<compile_context>
chip_gen: v7x
topology: tpu7x:2x2x1
jax: 0.10.0
libtpu: 0.0.40
codegen_flags: <defaults>
</compile_context>

<pallas_src>
import functools
import math

import jax
import jax.numpy as jnp
from jax import lax
from jax.experimental import pallas as pl
from jax.experimental.pallas import tpu as pltpu


def _layernorm(v, w, b, eps=1e-12):
    # TF-style LayerNorm (epsilon inside the sqrt), computed in f32.
    u = jnp.mean(v, axis=-1, keepdims=True)
    d = v - u
    s = jnp.mean(d * d, axis=-1, keepdims=True)
    return w * (d / jnp.sqrt(s + eps)) + b


def layer_kernel(x_full_ref, x_tile_ref, mask_ref,
                 ln1w_ref, ln1b_ref,
                 wqkv_ref, bqkv_ref,
                 ln2w_ref, ln2b_ref,
                 w1_ref, b1_ref, w2_ref, b2_ref,
                 out_ref,
                 q_vmem, k_vmem, v_vmem,
                 *, scale, q_block, hidden, n_chunks):
    iq = pl.program_id(1)
    H = hidden

    # ---- Q / K / V for the whole sequence: fused projection, once per batch,
    #      chunked over q_block-row slabs, cached in VMEM as bf16 (Q pre-scaled).
    @pl.when(iq == 0)
    def _():
        ln1w = ln1w_ref[...]
        ln1b = ln1b_ref[...]
        wqkv = wqkv_ref[...]          # (H, 3H) bf16
        bqkv = bqkv_ref[...]          # (1, 3H) f32

        def body(c, carry):
            r0 = pl.multiple_of(c * q_block, q_block)
            xc = x_full_ref[pl.ds(r0, q_block), :]                       # (TQ, H) f32
            lnc = _layernorm(xc, ln1w, ln1b).astype(jnp.bfloat16)
            qkv = jnp.dot(lnc, wqkv,
                          preferred_element_type=jnp.float32) + bqkv     # (TQ, 3H) f32
            q_vmem[pl.ds(r0, q_block), :] = (qkv[:, :H] * scale).astype(jnp.bfloat16)
            k_vmem[pl.ds(r0, q_block), :] = qkv[:, H:2 * H].astype(jnp.bfloat16)
            v_vmem[pl.ds(r0, q_block), :] = qkv[:, 2 * H:].astype(jnp.bfloat16)
            return carry

        lax.fori_loop(0, n_chunks, body, 0)

    # ---- current query tile: scores = (Q@K^T * mask) * 1/sqrt(d) (scale folded
    #      into Q); threshold; softmax; @V; residual 1.
    row0 = pl.multiple_of(iq * q_block, q_block)
    q_tile = q_vmem[pl.ds(row0, q_block), :]                              # (TQ, H) bf16
    scores = lax.dot_general(q_tile, k_vmem[...],
                             (((1,), (1,)), ((), ())),
                             preferred_element_type=jnp.float32)          # (TQ, S) f32
    scores = scores * mask_ref[pl.ds(row0, q_block), :]
    scores = jnp.where(scores < 0.001, -10000.0, scores)
    m = jnp.max(scores, axis=-1, keepdims=True)
    e = jnp.exp(scores - m)
    p = (e * pl.reciprocal(jnp.sum(e, axis=-1, keepdims=True),
                           approx=True)).astype(jnp.bfloat16)

    x_q = x_tile_ref[...]                                                 # (TQ, H) f32
    attn = jnp.dot(p, v_vmem[...],
                   preferred_element_type=jnp.float32) + x_q              # residual 1

    # ---- PointWiseFeedForward
    ln2 = _layernorm(attn, ln2w_ref[...], ln2b_ref[...]).astype(jnp.bfloat16)
    h = jnp.dot(ln2, w1_ref[...],
                preferred_element_type=jnp.float32) + b1_ref[...]
    h = jnp.maximum(h, 0.0).astype(jnp.bfloat16)                          # ReLU
    h = jnp.dot(h, w2_ref[...],
                preferred_element_type=jnp.float32) + b2_ref[...]

    out_ref[...] = (h + attn).astype(out_ref.dtype)                       # residual 2


def _pick_q_block(S):
    # 256 fills the v6e/v7x MXU M-dim, 128 fills v5e's; fall back for short S.
    for t in (256, 128, 64, 32, 16, 8):
        if t <= S and S % t == 0:
            return t
    return S


def _vmem_limit_bytes(B, S, H, q_block, single_buffer):
    wbuf = 1 if single_buffer else 2
    need = 0
    need += (1 if single_buffer else 2) * S * H * 4     # full-x view
    need += 2 * q_block * H * 4                         # per-tile x view (double-buffered)
    need += (1 if single_buffer else 2) * S * S * 4     # resident mask
    need += wbuf * 5 * H * H * 2                        # Wqkv + W1 + W2 (bf16)
    need += wbuf * 16 * H * 4                           # biases / LN params (approx)
    need += 2 * q_block * H * 4                         # output tile
    need += 3 * S * H * 2                               # Q/K/V scratch (bf16)
    want = int(need * 1.3) + (4 << 20)                  # margin for compiler scratch
    try:
        cap = getattr(pltpu.get_tpu_info(), "vmem_capacity_bytes", None)
    except Exception:
        cap = None
    if not cap:
        cap = 64 << 20                                  # conservative: v7x per-TC VMEM
    return int(max(32 << 20, min(want, int(cap) - (8 << 20))))


def _layer_forward(x, mask, params, num_heads, q_block, out_dtype, single_buffer):
    B, S, H = x.shape
    head_size = H // num_heads
    scale = 1.0 / math.sqrt(head_size)

    if q_block is None:
        q_block = _pick_q_block(S)
    if S % q_block != 0:
        raise ValueError("q_block must divide the sequence length")
    n_q = S // q_block

    # Grid-invariant specs: loaded once, single-buffered when supported.
    def invariant(shape):
        idx = lambda b, q: (0,) * len(shape)
        if single_buffer:
            return pl.BlockSpec(shape, idx, pipeline_mode=pl.Buffered(buffer_count=1))
        return pl.BlockSpec(shape, idx)

    mat_hh = invariant((H, H))
    vec_h = invariant((1, H))

    if single_buffer:
        x_full_spec = pl.BlockSpec((None, S, H), lambda b, q: (b, 0, 0),
                                   pipeline_mode=pl.Buffered(buffer_count=1))
    else:
        x_full_spec = pl.BlockSpec((None, S, H), lambda b, q: (b, 0, 0))
    x_tile_spec = pl.BlockSpec((None, q_block, H), lambda b, q: (b, q, 0))

    if mask.ndim == 2:      # (S, S) shared across the batch -> resident, DMA'd once
        mask_spec = invariant((S, S))
    else:                   # (B, S, S) per-batch mask
        mask_spec = pl.BlockSpec((None, S, S), lambda b, q: (b, 0, 0))

    kernel = functools.partial(layer_kernel, scale=scale, q_block=q_block,
                               hidden=H, n_chunks=n_q)

    return pl.pallas_call(
        kernel,
        out_shape=jax.ShapeDtypeStruct((B, S, H), out_dtype),
        grid=(B, n_q),
        in_specs=[
            x_full_spec,                    # x: full sequence (step-0 QKV projection)
            x_tile_spec,                    # x: query tile (residual 1)
            mask_spec,                      # attention mask
            vec_h, vec_h,                   # ln1 w, b
            invariant((H, 3 * H)),          # fused Wqkv (bf16)
            invariant((1, 3 * H)),          # fused bqkv
            vec_h, vec_h,                   # ln2 w, b
            mat_hh, vec_h,                  # W1, b1
            mat_hh, vec_h,                  # W2, b2
        ],
        out_specs=pl.BlockSpec((None, q_block, H), lambda b, q: (b, q, 0)),
        scratch_shapes=[
            pltpu.VMEM((S, H), jnp.bfloat16),   # cached Q (pre-scaled)
            pltpu.VMEM((S, H), jnp.bfloat16),   # cached K
            pltpu.VMEM((S, H), jnp.bfloat16),   # cached V
        ],
        compiler_params=pltpu.CompilerParams(
            dimension_semantics=("parallel", "arbitrary"),
            vmem_limit_bytes=_vmem_limit_bytes(B, S, H, q_block, single_buffer)),
    )(x, x, mask,
      params["ln1_w"], params["ln1_b"],
      params["wqkv"], params["bqkv"],
      params["ln2_w"], params["ln2_b"],
      params["w1"], params["b1"],
      params["w2"], params["b2"])


def layer_forward(x, mask, params, num_heads, q_block=None, out_dtype=jnp.float32):
    if x.ndim != 3:
        raise ValueError("hidden_states must be (B, S, H)")
    if mask.ndim not in (2, 3):
        raise ValueError("attention_mask must be (S, S) or (B, S, S)")
    try:
        return _layer_forward(x, mask, params, num_heads, q_block, out_dtype,
                              single_buffer=True)
    except Exception:
        # Only the single-buffered (pl.Buffered(1)) lowering is being probed above;
        # a genuine error will reproduce and surface from this retry, which uses
        # default double buffering.
        return _layer_forward(x, mask, params, num_heads, q_block, out_dtype,
                              single_buffer=False)


def make_params(key, H):
    """Deterministic synthetic parameters. Linear weights stored as (in, out)."""
    ks = jax.random.split(key, 10)

    def lin(k):
        return jax.random.normal(k, (H, H), jnp.float32) * 0.05

    def vec(k):
        return jax.random.normal(k, (1, H), jnp.float32) * 0.05

    return {
        "ln1_w": jnp.ones((1, H), jnp.float32),
        "ln1_b": jnp.zeros((1, H), jnp.float32),
        "wq": lin(ks[0]), "bq": vec(ks[1]),
        "wk": lin(ks[2]), "bk": vec(ks[3]),
        "wv": lin(ks[4]), "bv": vec(ks[5]),
        "ln2_w": jnp.ones((1, H), jnp.float32),
        "ln2_b": jnp.zeros((1, H), jnp.float32),
        "w1": lin(ks[6]), "b1": vec(ks[7]),
        "w2": lin(ks[8]), "b2": vec(ks[9]),
    }


def prepare_layer_params(params):
    """One-time prep: fuse Q/K/V into (H, 3H) and pre-cast matmul weights to bf16."""
    wqkv = jnp.concatenate([params["wq"], params["wk"], params["wv"]],
                           axis=1).astype(jnp.bfloat16)
    bqkv = jnp.concatenate([params["bq"], params["bk"], params["bv"]], axis=1)
    return {
        "ln1_w": params["ln1_w"], "ln1_b": params["ln1_b"],
        "wqkv": wqkv, "bqkv": bqkv,
        "ln2_w": params["ln2_w"], "ln2_b": params["ln2_b"],
        "w1": params["w1"].astype(jnp.bfloat16), "b1": params["b1"],
        "w2": params["w2"].astype(jnp.bfloat16), "b2": params["b2"],
    }


if __name__ == "__main__":
    # Small but lane-dense demo shapes (H multiple of 128); q_block=16 exercises
    # the multi-query-tile path and cached Q/K/V reuse across grid steps.
    # Production callers should pass q_block=None (auto -> 256/128).
    B, S, H, NUM_HEADS = 2, 32, 128, 4

    key = jax.random.PRNGKey(0)
    kx, kp = jax.random.split(key)

    x = jax.random.normal(kx, (B, S, H), jnp.float32)
    # Causal 0/1 multiplicative mask, shared across the batch (as in the reference
    # it multiplies the raw scores).
    mask = jnp.tril(jnp.ones((S, S), jnp.float32))

    params = prepare_layer_params(make_params(kp, H))

    out = layer_forward(x, mask, params, NUM_HEADS, q_block=16)
    jax.block_until_ready(out)

    assert out.shape == (B, S, H)
    assert bool(jnp.all(jnp.isfinite(out)))
    print("KERNEL_OK")
</pallas_src>

<mosaic_0001>
module attributes {stable_mosaic.version = 11 : i64} {
  func.func @layer_kernel(%arg0: i32, %arg1: i32, %arg2: memref<1x32x128xf32, #tpu.memory_space<vmem>>, %arg3: memref<1x16x128xf32, #tpu.memory_space<vmem>>, %arg4: memref<32x32xf32, #tpu.memory_space<vmem>>, %arg5: memref<1x128xf32, #tpu.memory_space<vmem>>, %arg6: memref<1x128xf32, #tpu.memory_space<vmem>>, %arg7: memref<128x384xbf16, #tpu.memory_space<vmem>>, %arg8: memref<1x384xf32, #tpu.memory_space<vmem>>, %arg9: memref<1x128xf32, #tpu.memory_space<vmem>>, %arg10: memref<1x128xf32, #tpu.memory_space<vmem>>, %arg11: memref<128x128xbf16, #tpu.memory_space<vmem>>, %arg12: memref<1x128xf32, #tpu.memory_space<vmem>>, %arg13: memref<128x128xbf16, #tpu.memory_space<vmem>>, %arg14: memref<1x128xf32, #tpu.memory_space<vmem>>, %arg15: memref<1x16x128xf32, #tpu.memory_space<vmem>>, %arg16: memref<32x128xbf16, #tpu.memory_space<vmem>>, %arg17: memref<32x128xbf16, #tpu.memory_space<vmem>>, %arg18: memref<32x128xbf16, #tpu.memory_space<vmem>>) attributes {dimension_semantics = [#tpu.dimension_semantics<parallel>, #tpu.dimension_semantics<arbitrary>], iteration_bounds = array<i64: 2, 2>, scalar_prefetch = 0 : i64, scratch_operands = 3 : i64, tpu.core_type = #tpu.core_type<tc>, window_params = [{pipeline_mode = #tpu.pipeline_mode<synchronous>, transform_indices = @transform_0, window_bounds = array<i64: 1, 32, 128>}, {transform_indices = @transform_1, window_bounds = array<i64: 1, 16, 128>}, {pipeline_mode = #tpu.pipeline_mode<synchronous>, transform_indices = @transform_2, window_bounds = array<i64: 32, 32>}, {pipeline_mode = #tpu.pipeline_mode<synchronous>, transform_indices = @transform_3, window_bounds = array<i64: 1, 128>}, {pipeline_mode = #tpu.pipeline_mode<synchronous>, transform_indices = @transform_4, window_bounds = array<i64: 1, 128>}, {pipeline_mode = #tpu.pipeline_mode<synchronous>, transform_indices = @transform_5, window_bounds = array<i64: 128, 384>}, {pipeline_mode = #tpu.pipeline_mode<synchronous>, transform_indices = @transform_6, window_bounds = array<i64: 1, 384>}, {pipeline_mode = #tpu.pipeline_mode<synchronous>, transform_indices = @transform_7, window_bounds = array<i64: 1, 128>}, {pipeline_mode = #tpu.pipeline_mode<synchronous>, transform_indices = @transform_8, window_bounds = array<i64: 1, 128>}, {pipeline_mode = #tpu.pipeline_mode<synchronous>, transform_indices = @transform_9, window_bounds = array<i64: 128, 128>}, {pipeline_mode = #tpu.pipeline_mode<synchronous>, transform_indices = @transform_10, window_bounds = array<i64: 1, 128>}, {pipeline_mode = #tpu.pipeline_mode<synchronous>, transform_indices = @transform_11, window_bounds = array<i64: 128, 128>}, {pipeline_mode = #tpu.pipeline_mode<synchronous>, transform_indices = @transform_12, window_bounds = array<i64: 1, 128>}, {transform_indices = @transform_13, window_bounds = array<i64: 1, 16, 128>}]} {
    %c0_i32 = arith.constant 0 : i32
    %0 = arith.cmpi eq, %arg1, %c0_i32 : i32
    %1 = arith.extui %0 : i1 to i32
    %c0_i32_0 = arith.constant 0 : i32
    %2 = arith.cmpi ne, %1, %c0_i32_0 : i32
    scf.if %2 {
      %c0_37 = arith.constant 0 : index
      %c0_38 = arith.constant 0 : index
      %72 = vector.load %arg5[%c0_37, %c0_38] : memref<1x128xf32, #tpu.memory_space<vmem>>, vector<1x128xf32>
      %c0_39 = arith.constant 0 : index
      %c0_40 = arith.constant 0 : index
      %73 = vector.load %arg6[%c0_39, %c0_40] : memref<1x128xf32, #tpu.memory_space<vmem>>, vector<1x128xf32>
      %c0_41 = arith.constant 0 : index
      %c0_42 = arith.constant 0 : index
      %74 = vector.load %arg7[%c0_41, %c0_42] : memref<128x384xbf16, #tpu.memory_space<vmem>>, vector<128x384xbf16>
      %c0_43 = arith.constant 0 : index
      %c0_44 = arith.constant 0 : index
      %75 = vector.load %arg8[%c0_43, %c0_44] : memref<1x384xf32, #tpu.memory_space<vmem>>, vector<1x384xf32>
      %c0_i32_45 = arith.constant 0 : i32
      %c2_i32 = arith.constant 2 : i32
      %76 = arith.addi %c0_i32_45, %c2_i32 : i32
      %c1_i32 = arith.constant 1 : i32
      scf.for %arg19 = %c0_i32_45 to %76 step %c1_i32  : i32 {
        %c16_i32_47 = arith.constant 16 : i32
        %77 = arith.muli %arg19, %c16_i32_47 : i32
        %78 = tpu.assume_multiple %77, 16 : i32
        %c0_48 = arith.constant 0 : index
        %79 = arith.index_cast %78 : i32 to index
        %c0_49 = arith.constant 0 : index
        %80 = vector.load %arg2[%c0_48, %79, %c0_49] : memref<1x32x128xf32, #tpu.memory_space<vmem>>, vector<1x16x128xf32>
        %81 = vector.shape_cast %80 : vector<1x16x128xf32> to vector<16x128xf32>
        %cst_50 = arith.constant dense<0.000000e+00> : vector<16xf32>
        %82 = vector.multi_reduction <add>, %81, %cst_50 [1] : vector<16x128xf32> to vector<16xf32>
        %83 = vector.shape_cast %82 : vector<16xf32> to vector<16x1xf32>
        %cst_51 = arith.constant 1.280000e+02 : f32
        %84 = vector.broadcast %cst_51 : f32 to vector<16x1xf32>
        %85 = arith.divf %83, %84 : vector<16x1xf32>
        %86 = vector.broadcast %85 : vector<16x1xf32> to vector<16x128xf32>
        %87 = arith.subf %81, %86 : vector<16x128xf32>
        %88 = arith.mulf %87, %87 : vector<16x128xf32>
        %cst_52 = arith.constant dense<0.000000e+00> : vector<16xf32>
        %89 = vector.multi_reduction <add>, %88, %cst_52 [1] : vector<16x128xf32> to vector<16xf32>
        %90 = vector.shape_cast %89 : vector<16xf32> to vector<16x1xf32>
        %cst_53 = arith.constant 1.280000e+02 : f32
        %91 = vector.broadcast %cst_53 : f32 to vector<16x1xf32>
        %92 = arith.divf %90, %91 : vector<16x1xf32>
        %cst_54 = arith.constant 9.99999996E-13 : f32
        %93 = vector.broadcast %cst_54 : f32 to vector<16x1xf32>
        %94 = arith.addf %92, %93 : vector<16x1xf32>
        %95 = math.sqrt %94 : vector<16x1xf32>
        %96 = vector.broadcast %95 : vector<16x1xf32> to vector<16x128xf32>
        %97 = arith.divf %87, %96 : vector<16x128xf32>
        %98 = vector.broadcast %72 : vector<1x128xf32> to vector<16x128xf32>
        %99 = arith.mulf %98, %97 : vector<16x128xf32>
        %100 = vector.broadcast %73 : vector<1x128xf32> to vector<16x128xf32>
        %101 = arith.addf %99, %100 : vector<16x128xf32>
        %102 = arith.truncf %101 : vector<16x128xf32> to vector<16x128xbf16>
        %cst_55 = arith.constant dense<0.000000e+00> : vector<16x384xf32>
        %103 = tpu.matmul %102, %74, %cst_55 {dimension_numbers = #tpu.dot_dimension_numbers<[1], [0], [0], [1], [0, 0, 1, 1], [], []>} : vector<16x128xbf16>, vector<128x384xbf16>, vector<16x384xf32> -> vector<16x384xf32>
        %104 = vector.broadcast %75 : vector<1x384xf32> to vector<16x384xf32>
        %105 = arith.addf %103, %104 : vector<16x384xf32>
        %106 = vector.extract_strided_slice %105 {offsets = [0, 0], sizes = [16, 128], strides = [1, 1]} : vector<16x384xf32> to vector<16x128xf32>
        %cst_56 = arith.constant 0.176776692 : f32
        %107 = vector.broadcast %cst_56 : f32 to vector<16x128xf32>
        %108 = arith.mulf %106, %107 : vector<16x128xf32>
        %109 = arith.truncf %108 : vector<16x128xf32> to vector<16x128xbf16>
        %110 = arith.index_cast %78 : i32 to index
        %c0_57 = arith.constant 0 : index
        %111 = vector.load %arg16[%110, %c0_57] : memref<32x128xbf16, #tpu.memory_space<vmem>>, vector<16x128xbf16>
        tpu.vector_store %arg16[%110, %c0_57], %109 {strides = array<i32>} : memref<32x128xbf16, #tpu.memory_space<vmem>>, vector<16x128xbf16>,
        %112 = vector.extract_strided_slice %105 {offsets = [0, 128], sizes = [16, 128], strides = [1, 1]} : vector<16x384xf32> to vector<16x128xf32>
        %113 = arith.truncf %112 : vector<16x128xf32> to vector<16x128xbf16>
        %114 = arith.index_cast %78 : i32 to index
        %c0_58 = arith.constant 0 : index
        %115 = vector.load %arg17[%114, %c0_58] : memref<32x128xbf16, #tpu.memory_space<vmem>>, vector<16x128xbf16>
        tpu.vector_store %arg17[%114, %c0_58], %113 {strides = array<i32>} : memref<32x128xbf16, #tpu.memory_space<vmem>>, vector<16x128xbf16>,
        %116 = vector.extract_strided_slice %105 {offsets = [0, 256], sizes = [16, 128], strides = [1, 1]} : vector<16x384xf32> to vector<16x128xf32>
        %117 = arith.truncf %116 : vector<16x128xf32> to vector<16x128xbf16>
        %118 = arith.index_cast %78 : i32 to index
        %c0_59 = arith.constant 0 : index
        %119 = vector.load %arg18[%118, %c0_59] : memref<32x128xbf16, #tpu.memory_space<vmem>>, vector<16x128xbf16>
        tpu.vector_store %arg18[%118, %c0_59], %117 {strides = array<i32>} : memref<32x128xbf16, #tpu.memory_space<vmem>>, vector<16x128xbf16>,
      }
      %c2_i32_46 = arith.constant 2 : i32
    } else {
    }
    %c16_i32 = arith.constant 16 : i32
    %3 = arith.muli %arg1, %c16_i32 : i32
    %4 = tpu.assume_multiple %3, 16 : i32
    %5 = arith.index_cast %4 : i32 to index
    %c0 = arith.constant 0 : index
    %6 = vector.load %arg16[%5, %c0] : memref<32x128xbf16, #tpu.memory_space<vmem>>, vector<16x128xbf16>
    %c0_1 = arith.constant 0 : index
    %c0_2 = arith.constant 0 : index
    %7 = vector.load %arg17[%c0_1, %c0_2] : memref<32x128xbf16, #tpu.memory_space<vmem>>, vector<32x128xbf16>
    %cst = arith.constant dense<0.000000e+00> : vector<16x32xf32>
    %8 = tpu.matmul %6, %7, %cst {dimension_numbers = #tpu.dot_dimension_numbers<[1], [1], [0], [0], [0, 0, 1, 0], [], []>} : vector<16x128xbf16>, vector<32x128xbf16>, vector<16x32xf32> -> vector<16x32xf32>
    %9 = arith.index_cast %4 : i32 to index
    %c0_3 = arith.constant 0 : index
    %10 = vector.load %arg4[%9, %c0_3] : memref<32x32xf32, #tpu.memory_space<vmem>>, vector<16x32xf32>
    %11 = arith.mulf %8, %10 : vector<16x32xf32>
    %cst_4 = arith.constant 1.000000e-03 : f32
    %12 = vector.broadcast %cst_4 : f32 to vector<16x32xf32>
    %13 = arith.cmpf olt, %11, %12 : vector<16x32xf32>
    %cst_5 = arith.constant -1.000000e+04 : f32
    %14 = vector.broadcast %cst_5 : f32 to vector<16x32xf32>
    %15 = arith.select %13, %14, %11 : vector<16x32xi1>, vector<16x32xf32>
    %cst_6 = arith.constant dense<0xFF800000> : vector<16xf32>
    %16 = vector.multi_reduction <maximumf>, %15, %cst_6 [1] : vector<16x32xf32> to vector<16xf32>
    %17 = vector.shape_cast %16 : vector<16xf32> to vector<16x1xf32>
    %18 = vector.broadcast %17 : vector<16x1xf32> to vector<16x32xf32>
    %19 = arith.subf %15, %18 : vector<16x32xf32>
    %20 = math.exp %19 : vector<16x32xf32>
    %cst_7 = arith.constant dense<0.000000e+00> : vector<16xf32>
    %21 = vector.multi_reduction <add>, %20, %cst_7 [1] : vector<16x32xf32> to vector<16xf32>
    %22 = vector.shape_cast %21 : vector<16xf32> to vector<16x1xf32>
    %23 = tpu.reciprocal %22 {approx = true} : vector<16x1xf32> -> vector<16x1xf32>
    %24 = vector.broadcast %23 : vector<16x1xf32> to vector<16x32xf32>
    %25 = arith.mulf %20, %24 : vector<16x32xf32>
    %26 = arith.truncf %25 : vector<16x32xf32> to vector<16x32xbf16>
    %c0_8 = arith.constant 0 : index
    %c0_9 = arith.constant 0 : index
    %c0_10 = arith.constant 0 : index
    %27 = vector.load %arg3[%c0_8, %c0_9, %c0_10] : memref<1x16x128xf32, #tpu.memory_space<vmem>>, vector<1x16x128xf32>
    %28 = vector.shape_cast %27 : vector<1x16x128xf32> to vector<16x128xf32>
    %c0_11 = arith.constant 0 : index
    %c0_12 = arith.constant 0 : index
    %29 = vector.load %arg18[%c0_11, %c0_12] : memref<32x128xbf16, #tpu.memory_space<vmem>>, vector<32x128xbf16>
    %cst_13 = arith.constant dense<0.000000e+00> : vector<16x128xf32>
    %30 = tpu.matmul %26, %29, %cst_13 {dimension_numbers = #tpu.dot_dimension_numbers<[1], [0], [0], [1], [0, 0, 1, 1], [], []>} : vector<16x32xbf16>, vector<32x128xbf16>, vector<16x128xf32> -> vector<16x128xf32>
    %31 = arith.addf %30, %28 : vector<16x128xf32>
    %c0_14 = arith.constant 0 : index
    %c0_15 = arith.constant 0 : index
    %32 = vector.load %arg9[%c0_14, %c0_15] : memref<1x128xf32, #tpu.memory_space<vmem>>, vector<1x128xf32>
    %c0_16 = arith.constant 0 : index
    %c0_17 = arith.constant 0 : index
    %33 = vector.load %arg10[%c0_16, %c0_17] : memref<1x128xf32, #tpu.memory_space<vmem>>, vector<1x128xf32>
    %cst_18 = arith.constant dense<0.000000e+00> : vector<16xf32>
    %34 = vector.multi_reduction <add>, %31, %cst_18 [1] : vector<16x128xf32> to vector<16xf32>
    %35 = vector.shape_cast %34 : vector<16xf32> to vector<16x1xf32>
    %cst_19 = arith.constant 1.280000e+02 : f32
    %36 = vector.broadcast %cst_19 : f32 to vector<16x1xf32>
    %37 = arith.divf %35, %36 : vector<16x1xf32>
    %38 = vector.broadcast %37 : vector<16x1xf32> to vector<16x128xf32>
    %39 = arith.subf %31, %38 : vector<16x128xf32>
    %40 = arith.mulf %39, %39 : vector<16x128xf32>
    %cst_20 = arith.constant dense<0.000000e+00> : vector<16xf32>
    %41 = vector.multi_reduction <add>, %40, %cst_20 [1] : vector<16x128xf32> to vector<16xf32>
    %42 = vector.shape_cast %41 : vector<16xf32> to vector<16x1xf32>
    %cst_21 = arith.constant 1.280000e+02 : f32
    %43 = vector.broadcast %cst_21 : f32 to vector<16x1xf32>
    %44 = arith.divf %42, %43 : vector<16x1xf32>
    %cst_22 = arith.constant 9.99999996E-13 : f32
    %45 = vector.broadcast %cst_22 : f32 to vector<16x1xf32>
    %46 = arith.addf %44, %45 : vector<16x1xf32>
    %47 = math.sqrt %46 : vector<16x1xf32>
    %48 = vector.broadcast %47 : vector<16x1xf32> to vector<16x128xf32>
    %49 = arith.divf %39, %48 : vector<16x128xf32>
    %50 = vector.broadcast %32 : vector<1x128xf32> to vector<16x128xf32>
    %51 = arith.mulf %50, %49 : vector<16x128xf32>
    %52 = vector.broadcast %33 : vector<1x128xf32> to vector<16x128xf32>
    %53 = arith.addf %51, %52 : vector<16x128xf32>
    %54 = arith.truncf %53 : vector<16x128xf32> to vector<16x128xbf16>
    %c0_23 = arith.constant 0 : index
    %c0_24 = arith.constant 0 : index
    %55 = vector.load %arg11[%c0_23, %c0_24] : memref<128x128xbf16, #tpu.memory_space<vmem>>, vector<128x128xbf16>
    %cst_25 = arith.constant dense<0.000000e+00> : vector<16x128xf32>
    %56 = tpu.matmul %54, %55, %cst_25 {dimension_numbers = #tpu.dot_dimension_numbers<[1], [0], [0], [1], [0, 0, 1, 1], [], []>} : vector<16x128xbf16>, vector<128x128xbf16>, vector<16x128xf32> -> vector<16x128xf32>
    %c0_26 = arith.constant 0 : index
    %c0_27 = arith.constant 0 : index
    %57 = vector.load %arg12[%c0_26, %c0_27] : memref<1x128xf32, #tpu.memory_space<vmem>>, vector<1x128xf32>
    %58 = vector.broadcast %57 : vector<1x128xf32> to vector<16x128xf32>
    %59 = arith.addf %56, %58 : vector<16x128xf32>
    %cst_28 = arith.constant 0.000000e+00 : f32
    %60 = vector.broadcast %cst_28 : f32 to vector<16x128xf32>
    %61 = arith.maximumf %59, %60 : vector<16x128xf32>
    %62 = arith.truncf %61 : vector<16x128xf32> to vector<16x128xbf16>
    %c0_29 = arith.constant 0 : index
    %c0_30 = arith.constant 0 : index
    %63 = vector.load %arg13[%c0_29, %c0_30] : memref<128x128xbf16, #tpu.memory_space<vmem>>, vector<128x128xbf16>
    %cst_31 = arith.constant dense<0.000000e+00> : vector<16x128xf32>
    %64 = tpu.matmul %62, %63, %cst_31 {dimension_numbers = #tpu.dot_dimension_numbers<[1], [0], [0], [1], [0, 0, 1, 1], [], []>} : vector<16x128xbf16>, vector<128x128xbf16>, vector<16x128xf32> -> vector<16x128xf32>
    %c0_32 = arith.constant 0 : index
    %c0_33 = arith.constant 0 : index
    %65 = vector.load %arg14[%c0_32, %c0_33] : memref<1x128xf32, #tpu.memory_space<vmem>>, vector<1x128xf32>
    %66 = vector.broadcast %65 : vector<1x128xf32> to vector<16x128xf32>
    %67 = arith.addf %64, %66 : vector<16x128xf32>
    %68 = arith.addf %67, %31 : vector<16x128xf32>
    %c0_34 = arith.constant 0 : index
    %c0_35 = arith.constant 0 : index
    %c0_36 = arith.constant 0 : index
    %69 = vector.load %arg15[%c0_34, %c0_35, %c0_36] : memref<1x16x128xf32, #tpu.memory_space<vmem>>, vector<1x16x128xf32>
    %70 = vector.shape_cast %69 : vector<1x16x128xf32> to vector<16x128xf32>
    %71 = vector.shape_cast %68 : vector<16x128xf32> to vector<1x16x128xf32>
    tpu.vector_store %arg15[%c0_34, %c0_35, %c0_36], %71 {strides = array<i32>} : memref<1x16x128xf32, #tpu.memory_space<vmem>>, vector<1x16x128xf32>,
    return
  }
  func.func @transform_0(%arg0: i32, %arg1: i32) -> (i32, i32, i32) {
    %c0_i32 = arith.constant 0 : i32
    %c0_i32_0 = arith.constant 0 : i32
    %c0_i32_1 = arith.constant 0 : i32
    return %arg0, %c0_i32, %c0_i32_0 : i32, i32, i32
  }
  func.func @transform_1(%arg0: i32, %arg1: i32) -> (i32, i32, i32) {
    %c0_i32 = arith.constant 0 : i32
    %c0_i32_0 = arith.constant 0 : i32
    return %arg0, %arg1, %c0_i32 : i32, i32, i32
  }
  func.func @transform_2(%arg0: i32, %arg1: i32) -> (i32, i32) {
    %c0_i32 = arith.constant 0 : i32
    %c0_i32_0 = arith.constant 0 : i32
    %c0_i32_1 = arith.constant 0 : i32
    return %c0_i32, %c0_i32_0 : i32, i32
  }
  func.func @transform_3(%arg0: i32, %arg1: i32) -> (i32, i32) {
    %c0_i32 = arith.constant 0 : i32
    %c0_i32_0 = arith.constant 0 : i32
    %c0_i32_1 = arith.constant 0 : i32
    return %c0_i32, %c0_i32_0 : i32, i32
  }
  func.func @transform_4(%arg0: i32, %arg1: i32) -> (i32, i32) {
    %c0_i32 = arith.constant 0 : i32
    %c0_i32_0 = arith.constant 0 : i32
    %c0_i32_1 = arith.constant 0 : i32
    return %c0_i32, %c0_i32_0 : i32, i32
  }
  func.func @transform_5(%arg0: i32, %arg1: i32) -> (i32, i32) {
    %c0_i32 = arith.constant 0 : i32
    %c0_i32_0 = arith.constant 0 : i32
    %c0_i32_1 = arith.constant 0 : i32
    return %c0_i32, %c0_i32_0 : i32, i32
  }
  func.func @transform_6(%arg0: i32, %arg1: i32) -> (i32, i32) {
    %c0_i32 = arith.constant 0 : i32
    %c0_i32_0 = arith.constant 0 : i32
    %c0_i32_1 = arith.constant 0 : i32
    return %c0_i32, %c0_i32_0 : i32, i32
  }
  func.func @transform_7(%arg0: i32, %arg1: i32) -> (i32, i32) {
    %c0_i32 = arith.constant 0 : i32
    %c0_i32_0 = arith.constant 0 : i32
    %c0_i32_1 = arith.constant 0 : i32
    return %c0_i32, %c0_i32_0 : i32, i32
  }
  func.func @transform_8(%arg0: i32, %arg1: i32) -> (i32, i32) {
    %c0_i32 = arith.constant 0 : i32
    %c0_i32_0 = arith.constant 0 : i32
    %c0_i32_1 = arith.constant 0 : i32
    return %c0_i32, %c0_i32_0 : i32, i32
  }
  func.func @transform_9(%arg0: i32, %arg1: i32) -> (i32, i32) {
    %c0_i32 = arith.constant 0 : i32
    %c0_i32_0 = arith.constant 0 : i32
    %c0_i32_1 = arith.constant 0 : i32
    return %c0_i32, %c0_i32_0 : i32, i32
  }
  func.func @transform_10(%arg0: i32, %arg1: i32) -> (i32, i32) {
    %c0_i32 = arith.constant 0 : i32
    %c0_i32_0 = arith.constant 0 : i32
    %c0_i32_1 = arith.constant 0 : i32
    return %c0_i32, %c0_i32_0 : i32, i32
  }
  func.func @transform_11(%arg0: i32, %arg1: i32) -> (i32, i32) {
    %c0_i32 = arith.constant 0 : i32
    %c0_i32_0 = arith.constant 0 : i32
    %c0_i32_1 = arith.constant 0 : i32
    return %c0_i32, %c0_i32_0 : i32, i32
  }
  func.func @transform_12(%arg0: i32, %arg1: i32) -> (i32, i32) {
    %c0_i32 = arith.constant 0 : i32
    %c0_i32_0 = arith.constant 0 : i32
    %c0_i32_1 = arith.constant 0 : i32
    return %c0_i32, %c0_i32_0 : i32, i32
  }
  func.func @transform_13(%arg0: i32, %arg1: i32) -> (i32, i32, i32) {
    %c0_i32 = arith.constant 0 : i32
    %c0_i32_0 = arith.constant 0 : i32
    return %arg0, %arg1, %c0_i32 : i32, i32, i32
  }
}

module attributes {stable_mosaic.version = 11 : i64} {
  func.func @layer_kernel(%arg0: i32, %arg1: i32, %arg2: memref<1x32x128xf32, #tpu.memory_space<vmem>>, %arg3: memref<1x16x128xf32, #tpu.memory_space<vmem>>, %arg4: memref<32x32xf32, #tpu.memory_space<vmem>>, %arg5: memref<1x128xf32, #tpu.memory_space<vmem>>, %arg6: memref<1x128xf32, #tpu.memory_space<vmem>>, %arg7: memref<128x384xbf16, #tpu.memory_space<vmem>>, %arg8: memref<1x384xf32, #tpu.memory_space<vmem>>, %arg9: memref<1x128xf32, #tpu.memory_space<vmem>>, %arg10: memref<1x128xf32, #tpu.memory_space<vmem>>, %arg11: memref<128x128xbf16, #tpu.memory_space<vmem>>, %arg12: memref<1x128xf32, #tpu.memory_space<vmem>>, %arg13: memref<128x128xbf16, #tpu.memory_space<vmem>>, %arg14: memref<1x128xf32, #tpu.memory_space<vmem>>, %arg15: memref<1x16x128xf32, #tpu.memory_space<vmem>>, %arg16: memref<32x128xbf16, #tpu.memory_space<vmem>>, %arg17: memref<32x128xbf16, #tpu.memory_space<vmem>>, %arg18: memref<32x128xbf16, #tpu.memory_space<vmem>>) attributes {dimension_semantics = [#tpu.dimension_semantics<parallel>, #tpu.dimension_semantics<arbitrary>], iteration_bounds = array<i64: 2, 2>, scalar_prefetch = 0 : i64, scratch_operands = 3 : i64, tpu.core_type = #tpu.core_type<tc>, window_params = [{transform_indices = @transform_0, window_bounds = array<i64: 1, 32, 128>}, {transform_indices = @transform_1, window_bounds = array<i64: 1, 16, 128>}, {pipeline_mode = #tpu.pipeline_mode<synchronous>, transform_indices = @transform_2, window_bounds = array<i64: 32, 32>}, {pipeline_mode = #tpu.pipeline_mode<synchronous>, transform_indices = @transform_3, window_bounds = array<i64: 1, 128>}, {pipeline_mode = #tpu.pipeline_mode<synchronous>, transform_indices = @transform_4, window_bounds = array<i64: 1, 128>}, {pipeline_mode = #tpu.pipeline_mode<synchronous>, transform_indices = @transform_5, window_bounds = array<i64: 128, 384>}, {pipeline_mode = #tpu.pipeline_mode<synchronous>, transform_indices = @transform_6, window_bounds = array<i64: 1, 384>}, {pipeline_mode = #tpu.pipeline_mode<synchronous>, transform_indices = @transform_7, window_bounds = array<i64: 1, 128>}, {pipeline_mode = #tpu.pipeline_mode<synchronous>, transform_indices = @transform_8, window_bounds = array<i64: 1, 128>}, {pipeline_mode = #tpu.pipeline_mode<synchronous>, transform_indices = @transform_9, window_bounds = array<i64: 128, 128>}, {pipeline_mode = #tpu.pipeline_mode<synchronous>, transform_indices = @transform_10, window_bounds = array<i64: 1, 128>}, {pipeline_mode = #tpu.pipeline_mode<synchronous>, transform_indices = @transform_11, window_bounds = array<i64: 128, 128>}, {pipeline_mode = #tpu.pipeline_mode<synchronous>, transform_indices = @transform_12, window_bounds = array<i64: 1, 128>}, {transform_indices = @transform_13, window_bounds = array<i64: 1, 16, 128>}]} {
    %c0_i32 = arith.constant 0 : i32
    %0 = arith.cmpi eq, %arg1, %c0_i32 : i32
    %1 = arith.extui %0 : i1 to i32
    %c0_i32_0 = arith.constant 0 : i32
    %2 = arith.cmpi ne, %1, %c0_i32_0 : i32
    scf.if %2 {
      %c0_37 = arith.constant 0 : index
      %c0_38 = arith.constant 0 : index
      %72 = vector.load %arg5[%c0_37, %c0_38] : memref<1x128xf32, #tpu.memory_space<vmem>>, vector<1x128xf32>
      %c0_39 = arith.constant 0 : index
      %c0_40 = arith.constant 0 : index
      %73 = vector.load %arg6[%c0_39, %c0_40] : memref<1x128xf32, #tpu.memory_space<vmem>>, vector<1x128xf32>
      %c0_41 = arith.constant 0 : index
      %c0_42 = arith.constant 0 : index
      %74 = vector.load %arg7[%c0_41, %c0_42] : memref<128x384xbf16, #tpu.memory_space<vmem>>, vector<128x384xbf16>
      %c0_43 = arith.constant 0 : index
      %c0_44 = arith.constant 0 : index
      %75 = vector.load %arg8[%c0_43, %c0_44] : memref<1x384xf32, #tpu.memory_space<vmem>>, vector<1x384xf32>
      %c0_i32_45 = arith.constant 0 : i32
      %c2_i32 = arith.constant 2 : i32
      %76 = arith.addi %c0_i32_45, %c2_i32 : i32
      %c1_i32 = arith.constant 1 : i32
      scf.for %arg19 = %c0_i32_45 to %76 step %c1_i32  : i32 {
        %c16_i32_47 = arith.constant 16 : i32
        %77 = arith.muli %arg19, %c16_i32_47 : i32
        %78 = tpu.assume_multiple %77, 16 : i32
        %c0_48 = arith.constant 0 : index
        %79 = arith.index_cast %78 : i32 to index
        %c0_49 = arith.constant 0 : index
        %80 = vector.load %arg2[%c0_48, %79, %c0_49] : memref<1x32x128xf32, #tpu.memory_space<vmem>>, vector<1x16x128xf32>
        %81 = vector.shape_cast %80 : vector<1x16x128xf32> to vector<16x128xf32>
        %cst_50 = arith.constant dense<0.000000e+00> : vector<16xf32>
        %82 = vector.multi_reduction <add>, %81, %cst_50 [1] : vector<16x128xf32> to vector<16xf32>
        %83 = vector.shape_cast %82 : vector<16xf32> to vector<16x1xf32>
        %cst_51 = arith.constant 1.280000e+02 : f32
        %84 = vector.broadcast %cst_51 : f32 to vector<16x1xf32>
        %85 = arith.divf %83, %84 : vector<16x1xf32>
        %86 = vector.broadcast %85 : vector<16x1xf32> to vector<16x128xf32>
        %87 = arith.subf %81, %86 : vector<16x128xf32>
        %88 = arith.mulf %87, %87 : vector<16x128xf32>
        %cst_52 = arith.constant dense<0.000000e+00> : vector<16xf32>
        %89 = vector.multi_reduction <add>, %88, %cst_52 [1] : vector<16x128xf32> to vector<16xf32>
        %90 = vector.shape_cast %89 : vector<16xf32> to vector<16x1xf32>
        %cst_53 = arith.constant 1.280000e+02 : f32
        %91 = vector.broadcast %cst_53 : f32 to vector<16x1xf32>
        %92 = arith.divf %90, %91 : vector<16x1xf32>
        %cst_54 = arith.constant 9.99999996E-13 : f32
        %93 = vector.broadcast %cst_54 : f32 to vector<16x1xf32>
        %94 = arith.addf %92, %93 : vector<16x1xf32>
        %95 = math.sqrt %94 : vector<16x1xf32>
        %96 = vector.broadcast %95 : vector<16x1xf32> to vector<16x128xf32>
        %97 = arith.divf %87, %96 : vector<16x128xf32>
        %98 = vector.broadcast %72 : vector<1x128xf32> to vector<16x128xf32>
        %99 = arith.mulf %98, %97 : vector<16x128xf32>
        %100 = vector.broadcast %73 : vector<1x128xf32> to vector<16x128xf32>
        %101 = arith.addf %99, %100 : vector<16x128xf32>
        %102 = arith.truncf %101 : vector<16x128xf32> to vector<16x128xbf16>
        %cst_55 = arith.constant dense<0.000000e+00> : vector<16x384xf32>
        %103 = tpu.matmul %102, %74, %cst_55 {dimension_numbers = #tpu.dot_dimension_numbers<[1], [0], [0], [1], [0, 0, 1, 1], [], []>} : vector<16x128xbf16>, vector<128x384xbf16>, vector<16x384xf32> -> vector<16x384xf32>
        %104 = vector.broadcast %75 : vector<1x384xf32> to vector<16x384xf32>
        %105 = arith.addf %103, %104 : vector<16x384xf32>
        %106 = vector.extract_strided_slice %105 {offsets = [0, 0], sizes = [16, 128], strides = [1, 1]} : vector<16x384xf32> to vector<16x128xf32>
        %cst_56 = arith.constant 0.176776692 : f32
        %107 = vector.broadcast %cst_56 : f32 to vector<16x128xf32>
        %108 = arith.mulf %106, %107 : vector<16x128xf32>
        %109 = arith.truncf %108 : vector<16x128xf32> to vector<16x128xbf16>
        %110 = arith.index_cast %78 : i32 to index
        %c0_57 = arith.constant 0 : index
        %111 = vector.load %arg16[%110, %c0_57] : memref<32x128xbf16, #tpu.memory_space<vmem>>, vector<16x128xbf16>
        tpu.vector_store %arg16[%110, %c0_57], %109 {strides = array<i32>} : memref<32x128xbf16, #tpu.memory_space<vmem>>, vector<16x128xbf16>,
        %112 = vector.extract_strided_slice %105 {offsets = [0, 128], sizes = [16, 128], strides = [1, 1]} : vector<16x384xf32> to vector<16x128xf32>
        %113 = arith.truncf %112 : vector<16x128xf32> to vector<16x128xbf16>
        %114 = arith.index_cast %78 : i32 to index
        %c0_58 = arith.constant 0 : index
        %115 = vector.load %arg17[%114, %c0_58] : memref<32x128xbf16, #tpu.memory_space<vmem>>, vector<16x128xbf16>
        tpu.vector_store %arg17[%114, %c0_58], %113 {strides = array<i32>} : memref<32x128xbf16, #tpu.memory_space<vmem>>, vector<16x128xbf16>,
        %116 = vector.extract_strided_slice %105 {offsets = [0, 256], sizes = [16, 128], strides = [1, 1]} : vector<16x384xf32> to vector<16x128xf32>
        %117 = arith.truncf %116 : vector<16x128xf32> to vector<16x128xbf16>
        %118 = arith.index_cast %78 : i32 to index
        %c0_59 = arith.constant 0 : index
        %119 = vector.load %arg18[%118, %c0_59] : memref<32x128xbf16, #tpu.memory_space<vmem>>, vector<16x128xbf16>
        tpu.vector_store %arg18[%118, %c0_59], %117 {strides = array<i32>} : memref<32x128xbf16, #tpu.memory_space<vmem>>, vector<16x128xbf16>,
      }
      %c2_i32_46 = arith.constant 2 : i32
    } else {
    }
    %c16_i32 = arith.constant 16 : i32
    %3 = arith.muli %arg1, %c16_i32 : i32
    %4 = tpu.assume_multiple %3, 16 : i32
    %5 = arith.index_cast %4 : i32 to index
    %c0 = arith.constant 0 : index
    %6 = vector.load %arg16[%5, %c0] : memref<32x128xbf16, #tpu.memory_space<vmem>>, vector<16x128xbf16>
    %c0_1 = arith.constant 0 : index
    %c0_2 = arith.constant 0 : index
    %7 = vector.load %arg17[%c0_1, %c0_2] : memref<32x128xbf16, #tpu.memory_space<vmem>>, vector<32x128xbf16>
    %cst = arith.constant dense<0.000000e+00> : vector<16x32xf32>
    %8 = tpu.matmul %6, %7, %cst {dimension_numbers = #tpu.dot_dimension_numbers<[1], [1], [0], [0], [0, 0, 1, 0], [], []>} : vector<16x128xbf16>, vector<32x128xbf16>, vector<16x32xf32> -> vector<16x32xf32>
    %9 = arith.index_cast %4 : i32 to index
    %c0_3 = arith.constant 0 : index
    %10 = vector.load %arg4[%9, %c0_3] : memref<32x32xf32, #tpu.memory_space<vmem>>, vector<16x32xf32>
    %11 = arith.mulf %8, %10 : vector<16x32xf32>
    %cst_4 = arith.constant 1.000000e-03 : f32
    %12 = vector.broadcast %cst_4 : f32 to vector<16x32xf32>
    %13 = arith.cmpf olt, %11, %12 : vector<16x32xf32>
    %cst_5 = arith.constant -1.000000e+04 : f32
    %14 = vector.broadcast %cst_5 : f32 to vector<16x32xf32>
    %15 = arith.select %13, %14, %11 : vector<16x32xi1>, vector<16x32xf32>
    %cst_6 = arith.constant dense<0xFF800000> : vector<16xf32>
    %16 = vector.multi_reduction <maximumf>, %15, %cst_6 [1] : vector<16x32xf32> to vector<16xf32>
    %17 = vector.shape_cast %16 : vector<16xf32> to vector<16x1xf32>
    %18 = vector.broadcast %17 : vector<16x1xf32> to vector<16x32xf32>
    %19 = arith.subf %15, %18 : vector<16x32xf32>
    %20 = math.exp %19 : vector<16x32xf32>
    %cst_7 = arith.constant dense<0.000000e+00> : vector<16xf32>
    %21 = vector.multi_reduction <add>, %20, %cst_7 [1] : vector<16x32xf32> to vector<16xf32>
    %22 = vector.shape_cast %21 : vector<16xf32> to vector<16x1xf32>
    %23 = tpu.reciprocal %22 {approx = true} : vector<16x1xf32> -> vector<16x1xf32>
    %24 = vector.broadcast %23 : vector<16x1xf32> to vector<16x32xf32>
    %25 = arith.mulf %20, %24 : vector<16x32xf32>
    %26 = arith.truncf %25 : vector<16x32xf32> to vector<16x32xbf16>
    %c0_8 = arith.constant 0 : index
    %c0_9 = arith.constant 0 : index
    %c0_10 = arith.constant 0 : index
    %27 = vector.load %arg3[%c0_8, %c0_9, %c0_10] : memref<1x16x128xf32, #tpu.memory_space<vmem>>, vector<1x16x128xf32>
    %28 = vector.shape_cast %27 : vector<1x16x128xf32> to vector<16x128xf32>
    %c0_11 = arith.constant 0 : index
    %c0_12 = arith.constant 0 : index
    %29 = vector.load %arg18[%c0_11, %c0_12] : memref<32x128xbf16, #tpu.memory_space<vmem>>, vector<32x128xbf16>
    %cst_13 = arith.constant dense<0.000000e+00> : vector<16x128xf32>
    %30 = tpu.matmul %26, %29, %cst_13 {dimension_numbers = #tpu.dot_dimension_numbers<[1], [0], [0], [1], [0, 0, 1, 1], [], []>} : vector<16x32xbf16>, vector<32x128xbf16>, vector<16x128xf32> -> vector<16x128xf32>
    %31 = arith.addf %30, %28 : vector<16x128xf32>
    %c0_14 = arith.constant 0 : index
    %c0_15 = arith.constant 0 : index
    %32 = vector.load %arg9[%c0_14, %c0_15] : memref<1x128xf32, #tpu.memory_space<vmem>>, vector<1x128xf32>
    %c0_16 = arith.constant 0 : index
    %c0_17 = arith.constant 0 : index
    %33 = vector.load %arg10[%c0_16, %c0_17] : memref<1x128xf32, #tpu.memory_space<vmem>>, vector<1x128xf32>
    %cst_18 = arith.constant dense<0.000000e+00> : vector<16xf32>
    %34 = vector.multi_reduction <add>, %31, %cst_18 [1] : vector<16x128xf32> to vector<16xf32>
    %35 = vector.shape_cast %34 : vector<16xf32> to vector<16x1xf32>
    %cst_19 = arith.constant 1.280000e+02 : f32
    %36 = vector.broadcast %cst_19 : f32 to vector<16x1xf32>
    %37 = arith.divf %35, %36 : vector<16x1xf32>
    %38 = vector.broadcast %37 : vector<16x1xf32> to vector<16x128xf32>
    %39 = arith.subf %31, %38 : vector<16x128xf32>
    %40 = arith.mulf %39, %39 : vector<16x128xf32>
    %cst_20 = arith.constant dense<0.000000e+00> : vector<16xf32>
    %41 = vector.multi_reduction <add>, %40, %cst_20 [1] : vector<16x128xf32> to vector<16xf32>
    %42 = vector.shape_cast %41 : vector<16xf32> to vector<16x1xf32>
    %cst_21 = arith.constant 1.280000e+02 : f32
    %43 = vector.broadcast %cst_21 : f32 to vector<16x1xf32>
    %44 = arith.divf %42, %43 : vector<16x1xf32>
    %cst_22 = arith.constant 9.99999996E-13 : f32
    %45 = vector.broadcast %cst_22 : f32 to vector<16x1xf32>
    %46 = arith.addf %44, %45 : vector<16x1xf32>
    %47 = math.sqrt %46 : vector<16x1xf32>
    %48 = vector.broadcast %47 : vector<16x1xf32> to vector<16x128xf32>
    %49 = arith.divf %39, %48 : vector<16x128xf32>
    %50 = vector.broadcast %32 : vector<1x128xf32> to vector<16x128xf32>
    %51 = arith.mulf %50, %49 : vector<16x128xf32>
    %52 = vector.broadcast %33 : vector<1x128xf32> to vector<16x128xf32>
    %53 = arith.addf %51, %52 : vector<16x128xf32>
    %54 = arith.truncf %53 : vector<16x128xf32> to vector<16x128xbf16>
    %c0_23 = arith.constant 0 : index
    %c0_24 = arith.constant 0 : index
    %55 = vector.load %arg11[%c0_23, %c0_24] : memref<128x128xbf16, #tpu.memory_space<vmem>>, vector<128x128xbf16>
    %cst_25 = arith.constant dense<0.000000e+00> : vector<16x128xf32>
    %56 = tpu.matmul %54, %55, %cst_25 {dimension_numbers = #tpu.dot_dimension_numbers<[1], [0], [0], [1], [0, 0, 1, 1], [], []>} : vector<16x128xbf16>, vector<128x128xbf16>, vector<16x128xf32> -> vector<16x128xf32>
    %c0_26 = arith.constant 0 : index
    %c0_27 = arith.constant 0 : index
    %57 = vector.load %arg12[%c0_26, %c0_27] : memref<1x128xf32, #tpu.memory_space<vmem>>, vector<1x128xf32>
    %58 = vector.broadcast %57 : vector<1x128xf32> to vector<16x128xf32>
    %59 = arith.addf %56, %58 : vector<16x128xf32>
    %cst_28 = arith.constant 0.000000e+00 : f32
    %60 = vector.broadcast %cst_28 : f32 to vector<16x128xf32>
    %61 = arith.maximumf %59, %60 : vector<16x128xf32>
    %62 = arith.truncf %61 : vector<16x128xf32> to vector<16x128xbf16>
    %c0_29 = arith.constant 0 : index
    %c0_30 = arith.constant 0 : index
    %63 = vector.load %arg13[%c0_29, %c0_30] : memref<128x128xbf16, #tpu.memory_space<vmem>>, vector<128x128xbf16>
    %cst_31 = arith.constant dense<0.000000e+00> : vector<16x128xf32>
    %64 = tpu.matmul %62, %63, %cst_31 {dimension_numbers = #tpu.dot_dimension_numbers<[1], [0], [0], [1], [0, 0, 1, 1], [], []>} : vector<16x128xbf16>, vector<128x128xbf16>, vector<16x128xf32> -> vector<16x128xf32>
    %c0_32 = arith.constant 0 : index
    %c0_33 = arith.constant 0 : index
    %65 = vector.load %arg14[%c0_32, %c0_33] : memref<1x128xf32, #tpu.memory_space<vmem>>, vector<1x128xf32>
    %66 = vector.broadcast %65 : vector<1x128xf32> to vector<16x128xf32>
    %67 = arith.addf %64, %66 : vector<16x128xf32>
    %68 = arith.addf %67, %31 : vector<16x128xf32>
    %c0_34 = arith.constant 0 : index
    %c0_35 = arith.constant 0 : index
    %c0_36 = arith.constant 0 : index
    %69 = vector.load %arg15[%c0_34, %c0_35, %c0_36] : memref<1x16x128xf32, #tpu.memory_space<vmem>>, vector<1x16x128xf32>
    %70 = vector.shape_cast %69 : vector<1x16x128xf32> to vector<16x128xf32>
    %71 = vector.shape_cast %68 : vector<16x128xf32> to vector<1x16x128xf32>
    tpu.vector_store %arg15[%c0_34, %c0_35, %c0_36], %71 {strides = array<i32>} : memref<1x16x128xf32, #tpu.memory_space<vmem>>, vector<1x16x128xf32>,
    return
  }
  func.func @transform_0(%arg0: i32, %arg1: i32) -> (i32, i32, i32) {
    %c0_i32 = arith.constant 0 : i32
    %c0_i32_0 = arith.constant 0 : i32
    %c0_i32_1 = arith.constant 0 : i32
    return %arg0, %c0_i32, %c0_i32_0 : i32, i32, i32
  }
  func.func @transform_1(%arg0: i32, %arg1: i32) -> (i32, i32, i32) {
    %c0_i32 = arith.constant 0 : i32
    %c0_i32_0 = arith.constant 0 : i32
    return %arg0, %arg1, %c0_i32 : i32, i32, i32
  }
  func.func @transform_2(%arg0: i32, %arg1: i32) -> (i32, i32) {
    %c0_i32 = arith.constant 0 : i32
    %c0_i32_0 = arith.constant 0 : i32
    %c0_i32_1 = arith.constant 0 : i32
    return %c0_i32, %c0_i32_0 : i32, i32
  }
  func.func @transform_3(%arg0: i32, %arg1: i32) -> (i32, i32) {
    %c0_i32 = arith.constant 0 : i32
    %c0_i32_0 = arith.constant 0 : i32
    %c0_i32_1 = arith.constant 0 : i32
    return %c0_i32, %c0_i32_0 : i32, i32
  }
  func.func @transform_4(%arg0: i32, %arg1: i32) -> (i32, i32) {
    %c0_i32 = arith.constant 0 : i32
    %c0_i32_0 = arith.constant 0 : i32
    %c0_i32_1 = arith.constant 0 : i32
    return %c0_i32, %c0_i32_0 : i32, i32
  }
  func.func @transform_5(%arg0: i32, %arg1: i32) -> (i32, i32) {
    %c0_i32 = arith.constant 0 : i32
    %c0_i32_0 = arith.constant 0 : i32
    %c0_i32_1 = arith.constant 0 : i32
    return %c0_i32, %c0_i32_0 : i32, i32
  }
  func.func @transform_6(%arg0: i32, %arg1: i32) -> (i32, i32) {
    %c0_i32 = arith.constant 0 : i32
    %c0_i32_0 = arith.constant 0 : i32
    %c0_i32_1 = arith.constant 0 : i32
    return %c0_i32, %c0_i32_0 : i32, i32
  }
  func.func @transform_7(%arg0: i32, %arg1: i32) -> (i32, i32) {
    %c0_i32 = arith.constant 0 : i32
    %c0_i32_0 = arith.constant 0 : i32
    %c0_i32_1 = arith.constant 0 : i32
    return %c0_i32, %c0_i32_0 : i32, i32
  }
  func.func @transform_8(%arg0: i32, %arg1: i32) -> (i32, i32) {
    %c0_i32 = arith.constant 0 : i32
    %c0_i32_0 = arith.constant 0 : i32
    %c0_i32_1 = arith.constant 0 : i32
    return %c0_i32, %c0_i32_0 : i32, i32
  }
  func.func @transform_9(%arg0: i32, %arg1: i32) -> (i32, i32) {
    %c0_i32 = arith.constant 0 : i32
    %c0_i32_0 = arith.constant 0 : i32
    %c0_i32_1 = arith.constant 0 : i32
    return %c0_i32, %c0_i32_0 : i32, i32
  }
  func.func @transform_10(%arg0: i32, %arg1: i32) -> (i32, i32) {
    %c0_i32 = arith.constant 0 : i32
    %c0_i32_0 = arith.constant 0 : i32
    %c0_i32_1 = arith.constant 0 : i32
    return %c0_i32, %c0_i32_0 : i32, i32
  }
  func.func @transform_11(%arg0: i32, %arg1: i32) -> (i32, i32) {
    %c0_i32 = arith.constant 0 : i32
    %c0_i32_0 = arith.constant 0 : i32
    %c0_i32_1 = arith.constant 0 : i32
    return %c0_i32, %c0_i32_0 : i32, i32
  }
  func.func @transform_12(%arg0: i32, %arg1: i32) -> (i32, i32) {
    %c0_i32 = arith.constant 0 : i32
    %c0_i32_0 = arith.constant 0 : i32
    %c0_i32_1 = arith.constant 0 : i32
    return %c0_i32, %c0_i32_0 : i32, i32
  }
  func.func @transform_13(%arg0: i32, %arg1: i32) -> (i32, i32, i32) {
    %c0_i32 = arith.constant 0 : i32
    %c0_i32_0 = arith.constant 0 : i32
    return %arg0, %arg1, %c0_i32 : i32, i32, i32
  }
}

</mosaic_0001>

<bundles_post_ra>
// kernel: tpu_custom_call.1
= control target key start
LH: loop header
LB: loop body
LE: loop exit
PB: predicated region body
PF: predicated region fallthrough
CT: control target
= control target key end

     0   :  { %s2968_s0 = inlined_call_operand.hbm [shape: f32[2,32,128], index: 0, kind: input, shape index: {}]   ;;  %s2969_s1 = inlined_call_operand.hbm [shape: f32[2,32,128], index: 1, kind: input, shape index: {}]   ;;  %s2970_s2 = inlined_call_operand.hbm [shape: f32[32,32], index: 2, kind: input, shape index: {}]   ;;  %s2971_s3 = inlined_call_operand.vmem [shape: f32[1,128], index: 3, kind: input, shape index: {}]   ;;  %s2972_s4 = inlined_call_operand.vmem [shape: f32[1,128], index: 4, kind: input, shape index: {}]   ;;  %s2973_s5 = inlined_call_operand.hbm [shape: bf16[128,384], index: 5, kind: input, shape index: {}]   ;;  %s2974_s6 = inlined_call_operand.vmem [shape: f32[1,384], index: 6, kind: input, shape index: {}]   ;;  %s2975_s7 = inlined_call_operand.vmem [shape: f32[1,128], index: 7, kind: input, shape index: {}]   ;;  %s2976_s8 = inlined_call_operand.vmem [shape: f32[1,128], index: 8, kind: input, shape index: {}]   ;;  %s2977_s9 = inlined_call_operand.hbm [shape: bf16[128,128], index: 9, kind: input, shape index: {}]   ;;  %s2978_s10 = inlined_call_operand.vmem [shape: f32[1,128], index: 10, kind: input, shape index: {}]   ;;  %s2979_s11 = inlined_call_operand.hbm [shape: bf16[128,128], index: 11, kind: input, shape index: {}]   ;;  %s2980_s12 = inlined_call_operand.vmem [shape: f32[1,128], index: 12, kind: input, shape index: {}]   ;;  %s2981_s13 = inlined_call_operand.hbm [shape: f32[2,32,128], index: 13, kind: output, shape index: {}]  }
   0x1   :  { %3008 = sst [smem:[#allocation32_spill]] %s2968_s0 }
   0x2   :  { %3009 = sst [smem:[#allocation33_spill]] %s2969_s1 }
   0x3   :  { %3010 = sst [smem:[#allocation34_spill]] %s2970_s2 }
   0x4   :  { %3011 = sst [smem:[#allocation35_spill]] %s2971_s3 }
   0x5   :  { %3012 = sst [smem:[#allocation36_spill]] %s2972_s4 }
   0x6   :  { %3013 = sst [smem:[#allocation37_spill]] %s2973_s5 }
   0x7   :  { %3014 = sst [smem:[#allocation38_spill]] %s2974_s6 }
   0x8   :  { %3015 = sst [smem:[#allocation39_spill]] %s2975_s7 }
   0x9   :  { %3016 = sst [smem:[#allocation40_spill]] %s2976_s8 }
   0xa   :  { %3017 = sst [smem:[#allocation41_spill]] %s2977_s9 }
   0xb   :  { %3018 = sst [smem:[#allocation42_spill]] %s2978_s10 }
   0xc   :  { %3019 = sst [smem:[#allocation43_spill]] %s2979_s11 }
   0xd   :  { %3020 = sst [smem:[#allocation44_spill]] %s2980_s12 }
   0xe   :  { %3021 = sst [smem:[#allocation45_spill]] %s2981_s13 }
   0xf   :  { %18 = vsyncpa [#allocation6], 0 }
  0x10   :  { %19 = vsyncpa [#allocation9], 0 }
  0x11   :  { %21 = vsyncpa [#allocation9 + $0x1], 0 }
  0x12   :  { %22 = vsyncpa [#allocation12], 0 }
  0x13   :  { %23 = vsyncpa [#allocation15], 0 }
  0x14   :  { %24 = vsyncpa [#allocation7], 0 }
  0x15   :  { %26 = vsyncpa [#allocation7 + $0x1], 0  ;;  %s2311_s25 = smov 0   ;;  %s2313_s26 = smov 0  }
  0x16   :  { %s2315_s27 = smov 0   ;;  %s2317_s28 = smov 0  }
  0x17   :  { %s2319_s29 = smov 0   ;;  %s2321_s30 = smov 0  }
  0x18   :  { %s2323_s14 = smov 0   ;;  %s2325_s15 = smov 0  }
  0x19   :  { %s2327_s16 = smov 0   ;;  %s2329_s17 = smov 0  }
  0x1a   :  { %s2331_s18 = smov 0  }
  0x1b LB: > { %3022 = sst [smem:[#allocation23_spill]] %s2175_s25  ;;  %s2367_s19 = sadd.s32 4294967295, %s2215_s18   ;;  %s2215_s18 = sphi %s2331_s18, %s32_s18   ;;  %s2211_s17 = sphi %s2329_s17, %s3093_s17   ;;  %s2207_s16 = sphi %s2327_s16, %s3092_s16   ;;  %s2203_s15 = sphi %s2325_s15, %s3091_s15   ;;  %s2199_s14 = sphi %s2323_s14, %s3090_s14   ;;  %s2195_s30 = sphi %s2321_s30, %s3089_s30   ;;  %s2191_s29 = sphi %s2319_s29, %s3088_s29   ;;  %s2187_s28 = sphi %s2317_s28, %s3082_s28   ;;  %s2183_s27 = sphi %s2315_s27, %s3087_s27   ;;  %s2179_s26 = sphi %s2313_s26, %s3086_s26   ;;  %s2175_s25 = sphi %s2311_s25, %s3085_s25  }
  0x1c   : > { %3023 = sst [smem:[#allocation24_spill]] %s2191_s29  ;;  %s1501_s20 = sadd.s32 4294967294, %s2215_s18  }
  0x1d   : > { %3024 = sst [smem:[#allocation25_spill]] %s2199_s14  ;;  %p2986_p0 = scmp.eq.s32.totalorder %s2367_s19, 0 }
  0x1e   : > { %3025 = sst [smem:[#allocation26_spill]] %s2203_s15  ;;  %p92_p1 = scmp.ne.s32.totalorder %s2179_s26, %s2175_s25 }
  0x1f   : > { %p355_p3 = scmp.eq.s32.totalorder %s1501_s20, 3  ;;  %p1502_p5 = scmp.ge.s32.totalorder %s2215_s18, 1 }
  0x20   : > { %p2376_p4 = por %p92_p1, %p2986_p0  ;;  %p362_p7 = scmp.lt.s32.totalorder %s2215_s18, 5 }
  0x21   : > { %p2381_p6 = por %p355_p3, %p92_p1  ;;  %s2221_s24 = smov [#allocation10]  }
  0x22   : > { %s3026_s21 = scalar_select %p2376_p4, 1, 0 }
  0x23   : > { %s3028_s22 = scalar_select %p2381_p6, 1, 0 }
  0x24   : > { %3027 = sst [smem:[#allocation27_spill]] %s3026_s21  ;;  %p2386_p8 = pnand %p1502_p5, %p362_p7 }
  0x25   : > { %3029 = sst [smem:[#allocation28_spill]] %s3028_s22  ;;  %s390_s20 = sshll.u32 %s2221_s24, 4  ;;  %s391_s20 = int_to_ptr.vmem [resolvable:$true] %s390_s20 }
  0x26   : > { %s3030_s23 = scalar_select %p2386_p8, 1, 0 }
  0x27   : > { %p2985_p9 = pneg %p2386_p8  ;;  %s2222_s22 = smov [#allocation11]  }
  0x28   : > { %s409_s13 = sshll.u32 %s2222_s22, 4  ;;  %s3032_s2 = sld [smem:[#allocation34_spill]]  ;;  %s2401_s13 = int_to_ptr.vmem [resolvable:$true] %s409_s13 }
  0x29   : > { %p2397_p10 = pnand %p2985_p9, %p2986_p0 }
  0x2b   : > { %s3031_s25 = scalar_select %p2397_p10, 1, 0 }
  0x2c   : > { %p2411_p12 = pneg %p2397_p10 }
  0x2e   : > { %s1901_s8 = scalar_lea.hbm %s3032_s2, 512 }
  0x2f   : > { %p1902_p11 = scmp.ne.s32.totalorder %s3032_s2, %s1901_s8  ;;  %p1908_p3 = scmp.lt.u32.totalorder %s1901_s8, %s3032_s2 }
  0x30   : > { %s3033_s24 = scalar_select %p2411_p12, 1, 0 }
  0x31   : > { %p1904_p13 = pnand %p2411_p12, %p1902_p11 }
  0x33   : > { %p1905_p1 = pneg %p1904_p13 }
  0x35   : > { %p1910_p5 = pnand %p1908_p3, %p1905_p1 }
  0x37   : > { %1913 = shalt.err (!%p1910_p5)
}
  0x38   : > { %s1914_s10 = scalar_lea.vmem %s391_s20, 512  ;;  %p1922_p0 = scmp.lt.s32.totalorder %s391_s20, %s391_s20 }
  0x39   : > { %p1915_p7 = scmp.ne.s32.totalorder %s391_s20, %s1914_s10  ;;  %p1923_p6 = scmp.lt.s32.totalorder %s1914_s10, %s1914_s10 }
  0x3b   : > { %p1917_p2 = pnand %p1915_p7, %p2411_p12  ;;  %p1924_p4 = por %p1923_p6, %p1922_p0 }
  0x3d   : > { %p1918_p9 = pneg %p1917_p2 }
  0x3f   : > { %p1925_p8 = pnand %p1924_p4, %p1918_p9 }
  0x41   : > { %1928 = shalt.err (!%p1925_p8)
}
  0x42   : > { %s3000_s6 = smov 128   ;;  %s3001_s7 = smov 8  }
  0x43   : > { %1719 = dma.hbm_to_vmem [thread:$0]  (!%p2397_p10), %s3032_s2, 512, %s391_s20, [#allocation9], %s3000_s6, %s3000_s6, %s3001_s7  }
  0x44   : > { %s3034_s5 = sld [smem:[#allocation37_spill]] }
  0x4a   : > { %s1929_s3 = scalar_lea.hbm %s3034_s5, 3072 }
  0x4b   : > { %p1930_p0 = scmp.ne.s32.totalorder %s3034_s5, %s1929_s3  ;;  %p1936_p6 = scmp.lt.u32.totalorder %s1929_s3, %s3034_s5 }
  0x4d   : > { %p1932_p2 = pnand %p1930_p0, %p2411_p12 }
  0x4f   : > { %p1933_p4 = pneg %p1932_p2 }
  0x51   : > { %p1938_p8 = pnand %p1936_p6, %p1933_p4 }
  0x53   : > { %1941 = shalt.err (!%p1938_p8)
}
  0x54   : > { %s1942_s20 = scalar_lea.vmem %s2401_s13, 3072  ;;  %p1950_p1 = scmp.lt.s32.totalorder %s2401_s13, %s2401_s13 }
  0x55   : > { %p1943_p9 = scmp.ne.s32.totalorder %s2401_s13, %s1942_s20  ;;  %p1951_p3 = scmp.lt.s32.totalorder %s1942_s20, %s1942_s20 }
  0x57   : > { %p1945_p11 = pnand %p1943_p9, %p2411_p12  ;;  %p1952_p5 = por %p1951_p3, %p1950_p1 }
  0x59   : > { %p1946_p13 = pneg %p1945_p11 }
  0x5b   : > { %p1953_p7 = pnand %p1952_p5, %p1946_p13 }
  0x5d   : > { %1956 = shalt.err (!%p1953_p7)
}
  0x5e   : > { %s2225_s14 = smov 192   ;;  %s2226_s1 = smov 12  }
  0x5f   : > { %1722 = dma.hbm_to_vmem [thread:$0]  (!%p2397_p10), %s3034_s5, 3072, %s2401_s13, [#allocation12], %s2225_s14, %s2225_s14, %s2226_s1  }
  0x60   : > { %p64_p0 = scmp.ne.s32.totalorder %s2191_s29, %s2187_s28  ;;  %s1581_s4 = sshll.u32 %s2203_s15, 9 }
  0x61   : > { %s3035_s0 = sld [smem:[#allocation32_spill]]  ;;  %p3036_p2 = scmp.eq.s32.totalorder %s2367_s19, 0 }
  0x62   : > { %s2227_s20 = smov [#allocation5]   ;;  %p3038_p6 = scmp.ne.s32.totalorder %s3030_s23, 0 }
  0x63   : > { %p2463_p4 = por %p3036_p2, %p64_p0  ;;  %s377_s3 = sshll.u32 %s2227_s20, 4  ;;  %s2467_s3 = int_to_ptr.vmem [resolvable:$true] %s377_s3 }
  0x64   : > { %p3039_p8 = pneg %p3038_p6  ;;  %s2228_s28 = smov [#allocation13]  }
  0x65   : > { %s3037_s10 = scalar_select %p2463_p4, 1, 0 }
  0x66   : > { %p2474_p9 = pnand %p3039_p8, %p2463_p4  ;;  %s431_s14 = sshll.u32 %s2228_s28, 4  ;;  %s2478_s14 = int_to_ptr.vmem [resolvable:$true] %s431_s14 }
  0x67   : > { %s2459_s22 = scalar_lea.hbm %s3035_s0, %s1581_s4  ;;  %s1962_s8 = scalar_lea.hbm %s3035_s0, 1024 }
  0x68   : > { %s1957_s1 = scalar_lea.hbm %s2459_s22, 512  ;;  %p1959_p13 = pneg %p2474_p9 }
  0x69   : > { %p1958_p11 = scmp.ne.s32.totalorder %s2459_s22, %s1957_s1  ;;  %p1963_p5 = scmp.lt.u32.totalorder %s2459_s22, %s3035_s0 }
  0x6a   : > { %p1964_p7 = scmp.lt.u32.totalorder %s1962_s8, %s1957_s1  ;;  %p1966_p2 = scmp.lt.u32.totalorder %s1957_s1, %s2459_s22 }
  0x6b   : > { %p1960_p1 = pnand %p1959_p13, %p1958_p11 }
  0x6c   : > { %p1965_p0 = por %p1964_p7, %p1963_p5 }
  0x6d   : > { %p1961_p3 = pneg %p1960_p1 }
  0x6e   : > { %p1967_p8 = por %p1966_p2, %p1965_p0 }
  0x70   : > { %p1968_p4 = pnand %p1967_p8, %p1961_p3 }
  0x72   : > { %1971 = shalt.err (!%p1968_p4)
}
  0x73   : > { %s1972_s28 = scalar_lea.vmem %s2467_s3, 512  ;;  %p1980_p10 = scmp.lt.s32.totalorder %s2467_s3, %s2467_s3 }
  0x74   : > { %p1973_p11 = scmp.ne.s32.totalorder %s2467_s3, %s1972_s28  ;;  %p1981_p12 = scmp.lt.s32.totalorder %s1972_s28, %s1972_s28 }
  0x76   : > { %p1975_p1 = pnand %p1973_p11, %p1959_p13  ;;  %p1982_p5 = por %p1981_p12, %p1980_p10 }
  0x78   : > { %p1976_p6 = pneg %p1975_p1 }
  0x7a   : > { %p1983_p7 = pnand %p1982_p5, %p1976_p6 }
  0x7c   : > { %1986 = shalt.err (!%p1983_p7)
}
  0x7d   : > { %1716 = dma.hbm_to_vmem [thread:$0]  (!%p2474_p9), %s2459_s22, 512, %s2467_s3, [#allocation6], %s3000_s6, %s3000_s6, %s3001_s7  }
  0x7e   : > { %s3041_s9 = sld [smem:[#allocation41_spill]]  ;;  %p3042_p10 = scmp.ne.s32.totalorder %s3033_s24, 0 }
  0x84   : > { %s1987_s4 = scalar_lea.hbm %s3041_s9, 1024 }
  0x85   : > { %p1988_p4 = scmp.ne.s32.totalorder %s3041_s9, %s1987_s4  ;;  %p1994_p13 = scmp.lt.u32.totalorder %s1987_s4, %s3041_s9 }
  0x87   : > { %p1990_p12 = pnand %p1988_p4, %p3042_p10 }
  0x89   : > { %p1991_p6 = pneg %p1990_p12 }
  0x8b   : > { %p1996_p3 = pnand %p1994_p13, %p1991_p6 }
  0x8d   : > { %1999 = shalt.err (!%p1996_p3)
}
  0x8e   : > { %s2000_s22 = scalar_lea.vmem %s2478_s14, 1024  ;;  %p2008_p8 = scmp.lt.s32.totalorder %s2478_s14, %s2478_s14 }
  0x8f   : > { %p2001_p9 = scmp.ne.s32.totalorder %s2478_s14, %s2000_s22  ;;  %p2009_p11 = scmp.lt.s32.totalorder %s2000_s22, %s2000_s22 }
  0x91   : > { %p2003_p0 = pnand %p2001_p9, %p3042_p10  ;;  %p2010_p1 = por %p2009_p11, %p2008_p8 }
  0x93   : > { %p2004_p2 = pneg %p2003_p0 }
  0x95   : > { %p2011_p5 = pnand %p2010_p1, %p2004_p2 }
  0x97   : > { %2014 = shalt.err (!%p2011_p5)
}
  0x98   : > { %s2229_s3 = smov 64   ;;  %s2230_s28 = smov 4  }
  0x99   : > { %p3043_p7 = scmp.ne.s32.totalorder %s3031_s25, 0  ;;  %s2231_s4 = smov [#allocation14]  }
  0x9a   : > { %s447_s8 = sshll.u32 %s2231_s4, 4  ;;  %s3044_s11 = sld [smem:[#allocation43_spill]]  ;;  %s448_s8 = int_to_ptr.vmem [resolvable:$true] %s447_s8 }
  0x9b   : > { %1725 = dma.hbm_to_vmem [thread:$0]  (!%p3043_p7), %s3041_s9, 1024, %s2478_s14, [#allocation12], %s2229_s3, %s2229_s3, %s2230_s28  }
  0xa0   : > { %s2015_s13 = scalar_lea.hbm %s3044_s11, 1024 }
  0xa1   : > { %p2016_p4 = scmp.ne.s32.totalorder %s3044_s11, %s2015_s13  ;;  %p2022_p13 = scmp.lt.u32.totalorder %s2015_s13, %s3044_s11 }
  0xa3   : > { %p2018_p12 = pnand %p2016_p4, %p3042_p10 }
  0xa5   : > { %p2019_p6 = pneg %p2018_p12 }
  0xa7   : > { %p2024_p3 = pnand %p2022_p13, %p2019_p6 }
  0xa9   : > { %2027 = shalt.err (!%p2024_p3)
}
  0xaa   : > { %s2028_s14 = scalar_lea.vmem %s448_s8, 1024  ;;  %p2036_p8 = scmp.lt.s32.totalorder %s448_s8, %s448_s8 }
  0xab   : > { %p2029_p9 = scmp.ne.s32.totalorder %s448_s8, %s2028_s14  ;;  %p2037_p11 = scmp.lt.s32.totalorder %s2028_s14, %s2028_s14 }
  0xad   : > { %p2031_p0 = pnand %p2029_p9, %p3042_p10  ;;  %p2038_p1 = por %p2037_p11, %p2036_p8 }
  0xaf   : > { %p2032_p2 = pneg %p2031_p0 }
  0xb1   : > { %p2039_p5 = pnand %p2038_p1, %p2032_p2 }
  0xb3   : > { %2042 = shalt.err (!%p2039_p5)
}
  0xb4   : > { %1728 = dma.hbm_to_vmem [thread:$0]  (!%p3043_p7), %s3044_s11, 1024, %s448_s8, [#allocation15], %s2229_s3, %s2229_s3, %s2230_s28  }
  0xb5   : > { %s41_s0 = sadd.s32 1, %s2207_s16  ;;  %s44_s25 = sadd.s32 1, %s2211_s17 }
  0xb6   : > { %p42_p10 = scmp.ge.s32.totalorder %s41_s0, 2  ;;  %s51_s24 = sadd.s32 1, %s2195_s30 }
  0xb7   : > { %s79_s7 = sadd.s32 1, %s2183_s27  ;;  %p86_p4 = scmp.ne.s32.totalorder %s2183_s27, %s2179_s26 }
  0xb8   : > { %s3095_s0 = smov (%p42_p10, %s41_s0), 0  ;;  %s3097_s25 = smov (!%p42_p10, %s44_s25), %s2211_s17 }
  0xb9   : > { %3045 = sst [smem:[#allocation29_spill]] %s3095_s0  ;;  %s75_s21 = ssub.s32 %s2207_s16, %s3095_s0 }
  0xba   : > { %p46_p12 = scmp.ge.s32.totalorder %s3097_s25, 2  ;;  %p87_p7 = scmp.eq.s32.totalorder %s2215_s18, 0 }
  0xbb   : > { %p3046_p6 = scmp.eq.s32.totalorder %s2367_s19, 3  ;;  %p1741_p3 = scmp.lt.s32.totalorder %s2215_s18, 4 }
  0xbc   : > { %s3099_s25 = smov (%p46_p12, %s3097_s25), 0  ;;  %p2571_p9 = por %p87_p7, %p86_p4 }
  0xbd   : > { %p2564_p13 = por %p3046_p6, %p86_p4  ;;  %3049 = sst [smem:[#allocation31_spill]] %s3099_s25 }
  0xbe   : > { %s464_s4 = sand.u32 1, %s2215_s18   ;;  %s48_s8 = ssub.s32 %s2211_s17, %s3099_s25 }
  0xbf   : > { %s3047_s3 = scalar_select %p2564_p13, 1, 0 }
  0xc0   : > { %p49_p0 = scmp.eq.s32.totalorder %s48_s8, 0  ;;  %s76_s12 = sor.u32 %s75_s21, %s48_s8 }
  0xc1   : > { %3048 = sst [smem:[#allocation30_spill]] %s3047_s3  ;;  %p77_p2 = scmp.eq.s32.totalorder %s76_s12, 0 }
  0xc2   : > { %s466_s20 = sand.u32 1, %s2183_s27   ;;  %s1511_s6 = sshll.u32 %s2207_s16, 1 }
  0xc3   : > { %s2580_s13 = scalar_select %p49_p0, %s2195_s30, %s51_s24  }
  0xc4   : > { %s2583_s22 = scalar_select %p77_p2, %s2183_s27, %s79_s7  }
  0xc5   : > { %s1510_s14 = sshll.u32 %s466_s20, 4  ;;  %s1512_s1 = sshll.u32 %s2211_s17, 2 }
  0xc6   : > { %s474_s2 = sadd.s32 %s1512_s1, %s1511_s6  ;;  %s468_s5 = scalar_lea.vmem [#allocation8], %s1510_s14 }
  0xc7   : > { %s477_s9 = sshll.u32 %s468_s5, 4  ;;  %s1513_s11 = sshll.u32 %s474_s2, 7  ;;  %s2587_s9 = int_to_ptr.vmem [resolvable:$true] %s477_s9 }
  0xc8   : > { %s3051_s29 = sld [smem:[#allocation33_spill]]  ;;  %p2598_p8 = pnand %p1741_p3, %p2571_p9 }
  0xc9   : > { %s2602_s2 = scalar_lea.sflag [#allocation9], %s464_s4 }
  0xca   : > { %p2045_p1 = pneg %p2598_p8 }
  0xce   : > { %s3052_s3 = smov %s3051_s29  ;;  %s2592_s15 = scalar_lea.hbm %s3051_s29, %s1513_s11 }
  0xcf   : > { %s2043_s5 = scalar_lea.hbm %s2592_s15, 256  ;;  %s2048_s0 = scalar_lea.hbm %s3052_s3, 1024 }
  0xd0   : > { %p2044_p11 = scmp.ne.s32.totalorder %s2592_s15, %s2043_s5  ;;  %p2049_p4 = scmp.lt.u32.totalorder %s2592_s15, %s3052_s3 }
  0xd1   : > { %p2050_p12 = scmp.lt.u32.totalorder %s2048_s0, %s2043_s5  ;;  %p2052_p6 = scmp.lt.u32.totalorder %s2043_s5, %s2592_s15 }
  0xd2   : > { %p2046_p5 = pnand %p2045_p1, %p2044_p11 }
  0xd3   : > { %p2051_p7 = por %p2050_p12, %p2049_p4 }
  0xd4   : > { %p2047_p10 = pneg %p2046_p5 }
  0xd5   : > { %p2053_p3 = por %p2052_p6, %p2051_p7 }
  0xd7   : > { %p2054_p9 = pnand %p2053_p3, %p2047_p10 }
  0xd9   : > { %2057 = shalt.err (!%p2054_p9)
}
  0xda   : > { %s2058_s21 = scalar_lea.vmem %s2587_s9, 256  ;;  %s2232_s28 = smov [#allocation8]  }
  0xdb   : > { %p2059_p0 = scmp.ne.s32.totalorder %s2587_s9, %s2058_s21  ;;  %s2063_s4 = sshll.u32 %s2232_s28, 4  ;;  %s2064_s4 = int_to_ptr.vmem [resolvable:$false] %s2063_s4 }
  0xdc   : > { %s2065_s8 = scalar_lea.vmem %s2064_s4, 512  ;;  %p2066_p5 = scmp.lt.s32.totalorder %s2587_s9, %s2064_s4 }
  0xdd   : > { %p2061_p2 = pnand %p2059_p0, %p2045_p1  ;;  %p2067_p4 = scmp.lt.s32.totalorder %s2065_s8, %s2058_s21 }
  0xdf   : > { %p2062_p11 = pneg %p2061_p2  ;;  %p2068_p12 = por %p2067_p4, %p2066_p5 }
  0xe1   : > { %p2069_p7 = pnand %p2068_p12, %p2062_p11 }
  0xe3   : > { %2072 = shalt.err (!%p2069_p7)
}
  0xe4   : > { %s3054_s12 = smov 8   ;;  %s3055_s20 = smov 128  }
  0xe5   : > { %1732 = dma.hbm_to_vmem [thread:$0]  (!%p2598_p8), %s2592_s15, 256, %s2587_s9, %s2602_s2, %s3055_s20, %s3055_s20, %s3054_s12  }
  0xe6   : > { %p3056_p1 = scmp.ne.s32.totalorder %s3030_s23, 0 }
  0xe7   : > { %p3057_p10 = scmp.ne.s32.totalorder (!%p3056_p1), %s3037_s10, 0 }
  0xe8   : > { %489 = sbr.rel (%p3056_p1) target bundleno = 2388 (0x954), region = 72 }
  0xef   : > { %2150 = dma.done.wait (%p3057_p10), [#allocation6], 512  }
  0xf0   : > { %2152 = vsyncadd (%p3057_p10), [#allocation6], 4294966784  ;;  %s3058_s14 = sld [smem:[#allocation27_spill]]  ;;  %s495_s6 = sand.u32 1, %s2367_s19  }
  0xf1   : > { %s497_s1 = sand.u32 1, %s2179_s26   ;;  %s496_s9 = scalar_lea.sflag [#allocation9], %s495_s6 }
  0xf2   : > { %s2643_s24 = sshll.u32 %s497_s1, 4 }
  0xf3   : > { %s499_s15 = scalar_lea.vmem [#allocation8], %s2643_s24 }
  0xf6   : > { %p3059_p8 = scmp.ne.s32.totalorder %s3058_s14, 0 }
  0xf8   : > { %2154 = dma.done.wait (%p3059_p8), %s496_s9, 256  }
  0xf9   : > { %2156 = vsyncadd (%p3059_p8), %s496_s9, 4294967040  ;;  %p3060_p6 = scmp.eq.s32.totalorder %s2367_s19, 0 }
  0xfb   : > { %2158 = dma.done.wait (%p3060_p6), [#allocation9], 512   ;;  %p3061_p3 = pmov %p3060_p6 }
  0xfd   : > { %2160 = vsyncadd (%p3061_p3), [#allocation9], 4294966784  ;;  %p3062_p9 = pmov %p3061_p3 }
  0xfe   : > { %p3063_p0 = pmov %p3061_p3 }
  0xff   : > { %2162 = dma.done.wait (%p3062_p9), [#allocation12], 4096  }
 0x100   : > { %2164 = vsyncadd (%p3063_p0), [#allocation12], 4294963200  ;;  %p3064_p2 = pmov %p3063_p0 }
 0x101   : > { %p3065_p11 = pmov %p3063_p0 }
 0x102   : > { %2166 = dma.done.wait (%p3064_p2), [#allocation15], 1024  }
 0x103   : > { %2168 = vsyncadd (%p3065_p11), [#allocation15], 4294966272  ;;  %s2663_s23 = scalar_lea.vmem [#allocation16], %s2643_s24  ;;  %s3066_s10 = sld [smem:[#allocation25_spill]] }
 0x109   : > { %p1521_p5 = scmp.ne.s32.totalorder %s3066_s10, 0 }
 0x10a   : > { %s3067_s11 = sld [smem:[#allocation35_spill]] (!%p1521_p5)  ;;  %s3068_s25 = sld [smem:[#allocation36_spill]] (!%p1521_p5)  ;;  %v2676_v2 = vld [vmem:[#allocation11] sm:$0xff] (!%p1521_p5)  ;;  %v2678_v3 = vld [vmem:[#allocation11 + $0x8] sm:$0xf] (!%p1521_p5)  ;;  %v2680_v4 = vld [vmem:[#allocation11 + $0xc] sm:$0xff] (!%p1521_p5) }
 0x10b   : > { %564 = sbr.rel (%p1521_p5) target bundleno = 834 (0x342), region = 100  ;;  %v2682_v5 = vld [vmem:[#allocation11 + $0x14] sm:$0xf] (!%p1521_p5)  ;;  %v2684_v6 = vld [vmem:[#allocation11 + $0x18] sm:$0xff] (!%p1521_p5)  ;;  %v2686_v7 = vld [vmem:[#allocation11 + $0x20] sm:$0xf] (!%p1521_p5) }
 0x10c   : > { %v2688_v8 = vld [vmem:[#allocation11 + $0x24] sm:$0xff] (!%p1521_p5)  ;;  %v2690_v9 = vld [vmem:[#allocation11 + $0x2c] sm:$0xf] (!%p1521_p5)  ;;  %v2692_v10 = vld [vmem:[#allocation11 + $0x30] sm:$0xff] (!%p1521_p5)  ;;  %s3069_s21 = sld [smem:[#allocation38_spill]] (!%p1521_p5)  ;;  %s2745_s28 = smov (!%p1521_p5), 0  }
 0x10d   : > { %v2694_v11 = vld [vmem:[#allocation11 + $0x38] sm:$0xf] (!%p1521_p5)  ;;  %v2696_v12 = vld [vmem:[#allocation11 + $0x3c] sm:$0xff] (!%p1521_p5)  ;;  %v2698_v13 = vld [vmem:[#allocation11 + $0x44] sm:$0xf] (!%p1521_p5) }
 0x10e   : > { %v2700_v14 = vld [vmem:[#allocation11 + $0x48] sm:$0xff] (!%p1521_p5)  ;;  %v2702_v15 = vld [vmem:[#allocation11 + $0x50] sm:$0xf] (!%p1521_p5)  ;;  %v2704_v16 = vld [vmem:[#allocation11 + $0x54] sm:$0xff] (!%p1521_p5) }
 0x10f   : > { %v2706_v17 = vld [vmem:[#allocation11 + $0x5c] sm:$0xf] (!%p1521_p5)  ;;  %v2708_v18 = vld [vmem:[#allocation11 + $0x60] sm:$0xff] (!%p1521_p5)  ;;  %v2710_v19 = vld [vmem:[#allocation11 + $0x68] sm:$0xf] (!%p1521_p5) }
 0x110   : > { %v2669_v0 = vld [vmem:[%s3067_s11] ss:$0 sm:$0xff] (!%p1521_p5)  ;;  %v2714_v21 = vld [vmem:[#allocation11 + $0x74] sm:$0xf] (!%p1521_p5)  ;;  %v2716_v22 = vld [vmem:[#allocation11 + $0x78] sm:$0xff] (!%p1521_p5) }
 0x111   : > { %v2674_v1 = vld [vmem:[%s3068_s25] ss:$0 sm:$0xff] (!%p1521_p5)  ;;  %v2718_v23 = vld [vmem:[#allocation11 + $0x80] sm:$0xf] (!%p1521_p5)  ;;  %v2720_v24 = vld [vmem:[#allocation11 + $0x84] sm:$0xff] (!%p1521_p5) }
 0x112   : > { %v2712_v20 = vld [vmem:[#allocation11 + $0x6c] sm:$0xff]  ;;  %v2726_v27 = vld [vmem:[#allocation11 + $0x98] sm:$0xf]  ;;  %v2728_v28 = vld [vmem:[#allocation11 + $0x9c] sm:$0xff] }
 0x113   : > { %v2722_v25 = vld [vmem:[#allocation11 + $0x8c] sm:$0xf]  ;;  %v2724_v26 = vld [vmem:[#allocation11 + $0x90] sm:$0xff]  ;;  %v2730_v29 = vld [vmem:[#allocation11 + $0xa4] sm:$0xf] }
 0x114   : > { %v2732_v30 = vld [vmem:[#allocation11 + $0xa8] sm:$0xff]  ;;  %v2734_v31 = vld [vmem:[#allocation11 + $0xb0] sm:$0xf]  ;;  %v2736_v32 = vld [vmem:[#allocation11 + $0xb4] sm:$0xff] }
 0x115   : > { %v2738_v33 = vld [vmem:[#allocation11 + $0xbc] sm:$0xf]  ;;  %v2743_v34 = vld [vmem:[%s3069_s21] sm:$0x7] }
 0x116 LB: >> { %s1522_s4 = sshll.u32 %s2219_s28, 4  ;;  %v1526_v45 = vcombine.high %v2676_v2, %v2680_v4  ;;  %v1525_v46 = vcombine.low %v2676_v2, %v2680_v4  ;;  %v1527_v47 = vcombine.low %v2678_v3, %v2682_v5  ;;  %v2233_v48 = vmov 0.0   ;;  %s605_s28 = sadd.s32 1, %s2219_s28   ;;  %s2219_s28 = sphi %s2745_s28, %s605_s28  }
 0x117   : >> { %s607_s8 = scalar_lea.vmem [#allocation5], %s1522_s4  ;;  %1615 = vmatprep.subr.bf16.mxu1 %v2233_v48  ;;  %v1529_v49 = vcombine.high %v2684_v6, %v2688_v8  ;;  %v1528_v50 = vcombine.low %v2684_v6, %v2688_v8  ;;  %v1530_v51 = vcombine.low %v2686_v7, %v2690_v9  ;;  %v1532_v52 = vcombine.high %v2692_v10, %v2696_v12  ;;  %s895_s12 = sshra.s32 %s1522_s4, 4 }
 0x118   : >> { %v608_v35 = vld [vmem:[%s607_s8] sm:$0xff]  ;;  %v609_v36 = vld [vmem:[%s607_s8 + $0x8] sm:$0xff]  ;;  %808 = vmatprep.subr.bf16.mxu0 %v1526_v45  ;;  %1616 = vmatpush3.bf16.msra.mxu1 %v1527_v47  ;;  %v1531_v53 = vcombine.low %v2692_v10, %v2696_v12  ;;  %v1533_v54 = vcombine.low %v2694_v11, %v2698_v13  ;;  %v1535_v55 = vcombine.high %v2700_v14, %v2704_v16  ;;  %v2234_v62 = vmov 0   ;;  %s1549_s20 = sshll.u32 %s895_s12, 3  ;;  %p602_p4 = scmp.ge.s32.totalorder %s605_s28, 2  }
 0x119   : >> { %610 = vadd.xlane.f32.xlu0 %v608_v35  ;;  %809 = vmatpush1.bf16.msra.mxu0 %v1525_v46  ;;  %v1534_v56 = vcombine.low %v2700_v14, %v2704_v16  ;;  %v1536_v57 = vcombine.low %v2702_v15, %v2706_v17  ;;  %v1538_v58 = vcombine.high %v2708_v18, %v2712_v20  ;;  %vm2235_vm0 = vmmov 0   ;;  %s906_s14 = scalar_lea.vmem [#allocation4], %s1549_s20  ;;  %s902_s6 = scalar_lea.vmem [#allocation3], %s1549_s20 }
 0x11a   : >> { %1617 = vmatprep.subr.bf16.mxu1 %v2233_v48  ;;  %810 = vmatprep.subr.bf16.mxu0 %v1529_v49  ;;  %v1537_v59 = vcombine.low %v2708_v18, %v2712_v20  ;;  %v1539_v60 = vcombine.low %v2710_v19, %v2714_v21  ;;  %v1541_v61 = vcombine.high %v2716_v22, %v2720_v24  ;;  %s898_s9 = scalar_lea.vmem [#allocation2], %s1549_s20 }
 0x11b   : >> { %840 = vmatprep.mubr.bf16.mxu0 %v2234_v62  ;;  %1631 = vmatprep.mubr.msk.bf16.mxu1 %vm2235_vm0, %v2233_v48  ;;  %v1540_v63 = vcombine.low %v2716_v22, %v2720_v24 }
 0x11c   : >> { %1618 = vmatpush3.bf16.msra.mxu1 %v1530_v51 }
 0x11d   : >> { %612 = vadd.xlane.f32.xlu0 %v609_v36  ;;  %811 = vmatpush1.bf16.msra.mxu0 %v1528_v50 }
 0x11e   : >> { %1619 = vmatprep.subr.bf16.mxu1 %v2233_v48  ;;  %812 = vmatprep.subr.bf16.mxu0 %v1532_v52 }
 0x120   : >> { %1620 = vmatpush3.bf16.msra.mxu1 %v1533_v54 }
 0x121   : >> { %813 = vmatpush1.bf16.msra.mxu0 %v1531_v53  ;;  %1621 = vmatprep.subr.bf16.mxu1 %v2233_v48 }
 0x122   : >> { %814 = vmatprep.subr.bf16.mxu0 %v1535_v55 }
 0x124   : >> { %1622 = vmatpush3.bf16.msra.mxu1 %v1536_v57 }
 0x125   : >> { %815 = vmatpush1.bf16.msra.mxu0 %v1534_v56  ;;  %1623 = vmatprep.subr.bf16.mxu1 %v2233_v48 }
 0x126   : >> { %816 = vmatprep.subr.bf16.mxu0 %v1538_v58 }
 0x128   : >> { %1624 = vmatpush3.bf16.msra.mxu1 %v1539_v60 }
 0x129   : >> { %817 = vmatpush1.bf16.msra.mxu0 %v1537_v59  ;;  %1625 = vmatprep.subr.bf16.mxu1 %v2233_v48 }
 0x12a   : >> { %818 = vmatprep.subr.bf16.mxu0 %v1541_v61 }
 0x12d   : >> { %819 = vmatpush1.bf16.msra.mxu0 %v1540_v63 }
 0x1a6   : >> { %v611_v37 = vpop.xlane.xlu0 %610 }
 0x1a7   : >> { %v615_v38 = vmul.f32 0.0078125, %v611_v37  ;;  %v1543_v37 = vcombine.low %v2724_v26, %v2728_v28 }
 0x1a9   : >> { %v2753_v39 = vsub.f32 %v608_v35, %v615_v38  ;;  %v1542_v35 = vcombine.low %v2718_v23, %v2722_v25  ;;  %v1545_v38 = vcombine.low %v2726_v27, %v2730_v29 }
 0x1aa   : >> { %v613_v40 = vpop.xlane.xlu0 %612 }
 0x1ab   : >> { %v616_v41 = vmul.f32 0.0078125, %v613_v40  ;;  %v619_v42 = vmul.f32 %v2753_v39, %v2753_v39  ;;  %1626 = vmatpush3.bf16.msra.mxu1 %v1542_v35  ;;  %v1547_v40 = vcombine.high %v2732_v30, %v2736_v32 }
 0x1ac   : >> { %1627 = vmatprep.subr.bf16.mxu1 %v2233_v48 }
 0x1ad   : >> { %v2757_v43 = vsub.f32 %v609_v36, %v616_v41  ;;  %621 = vadd.xlane.f32.xlu1 %v619_v42  ;;  %v1544_v36 = vcombine.high %v2724_v26, %v2728_v28  ;;  %v1546_v41 = vcombine.low %v2732_v30, %v2736_v32  ;;  %v1548_v42 = vcombine.low %v2734_v31, %v2738_v33 }
 0x1af   : >> { %v620_v44 = vmul.f32 %v2757_v43, %v2757_v43  ;;  %820 = vmatprep.subr.bf16.mxu0 %v1544_v36  ;;  %1628 = vmatpush3.bf16.msra.mxu1 %v1545_v38 }
 0x1b0   : >> { %821 = vmatpush1.bf16.msra.mxu0 %v1543_v37  ;;  %1629 = vmatprep.subr.bf16.mxu1 %v2233_v48 }
 0x1b1   : >> { %623 = vadd.xlane.f32.xlu1 %v620_v44  ;;  %822 = vmatprep.subr.bf16.mxu0 %v1547_v40 }
 0x1b3   : >> { %1630 = vmatpush3.bf16.msra.mxu1 %v1548_v42 }
 0x1b4   : >> { %823 = vmatpush1.bf16.msra.mxu0 %v1546_v41  ;;  %v665_v41 = vlaneseq }
 0x1b6   : >> { %v666_v42 = vshrl.u32 %v665_v41, 7 }
 0x23a   : >> { %v622_v44 = vpop.xlane.xlu1 %621 }
 0x23b   : >> { %v625_v45 = vmul.f32 0.0078125, %v622_v44  ;;  %v667_v44 = vsub.s32 0, %v666_v42 }
 0x23d   : >> { %v627_v46 = vadd.f32 1e-12, %v625_v45  ;;  %v675_v45 = vsub.s32 2, %v666_v42 }
 0x23e   : >> { %v624_v47 = vpop.xlane.xlu1 %623 }
 0x23f   : >> { %1861 = vrsqrt.f32 %v627_v46  ;;  %v626_v49 = vmul.f32 0.0078125, %v624_v47  ;;  %vm631_vm1 = vcmp.eq.f32.partialorder %v627_v46, inf  ;;  %v634_v53 = vand.u32 2147483648, %v627_v46 }
 0x240   : >> { %vm633_vm2 = vcmp.eq.f32.partialorder %v627_v46, 0.0 }
 0x241   : >> { %v628_v50 = vadd.f32 1e-12, %v626_v49 }
 0x243   : >> { %1863 = vrsqrt.f32 %v628_v50  ;;  %vm638_vm3 = vcmp.eq.f32.partialorder %v628_v50, inf  ;;  %v641_v57 = vand.u32 2147483648, %v628_v50  ;;  %vm640_vm4 = vcmp.eq.f32.partialorder %v628_v50, 0.0 }
 0x249   : >> { %v1862_v51 = vpop.eup %1861 }
 0x24a   : >> { %v630_v52 = vmul.f32 %v1862_v51, %v627_v46 }
 0x24c   : >> { %v632_v54 = vsel %vm631_vm1, %v627_v46, %v630_v52  ;;  %v668_v46 = vrot.slane %v2743_v34, %v667_v44 }
 0x24d   : >> { %v635_v55 = vsel %vm633_vm2, %v634_v53, %v632_v54  ;;  %v1864_v56 = vpop.eup %1863 }
 0x24e   : >> { %1865 = vrcp.f32 %v635_v55  ;;  %v637_v48 = vmul.f32 %v1864_v56, %v628_v50 }
 0x250   : >> { %v639_v58 = vsel %vm638_vm3, %v628_v50, %v637_v48 }
 0x251   : >> { %v642_v59 = vsel %vm640_vm4, %v641_v57, %v639_v58 }
 0x252   : >> { %1867 = vrcp.f32 %v642_v59 }
 0x258   : >> { %v1866_v60 = vpop.eup %1865 }
 0x259   : >> { %v644_v61 = vmul.f32 %v1866_v60, %v2753_v39  ;;  %v671_v39 = vsub.s32 1, %v666_v42 }
 0x25b   : >> { %v653_v35 = vmul.f32 %v2669_v0, %v644_v61  ;;  %v672_v50 = vrot.slane %v2743_v34, %v671_v39 }
 0x25c   : >> { %v1868_v62 = vpop.eup %1867 }
 0x25d   : >> { %v646_v63 = vmul.f32 %v1868_v62, %v2757_v43  ;;  %v661_v37 = vadd.f32 %v2674_v1, %v653_v35  ;;  %v676_v43 = vrot.slane %v2743_v34, %v675_v45 }
 0x25f   : >> { %v654_v36 = vmul.f32 %v2669_v0, %v646_v63 }
 0x261   : >> { %v662_v38 = vadd.f32 %v2674_v1, %v654_v36 }
 0x263   : >> { %v663_v40 = vpack.c.bf16 %v662_v38, %v661_v37 }
 0x265   : >> { %841 = vmatmul.mubr.bf16.vlgmr.msra.gmra.mrb[0].mxu0 %v663_v40  ;;  %1632 = vmatmul.mubr.bf16.vlgmr.msra.gmra.mrb[0].mxu1 %v663_v40 }
 0x338   : >> { %v842_v47 = vpop.f32.mrb[0].mxu0  ;;  %v885_v49 = vpop.f32.mrb[0].mxu1 }
 0x339   : >> { %v843_v51 = vadd.f32 %v842_v47, %v668_v46  ;;  %v844_v52 = vpop.f32.mrb[1].mxu0  ;;  %v1633_v53 = vpop.f32.mrb[1].mxu1  ;;  %v886_v56 = vadd.f32 %v885_v49, %v676_v43 }
 0x33a   : >> { %v846_v54 = vpop.f32.mrb[2].mxu0  ;;  %v888_v55 = vpop.f32.mrb[2].mxu1  ;;  %v845_v60 = vadd.f32 %v844_v52, %v672_v50 }
 0x33b   : >> { %v847_v48 = vadd.f32 %v846_v54, %v668_v46  ;;  %v889_v57 = vadd.f32 %v888_v55, %v676_v43  ;;  %v848_v58 = vpop.f32.mrb[3].mxu0  ;;  %v1634_v59 = vpop.f32.mrb[3].mxu1  ;;  %v892_v62 = vmul.f32 0.17677669, %v843_v51  ;;  %604 = sbr.rel (!%p602_p4) target bundleno = 278 (0x116), region = 156 }
 0x33c   : >> { %v849_v61 = vadd.f32 %v848_v58, %v672_v50 }
 0x33d   : >> { %v893_v63 = vmul.f32 0.17677669, %v847_v48  ;;  %v904_v35 = vpack.c.bf16 %v889_v57, %v886_v56 }
 0x33e   : >> { %v900_v36 = vpack.c.bf16 %v849_v61, %v845_v60 }
 0x33f   : >> { %v894_v37 = vpack.c.bf16 %v893_v63, %v892_v62  ;;  %907 = vst [vmem:[%s906_s14] sm:$0xff] %v904_v35 }
 0x340   : >> { %903 = vst [vmem:[%s902_s6] sm:$0xff] %v900_v36 }
 0x341   : >> { %899 = vst [vmem:[%s898_s9] sm:$0xff] %v894_v37 }
 0x342 PF: > { %s3070_s10 = sld [smem:[#allocation25_spill]]  ;;  %v2236_v40 = vmov 0.0   ;;  %vm2237_vm5 = vmmov 0   ;;  %vm966_vm6 = vcmask 261120   ;;  %v990_v33 = vld [vmem:[%s499_s15] sm:$0xff]  ;;  %v991_v41 = vld [vmem:[%s499_s15 + $0x8] sm:$0xff] }
 0x343   : > { %1635 = vmatprep.subr.bf16.mxu0 %v2236_v40  ;;  %1639 = vmatprep.mubr.msk.bf16.mxu0 %vm2237_vm5, %v2236_v40  ;;  %v1869_v55 = vld [vmem:[#allocation13] sm:$0xff]   ;;  %v1870_v56 = vld [vmem:[#allocation13 + $0x8] sm:$0xff]   ;;  %v1871_v48 = vld [vmem:[#allocation13 + $0x10] sm:$0xff]   ;;  %s3071_s25 = sld [smem:[#allocation39_spill]]  ;;  %s3072_s21 = sld [smem:[#allocation40_spill]] }
 0x344   : > { %1643 = vmatprep.subr.bf16.mxu1 %v2236_v40  ;;  %1647 = vmatprep.mubr.msk.bf16.mxu1 %vm2237_vm5, %v2236_v40  ;;  %v1872_v57 = vld [vmem:[#allocation13 + $0x18] sm:$0xff]   ;;  %v1873_v58 = vld [vmem:[#allocation13 + $0x20] sm:$0xff]   ;;  %v1874_v59 = vld [vmem:[#allocation13 + $0x28] sm:$0xff]   ;;  %s3073_s28 = sld [smem:[#allocation26_spill]]  ;;  %s3074_s12 = sld [smem:[#allocation42_spill]] }
 0x345   : > { %v1875_v60 = vld [vmem:[#allocation13 + $0x30] sm:$0xff]   ;;  %v1876_v61 = vld [vmem:[#allocation13 + $0x38] sm:$0xff]   ;;  %v1877_v62 = vld [vmem:[#allocation14] sm:$0xff]   ;;  %s3077_s15 = sld [smem:[#allocation45_spill]]  ;;  %s2907_s7 = scalar_lea.sflag [#allocation7], %s497_s1 }
 0x346   : > { %v992_v24 = vld [vmem:[#allocation4] sm:$0xff]  ;;  %v993_v25 = vld [vmem:[#allocation4 + $0x8] sm:$0xff]  ;;  %v1878_v63 = vld [vmem:[#allocation14 + $0x8] sm:$0xff]  }
 0x347   : > { %v914_v38 = vld [vmem:[#allocation3] sm:$0xff]  ;;  %v915_v0 = vld [vmem:[#allocation3 + $0x8] sm:$0xff]  ;;  %1644 = vmatpush3.bf16.msra.mxu1 %v992_v24  ;;  %v1879_v35 = vld [vmem:[#allocation14 + $0x10] sm:$0xff]  }
 0x348   : > { %s1552_s2 = sshll.u32 %s3070_s10, 4  ;;  %1636 = vmatpush3.bf16.xpose.msra.mxu0 %v914_v38  ;;  %1645 = vmatprep.subr.bf16.mxu1 %v2236_v40  ;;  %v1880_v36 = vld [vmem:[#allocation14 + $0x18] sm:$0xff]   ;;  %v1881_v37 = vld [vmem:[#allocation14 + $0x20] sm:$0xff]   ;;  %v1882_v38 = vld [vmem:[#allocation14 + $0x28] sm:$0xff]   ;;  %s1576_s20 = sshll.u32 %s3070_s10, 1 }
 0x349   : > { %s909_s5 = sshra.s32 %s1552_s2, 4  ;;  %1637 = vmatprep.subr.bf16.mxu0 %v2236_v40  ;;  %s957_s0 = scalar_lea.vmem [#allocation10], %s1552_s2 }
 0x34a   : > { %s1553_s11 = sshll.u32 %s909_s5, 3  ;;  %v958_v2 = vld [vmem:[%s957_s0] sm:$0xff]  ;;  %v959_v4 = vld [vmem:[%s957_s0 + $0x8] sm:$0xff]  ;;  %s1577_s14 = sshll.u32 %s3073_s28, 2 }
 0x34b   : > { %s912_s29 = scalar_lea.vmem [#allocation2], %s1553_s11  ;;  %1646 = vmatpush3.bf16.msra.mxu1 %v993_v25  ;;  %s3075_s2 = sld [smem:[#allocation44_spill]] }
 0x34c   : > { %v913_v1 = vld [vmem:[%s912_s29] sm:$0xff]  ;;  %1651 = vmatprep.subr.bf16.mxu1 %v2236_v40  ;;  %s1338_s5 = sadd.s32 %s1577_s14, %s1576_s20  ;;  %s1341_s0 = sshll.u32 %s2663_s23, 4  ;;  %s2900_s0 = int_to_ptr.vmem [resolvable:$true] %s1341_s0 }
 0x34d   : > { %s1578_s29 = sshll.u32 %s1338_s5, 7  ;;  %s3078_s19 = smov %s3077_s15 }
 0x34e   : > { %s2238_s28 = smov [#allocation16]  }
 0x34f   : > { %s2077_s4 = sshll.u32 %s2238_s28, 4  ;;  %s2078_s4 = int_to_ptr.vmem [resolvable:$false] %s2077_s4 }
 0x350   : > { %1638 = vmatpush3.bf16.xpose.msra.mxu0 %v915_v0  ;;  %s2079_s8 = scalar_lea.vmem %s2078_s4, 512  ;;  %p2080_p10 = scmp.lt.s32.totalorder %s2900_s0, %s2078_s4 }
 0x351   : > { %1671 = vmatprep.subr.bf16.mxu0 %v2236_v40 }
 0x357   : > { %1640 = vmatmul.mubr.bf16.vlgmr.msra.gmra.mrb[0].mxu0 %v913_v1 }
 0x358   : > { %1687 = vmatprep.mubr.msk.bf16.mxu0 %vm2237_vm5, %v2236_v40  ;;  %1672 = vmatpush3.bf16.msra.mxu0 %v1877_v62 }
 0x359   : > { %1673 = vmatprep.subr.bf16.mxu0 %v2236_v40 }
 0x35c   : > { %1674 = vmatpush3.bf16.msra.mxu0 %v1878_v63 }
 0x35d   : > { %1675 = vmatprep.subr.bf16.mxu0 %v2236_v40 }
 0x360   : > { %1676 = vmatpush3.bf16.msra.mxu0 %v1879_v35 }
 0x361   : > { %1677 = vmatprep.subr.bf16.mxu0 %v2236_v40 }
 0x364   : > { %1678 = vmatpush3.bf16.msra.mxu0 %v1880_v36 }
 0x365   : > { %1679 = vmatprep.subr.bf16.mxu0 %v2236_v40 }
 0x368   : > { %1680 = vmatpush3.bf16.msra.mxu0 %v1881_v37 }
 0x369   : > { %1681 = vmatprep.subr.bf16.mxu0 %v2236_v40 }
 0x36c   : > { %1682 = vmatpush3.bf16.msra.mxu0 %v1882_v38 }
 0x36d   : > { %1683 = vmatprep.subr.bf16.mxu0 %v2236_v40 }
 0x42a   : > { %v950_v3 = vpop.f32.mrb[0].mxu0 }
 0x42b   : > { %v960_v5 = vmul.f32 %v958_v2, %v950_v3  ;;  %v1641_v6 = vpop.f32.mrb[1].mxu0 }
 0x42c   : > { %v953_v7 = vpop.f32.mrb[2].mxu0 }
 0x42d   : > { %v961_v8 = vmul.f32 %v959_v4, %v953_v7  ;;  %v1642_v9 = vpop.f32.mrb[3].mxu0  ;;  %vm962_vm7 = vcmp.lt.f32.partialorder %v960_v5, 0.001 }
 0x42e   : > { %v964_v10 = vsel %vm962_vm7, -10000.0, %v960_v5 }
 0x42f   : > { %v967_v11 = vsel %vm966_vm6, %v964_v10, -inf  ;;  %vm963_vm8 = vcmp.lt.f32.partialorder %v961_v8, 0.001 }
 0x430   : > { %968 = vmax.xlane.f32.xlu0 %v967_v11  ;;  %v965_v12 = vsel %vm963_vm8, -10000.0, %v961_v8 }
 0x431   : > { %v970_v13 = vsel %vm966_vm6, %v965_v12, -inf }
 0x434   : > { %971 = vmax.xlane.f32.xlu0 %v970_v13 }
 0x4bd   : > { %v969_v14 = vpop.xlane.xlu0 %968 }
 0x4be   : > { %v973_v15 = vsub.f32 %v964_v10, %v969_v14 }
 0x4c0   : > { %v975_v16 = vmul.f32 1.442695, %v973_v15 }
 0x4c1   : > { %v972_v17 = vpop.xlane.xlu0 %971 }
 0x4c2   : > { %1885 = vpow2.f32 %v975_v16  ;;  %v974_v18 = vsub.f32 %v965_v12, %v972_v17  ;;  %v1555_v17 = vld [vmem:[%s3071_s25] ss:$0 sm:$0xff]  ;;  %s2898_s25 = scalar_lea.hbm %s3077_s15, %s1578_s29 }
 0x4c4   : > { %v977_v19 = vmul.f32 1.442695, %v974_v18 }
 0x4c6   : > { %1887 = vpow2.f32 %v977_v19 }
 0x4cc   : > { %v1886_v20 = vpop.eup %1885 }
 0x4cd   : > { %v979_v21 = vsel %vm966_vm6, %v1886_v20, 0.0 }
 0x4ce   : > { %980 = vadd.xlane.f32.xlu1 %v979_v21 }
 0x4d0   : > { %v1888_v22 = vpop.eup %1887 }
 0x4d1   : > { %v982_v23 = vsel %vm966_vm6, %v1888_v22, 0.0 }
 0x4d2   : > { %983 = vadd.xlane.f32.xlu1 %v982_v23 }
 0x55b   : > { %v981_v26 = vpop.xlane.xlu1 %980 }
 0x55c   : > { %1889 = vrcp.f32 %v981_v26 }
 0x55f   : > { %v984_v27 = vpop.xlane.xlu1 %983 }
 0x560   : > { %1891 = vrcp.f32 %v984_v27  ;;  %v1883_v27 = vld [vmem:[#allocation14 + $0x30] sm:$0xff]  }
 0x561   : > { %1684 = vmatpush3.bf16.msra.mxu0 %v1883_v27 }
 0x562   : > { %1685 = vmatprep.subr.bf16.mxu0 %v2236_v40 }
 0x566   : > { %v1890_v28 = vpop.eup %1889 }
 0x567   : > { %v987_v30 = vmul.f32 %v1890_v28, %v1886_v20  ;;  %v1884_v28 = vld [vmem:[#allocation14 + $0x38] sm:$0xff]  }
 0x568   : > { %1686 = vmatpush3.bf16.msra.mxu0 %v1884_v28 }
 0x56a   : > { %v1892_v29 = vpop.eup %1891 }
 0x56b   : > { %v988_v31 = vmul.f32 %v1892_v29, %v1888_v22  ;;  %v1556_v22 = vld [vmem:[%s3072_s21] ss:$0 sm:$0xff]  ;;  %s2073_s21 = scalar_lea.vmem %s2900_s0, 256 }
 0x56c   : > { %v1557_v29 = vld [vmem:[%s3074_s12] ss:$0 sm:$0xff]  ;;  %p2074_p12 = scmp.ne.s32.totalorder %s2900_s0, %s2073_s21  ;;  %p2081_p8 = scmp.lt.s32.totalorder %s2079_s8, %s2073_s21 }
 0x56d   : > { %v989_v32 = vpack.c.bf16 %v988_v31, %v987_v30 }
 0x56e   : > { %p2075_p7 = pnand %p2074_p12, %p2564_p13  ;;  %p2082_p6 = por %p2081_p8, %p2080_p10 }
 0x56f   : > { %1648 = vmatmul.mubr.msk.bf16.vlgmr.msra.gmra.mrb[0].mxu1 %vm966_vm6, %v989_v32 }
 0x570   : > { %1667 = vmatprep.mubr.msk.bf16.mxu1 %vm2237_vm5, %v2236_v40  ;;  %1652 = vmatpush3.bf16.msra.mxu1 %v1869_v55  ;;  %p2076_p1 = pneg %p2075_p7 }
 0x571   : > { %1653 = vmatprep.subr.bf16.mxu1 %v2236_v40 }
 0x572   : > { %p2083_p3 = pnand %p2082_p6, %p2076_p1 }
 0x574   : > { %1654 = vmatpush3.bf16.msra.mxu1 %v1870_v56 }
 0x575   : > { %1655 = vmatprep.subr.bf16.mxu1 %v2236_v40 }
 0x578   : > { %1656 = vmatpush3.bf16.msra.mxu1 %v1871_v48 }
 0x579   : > { %1657 = vmatprep.subr.bf16.mxu1 %v2236_v40 }
 0x57c   : > { %1658 = vmatpush3.bf16.msra.mxu1 %v1872_v57 }
 0x57d   : > { %1659 = vmatprep.subr.bf16.mxu1 %v2236_v40 }
 0x580   : > { %1660 = vmatpush3.bf16.msra.mxu1 %v1873_v58 }
 0x581   : > { %1661 = vmatprep.subr.bf16.mxu1 %v2236_v40 }
 0x584   : > { %1662 = vmatpush3.bf16.msra.mxu1 %v1874_v59 }
 0x585   : > { %1663 = vmatprep.subr.bf16.mxu1 %v2236_v40 }
 0x588   : > { %1664 = vmatpush3.bf16.msra.mxu1 %v1875_v60 }
 0x589   : > { %1665 = vmatprep.subr.bf16.mxu1 %v2236_v40  ;;  %v1566_v40 = vld [vmem:[%s3075_s2] ss:$0 sm:$0xff] }
 0x58c   : > { %1666 = vmatpush3.bf16.msra.mxu1 %v1876_v61 }
 0x642   : > { %v1031_v34 = vpop.f32.mrb[0].mxu1 }
 0x643   : > { %v2847_v42 = vadd.f32 %v1031_v34, %v990_v33  ;;  %v1649_v44 = vpop.f32.mrb[1].mxu1 }
 0x644   : > { %v1034_v45 = vpop.f32.mrb[2].mxu1 }
 0x645   : > { %v2849_v39 = vadd.f32 %v1034_v45, %v991_v41  ;;  %1040 = vadd.xlane.f32.xlu0 %v2847_v42  ;;  %v1650_v46 = vpop.f32.mrb[3].mxu1 }
 0x647   : > { %1042 = vadd.xlane.f32.xlu1 %v2849_v39 }
 0x6d2   : > { %v1041_v43 = vpop.xlane.xlu0 %1040 }
 0x6d3   : > { %v1045_v47 = vmul.f32 0.0078125, %v1041_v43 }
 0x6d4   : > { %v1043_v49 = vpop.xlane.xlu1 %1042 }
 0x6d5   : > { %v2854_v50 = vsub.f32 %v2847_v42, %v1045_v47  ;;  %v1046_v51 = vmul.f32 0.0078125, %v1043_v49 }
 0x6d7   : > { %v2857_v52 = vsub.f32 %v2849_v39, %v1046_v51  ;;  %v1049_v53 = vmul.f32 %v2854_v50, %v2854_v50 }
 0x6d9   : > { %1051 = vadd.xlane.f32.xlu0 %v1049_v53  ;;  %v1050_v54 = vmul.f32 %v2857_v52, %v2857_v52 }
 0x6db   : > { %1053 = vadd.xlane.f32.xlu1 %v1050_v54 }
 0x766   : > { %v1052_v0 = vpop.xlane.xlu0 %1051 }
 0x767   : > { %v1055_v1 = vmul.f32 0.0078125, %v1052_v0 }
 0x768   : > { %v1054_v2 = vpop.xlane.xlu1 %1053 }
 0x769   : > { %v1057_v3 = vadd.f32 1e-12, %v1055_v1  ;;  %v1056_v4 = vmul.f32 0.0078125, %v1054_v2 }
 0x76b   : > { %1893 = vrsqrt.f32 %v1057_v3  ;;  %v1058_v5 = vadd.f32 1e-12, %v1056_v4  ;;  %vm1061_vm9 = vcmp.eq.f32.partialorder %v1057_v3, inf  ;;  %v1064_v8 = vand.u32 2147483648, %v1057_v3 }
 0x76c   : > { %vm1063_vm10 = vcmp.eq.f32.partialorder %v1057_v3, 0.0 }
 0x76d   : > { %1895 = vrsqrt.f32 %v1058_v5  ;;  %vm1068_vm11 = vcmp.eq.f32.partialorder %v1058_v5, inf  ;;  %v1071_v13 = vand.u32 2147483648, %v1058_v5  ;;  %vm1070_vm12 = vcmp.eq.f32.partialorder %v1058_v5, 0.0 }
 0x775   : > { %v1894_v6 = vpop.eup %1893 }
 0x776   : > { %v1060_v7 = vmul.f32 %v1894_v6, %v1057_v3 }
 0x777   : > { %v1896_v9 = vpop.eup %1895 }
 0x778   : > { %v1062_v10 = vsel %vm1061_vm9, %v1057_v3, %v1060_v7  ;;  %v1067_v12 = vmul.f32 %v1896_v9, %v1058_v5 }
 0x779   : > { %v1065_v11 = vsel %vm1063_vm10, %v1064_v8, %v1062_v10 }
 0x77a   : > { %1897 = vrcp.f32 %v1065_v11  ;;  %v1069_v14 = vsel %vm1068_vm11, %v1058_v5, %v1067_v12 }
 0x77b   : > { %v1072_v15 = vsel %vm1070_vm12, %v1071_v13, %v1069_v14 }
 0x77c   : > { %1899 = vrcp.f32 %v1072_v15 }
 0x784   : > { %v1898_v16 = vpop.eup %1897 }
 0x785   : > { %v1074_v18 = vmul.f32 %v1898_v16, %v2854_v50 }
 0x786   : > { %v1900_v19 = vpop.eup %1899 }
 0x787   : > { %v1076_v20 = vmul.f32 %v1900_v19, %v2857_v52  ;;  %v1083_v21 = vmul.f32 %v1555_v17, %v1074_v18 }
 0x789   : > { %v1084_v23 = vmul.f32 %v1555_v17, %v1076_v20  ;;  %v1091_v24 = vadd.f32 %v1556_v22, %v1083_v21 }
 0x78b   : > { %v1092_v25 = vadd.f32 %v1556_v22, %v1084_v23 }
 0x78d   : > { %v1093_v26 = vpack.c.bf16 %v1092_v25, %v1091_v24 }
 0x78f   : > { %1668 = vmatmul.mubr.bf16.vlgmr.msra.gmra.mrb[4].mxu1 %v1093_v26 }
 0x862   : > { %v1199_v30 = vpop.f32.mrb[4].mxu1 }
 0x863   : > { %v1200_v31 = vadd.f32 %v1557_v29, %v1199_v30  ;;  %v1669_v32 = vpop.f32.mrb[5].mxu1 }
 0x864   : > { %v1202_v33 = vpop.f32.mrb[6].mxu1 }
 0x865   : > { %v1203_v34 = vadd.f32 %v1557_v29, %v1202_v33  ;;  %v1670_v41 = vpop.f32.mrb[7].mxu1  ;;  %v1206_v44 = vmax.f32 %v1200_v31, 0.0 }
 0x867   : > { %v1207_v45 = vmax.f32 %v1203_v34, 0.0 }
 0x869   : > { %v1208_v46 = vpack.c.bf16 %v1207_v45, %v1206_v44 }
 0x86b   : > { %1688 = vmatmul.mubr.bf16.vlgmr.msra.gmra.mrb[4].mxu0 %v1208_v46 }
 0x93e   : > { %v1314_v43 = vpop.f32.mrb[4].mxu0 }
 0x93f   : > { %v1315_v47 = vadd.f32 %v1566_v40, %v1314_v43  ;;  %v1689_v49 = vpop.f32.mrb[5].mxu0 }
 0x940   : > { %v1317_v50 = vpop.f32.mrb[6].mxu0 }
 0x941   : > { %v1321_v51 = vadd.f32 %v1315_v47, %v2847_v42  ;;  %v1318_v52 = vadd.f32 %v1566_v40, %v1317_v50  ;;  %v1690_v53 = vpop.f32.mrb[7].mxu0 }
 0x943   : > { %1323 = vst [vmem:[%s2663_s23] sm:$0xff] %v1321_v51  ;;  %v1322_v54 = vadd.f32 %v1318_v52, %v2849_v39 }
 0x945   : > { %1324 = vst [vmem:[%s2663_s23 + $0x8] sm:$0xff] %v1322_v54 }
 0x946   : > { %2086 = shalt.err (!%p2083_p3)
}
 0x947   : > { %s2087_s1 = scalar_lea.hbm %s2898_s25, 256  ;;  %s2091_s20 = scalar_lea.hbm %s3078_s19, 1024 }
 0x948   : > { %p2088_p9 = scmp.ne.s32.totalorder %s2898_s25, %s2087_s1  ;;  %p2092_p11 = scmp.lt.u32.totalorder %s2898_s25, %s3078_s19 }
 0x949   : > { %p2093_p5 = scmp.lt.u32.totalorder %s2091_s20, %s2087_s1  ;;  %p2095_p12 = scmp.lt.u32.totalorder %s2087_s1, %s2898_s25 }
 0x94a   : > { %p2089_p0 = pnand %p2088_p9, %p2564_p13 }
 0x94b   : > { %p2094_p4 = por %p2093_p5, %p2092_p11 }
 0x94c   : > { %p2090_p2 = pneg %p2089_p0 }
 0x94d   : > { %p2096_p7 = por %p2095_p12, %p2094_p4 }
 0x94f   : > { %p2097_p1 = pnand %p2096_p7, %p2090_p2 }
 0x951   : > { %2100 = shalt.err (!%p2097_p1)
}
 0x952   : > { %s2239_s9 = smov 128   ;;  %s2240_s2 = smov 8  }
 0x953   : > { %1711 = dma.vmem_to_hbm [thread:$0]  (%p2564_p13), %s2900_s0, 256, %s2898_s25, %s2907_s7, %s2239_s9, %s2239_s9, %s2240_s2  }
 0x954 PF: > { %s3079_s5 = sld [smem:[#allocation23_spill]]  ;;  %s3080_s29 = sld [smem:[#allocation28_spill]] }
 0x955   : > { %p1746_p10 = scmp.ge.s32.totalorder %s2215_s18, 2 }
 0x95a   : > { %s1356_s10 = sand.u32 1, %s3079_s5   ;;  %p3081_p8 = scmp.ne.s32.totalorder %s3080_s29, 0 }
 0x95b   : > { %s1357_s24 = scalar_lea.sflag [#allocation7], %s1356_s10 }
 0x95c   : > { %p1734_p6 = pnand %p1746_p10, %p3081_p8 }
 0x95e   : > { %2170 = dma.done.wait (!%p1734_p6), %s1357_s24, 256  }
 0x95f   : > { %2172 = vsyncadd (!%p1734_p6), %s1357_s24, 4294967040  ;;  %s32_s18 = sadd.s32 1, %s2215_s18   ;;  %s3082_s28 = sld [smem:[#allocation24_spill]] }
 0x960   : > { %p29_p3 = scmp.ge.s32.totalorder %s32_s18, 6   ;;  %s3083_s11 = sld [smem:[#allocation29_spill]] }
 0x961   : > { %s3084_s0 = sld [smem:[#allocation31_spill]]  ;;  %s3085_s25 = smov %s2179_s26 }
 0x962   : > { %s3086_s26 = smov %s2183_s27  ;;  %s3087_s27 = smov %s2583_s22 }
 0x963   : > { %s3088_s29 = smov %s2195_s30  ;;  %s3089_s30 = smov %s2580_s13 }
 0x964   : > { %s3090_s14 = smov %s2207_s16  ;;  %s3091_s15 = smov %s2211_s17 }
 0x965   :  { %31 = sbr.rel (!%p29_p3) target bundleno = 27 (0x1b), region = 167 }
 0x966   : > { %s3092_s16 = smov %s3083_s11 }
 0x967   : > { %s3093_s17 = smov %s3084_s0 }
 0x96c   :  { %1362 = vsyncpa [#allocation6], 1 }
 0x96d   :  { %1364 = vsyncpa [#allocation6 + $0x1], 1 }
 0x96e   :  { %1365 = vsyncpa [#allocation9], 1 }
 0x96f   :  { %1367 = vsyncpa [#allocation9 + $0x1], 1 }
 0x970   :  { %1368 = vsyncpa [#allocation12], 1 }
 0x971   :  { %1369 = vsyncpa [#allocation15], 1 }
 0x972   :  { %1370 = vsyncpa [#allocation7], 1 }
 0x973   :  { %1372 = vsyncpa [#allocation7 + $0x1], 1 }

// kernel: tpu_custom_call.1
= control target key start
LH: loop header
LB: loop body
LE: loop exit
PB: predicated region body
PF: predicated region fallthrough
CT: control target
= control target key end

     0   :  { %s2999_s0 = inlined_call_operand.hbm [shape: f32[2,32,128], index: 0, kind: input, shape index: {}]   ;;  %s3000_s1 = inlined_call_operand.hbm [shape: f32[2,32,128], index: 1, kind: input, shape index: {}]   ;;  %s3001_s2 = inlined_call_operand.hbm [shape: f32[32,32], index: 2, kind: input, shape index: {}]   ;;  %s3002_s3 = inlined_call_operand.vmem [shape: f32[1,128], index: 3, kind: input, shape index: {}]   ;;  %s3003_s4 = inlined_call_operand.vmem [shape: f32[1,128], index: 4, kind: input, shape index: {}]   ;;  %s3004_s5 = inlined_call_operand.hbm [shape: bf16[128,384], index: 5, kind: input, shape index: {}]   ;;  %s3005_s6 = inlined_call_operand.vmem [shape: f32[1,384], index: 6, kind: input, shape index: {}]   ;;  %s3006_s7 = inlined_call_operand.vmem [shape: f32[1,128], index: 7, kind: input, shape index: {}]   ;;  %s3007_s8 = inlined_call_operand.vmem [shape: f32[1,128], index: 8, kind: input, shape index: {}]   ;;  %s3008_s9 = inlined_call_operand.hbm [shape: bf16[128,128], index: 9, kind: input, shape index: {}]   ;;  %s3009_s10 = inlined_call_operand.vmem [shape: f32[1,128], index: 10, kind: input, shape index: {}]   ;;  %s3010_s11 = inlined_call_operand.hbm [shape: bf16[128,128], index: 11, kind: input, shape index: {}]   ;;  %s3011_s12 = inlined_call_operand.vmem [shape: f32[1,128], index: 12, kind: input, shape index: {}]   ;;  %s3012_s13 = inlined_call_operand.hbm [shape: f32[2,32,128], index: 13, kind: output, shape index: {}]  }
   0x1   :  { %3036 = sst [smem:[#allocation32_spill]] %s2999_s0 }
   0x2   :  { %3037 = sst [smem:[#allocation33_spill]] %s3001_s2 }
   0x3   :  { %3038 = sst [smem:[#allocation34_spill]] %s3002_s3 }
   0x4   :  { %3039 = sst [smem:[#allocation35_spill]] %s3003_s4 }
   0x5   :  { %3040 = sst [smem:[#allocation36_spill]] %s3004_s5 }
   0x6   :  { %3041 = sst [smem:[#allocation37_spill]] %s3005_s6 }
   0x7   :  { %3042 = sst [smem:[#allocation38_spill]] %s3006_s7 }
   0x8   :  { %3043 = sst [smem:[#allocation39_spill]] %s3007_s8 }
   0x9   :  { %3044 = sst [smem:[#allocation40_spill]] %s3008_s9 }
   0xa   :  { %3045 = sst [smem:[#allocation41_spill]] %s3009_s10 }
   0xb   :  { %3046 = sst [smem:[#allocation42_spill]] %s3010_s11 }
   0xc   :  { %3047 = sst [smem:[#allocation43_spill]] %s3011_s12 }
   0xd   :  { %3048 = sst [smem:[#allocation44_spill]] %s3012_s13 }
   0xe   :  { %18 = vsyncpa [#allocation6], 0 }
   0xf   :  { %20 = vsyncpa [#allocation6 + $0x1], 0 }
  0x10   :  { %21 = vsyncpa [#allocation9], 0 }
  0x11   :  { %23 = vsyncpa [#allocation9 + $0x1], 0 }
  0x12   :  { %24 = vsyncpa [#allocation12], 0 }
  0x13   :  { %25 = vsyncpa [#allocation15], 0 }
  0x14   :  { %26 = vsyncpa [#allocation7], 0 }
  0x15   :  { %28 = vsyncpa [#allocation7 + $0x1], 0  ;;  %s2338_s25 = smov 0   ;;  %s2340_s26 = smov 0  }
  0x16   :  { %s2342_s27 = smov 0   ;;  %s2344_s28 = smov 0  }
  0x17   :  { %s2346_s29 = smov 0   ;;  %s2348_s30 = smov 0  }
  0x18   :  { %s2350_s14 = smov 0   ;;  %s2352_s15 = smov 0  }
  0x19   :  { %s2354_s16 = smov 0   ;;  %s2356_s17 = smov 0  }
  0x1a   :  { %s2358_s18 = smov 0  }
  0x1b LB: > { %3049 = sst [smem:[#allocation23_spill]] %s2202_s25  ;;  %s2394_s19 = sadd.s32 4294967295, %s2242_s18   ;;  %s2242_s18 = sphi %s2358_s18, %s34_s18   ;;  %s2238_s17 = sphi %s2356_s17, %s3117_s17   ;;  %s2234_s16 = sphi %s2354_s16, %s3116_s16   ;;  %s2230_s15 = sphi %s2352_s15, %s3115_s15   ;;  %s2226_s14 = sphi %s2350_s14, %s3114_s14   ;;  %s2222_s30 = sphi %s2348_s30, %s3113_s30   ;;  %s2218_s29 = sphi %s2346_s29, %s3112_s29   ;;  %s2214_s28 = sphi %s2344_s28, %s3111_s28   ;;  %s2210_s27 = sphi %s2342_s27, %s3110_s27   ;;  %s2206_s26 = sphi %s2340_s26, %s3109_s26   ;;  %s2202_s25 = sphi %s2338_s25, %s3107_s25  }
  0x1c   : > { %3050 = sst [smem:[#allocation24_spill]] %s2206_s26  ;;  %s1527_s20 = sadd.s32 4294967294, %s2242_s18  }
  0x1d   : > { %3051 = sst [smem:[#allocation25_spill]] %s2226_s14  ;;  %p3016_p0 = scmp.eq.s32.totalorder %s2394_s19, 0 }
  0x1e   : > { %3052 = sst [smem:[#allocation26_spill]] %s2230_s15  ;;  %p94_p1 = scmp.ne.s32.totalorder %s2206_s26, %s2202_s25 }
  0x1f   : > { %3053 = sst [smem:[#allocation27_spill]] %s2394_s19  ;;  %p357_p2 = scmp.eq.s32.totalorder %s1527_s20, 3 }
  0x20   : > { %p2402_p3 = por %p94_p1, %p3016_p0  ;;  %p1528_p4 = scmp.ge.s32.totalorder %s2242_s18, 1 }
  0x21   : > { %p2407_p5 = por %p357_p2, %p94_p1  ;;  %p364_p6 = scmp.lt.s32.totalorder %s2242_s18, 5 }
  0x22   : > { %s3054_s21 = scalar_select %p2402_p3, 1, 0 }
  0x23   : > { %s3056_s22 = scalar_select %p2407_p5, 1, 0 }
  0x24   : > { %3055 = sst [smem:[#allocation28_spill]] %s3054_s21  ;;  %p2412_p7 = pnand %p1528_p4, %p364_p6 }
  0x25   : > { %3057 = sst [smem:[#allocation29_spill]] %s3056_s22  ;;  %s2248_s24 = smov [#allocation10]  }
  0x26   : > { %s3058_s23 = scalar_select %p2412_p7, 1, 0 }
  0x27   : > { %s376_s13 = sshll.u32 %s2248_s24, 4  ;;  %p1741_p8 = pneg %p2412_p7  ;;  %s377_s13 = int_to_ptr.vmem [resolvable:$true] %s376_s13 }
  0x28   : > { %s2249_s25 = smov [#allocation11]   ;;  %s3060_s2 = sld [smem:[#allocation33_spill]] }
  0x29   : > { %p2420_p9 = pnand %p1741_p8, %p3016_p0  ;;  %s395_s12 = sshll.u32 %s2249_s25, 4  ;;  %s2424_s12 = int_to_ptr.vmem [resolvable:$true] %s395_s12 }
  0x2b   : > { %p2434_p11 = pneg %p2420_p9 }
  0x2e   : > { %s1928_s15 = scalar_lea.hbm %s3060_s2, 512 }
  0x2f   : > { %p1929_p10 = scmp.ne.s32.totalorder %s3060_s2, %s1928_s15  ;;  %p1935_p1 = scmp.lt.u32.totalorder %s1928_s15, %s3060_s2 }
  0x31   : > { %p1931_p12 = pnand %p2434_p11, %p1929_p10 }
  0x33   : > { %p1932_p13 = pneg %p1931_p12 }
  0x35   : > { %p1937_p2 = pnand %p1935_p1, %p1932_p13 }
  0x37   : > { %1940 = shalt.err (!%p1937_p2)
}
  0x38   : > { %s1941_s10 = scalar_lea.vmem %s377_s13, 512  ;;  %p1949_p0 = scmp.lt.s32.totalorder %s377_s13, %s377_s13 }
  0x39   : > { %p1942_p4 = scmp.ne.s32.totalorder %s377_s13, %s1941_s10  ;;  %p1950_p5 = scmp.lt.s32.totalorder %s1941_s10, %s1941_s10 }
  0x3b   : > { %p1944_p6 = pnand %p1942_p4, %p2434_p11  ;;  %p1951_p3 = por %p1950_p5, %p1949_p0 }
  0x3d   : > { %p1945_p8 = pneg %p1944_p6 }
  0x3f   : > { %p1952_p7 = pnand %p1951_p3, %p1945_p8 }
  0x41   : > { %1955 = shalt.err (!%p1952_p7)
}
  0x42   : > { %s3022_s7 = smov 128   ;;  %s3024_s8 = smov 8  }
  0x43   : > { %1744 = dma.hbm_to_vmem [thread:$0]  (!%p2420_p9), %s3060_s2, 512, %s377_s13, [#allocation9], %s3022_s7, %s3022_s7, %s3024_s8  }
  0x44   : > { %s3062_s5 = sld [smem:[#allocation36_spill]] }
  0x4a   : > { %s1956_s4 = scalar_lea.hbm %s3062_s5, 3072 }
  0x4b   : > { %p1957_p0 = scmp.ne.s32.totalorder %s3062_s5, %s1956_s4  ;;  %p1963_p7 = scmp.lt.u32.totalorder %s1956_s4, %s3062_s5 }
  0x4d   : > { %p1959_p3 = pnand %p1957_p0, %p2434_p11 }
  0x4f   : > { %p1960_p5 = pneg %p1959_p3 }
  0x51   : > { %p1965_p10 = pnand %p1963_p7, %p1960_p5 }
  0x53   : > { %1968 = shalt.err (!%p1965_p10)
}
  0x54   : > { %s1969_s13 = scalar_lea.vmem %s2424_s12, 3072  ;;  %p1977_p2 = scmp.lt.s32.totalorder %s2424_s12, %s2424_s12 }
  0x55   : > { %p1970_p12 = scmp.ne.s32.totalorder %s2424_s12, %s1969_s13  ;;  %p1978_p4 = scmp.lt.s32.totalorder %s1969_s13, %s1969_s13 }
  0x57   : > { %p1972_p13 = pnand %p1970_p12, %p2434_p11  ;;  %p1979_p6 = por %p1978_p4, %p1977_p2 }
  0x59   : > { %p1973_p1 = pneg %p1972_p13 }
  0x5b   : > { %p1980_p8 = pnand %p1979_p6, %p1973_p1 }
  0x5d   : > { %1983 = shalt.err (!%p1980_p8)
}
  0x5e   : > { %s2252_s3 = smov 192   ;;  %s2253_s4 = smov 12  }
  0x5f   : > { %1747 = dma.hbm_to_vmem [thread:$0]  (!%p2420_p9), %s3062_s5, 3072, %s2424_s12, [#allocation12], %s2252_s3, %s2252_s3, %s2253_s4  }
  0x60   : > { %s2254_s6 = smov [#allocation13]   ;;  %s3063_s9 = sld [smem:[#allocation40_spill]] }
  0x61   : > { %s417_s15 = sshll.u32 %s2254_s6, 4  ;;  %s418_s15 = int_to_ptr.vmem [resolvable:$true] %s417_s15 }
  0x66   : > { %s1984_s10 = scalar_lea.hbm %s3063_s9, 1024 }
  0x67   : > { %p1985_p0 = scmp.ne.s32.totalorder %s3063_s9, %s1984_s10  ;;  %p1991_p7 = scmp.lt.u32.totalorder %s1984_s10, %s3063_s9 }
  0x69   : > { %p1987_p3 = pnand %p1985_p0, %p2434_p11 }
  0x6b   : > { %p1988_p5 = pneg %p1987_p3 }
  0x6d   : > { %p1993_p10 = pnand %p1991_p7, %p1988_p5 }
  0x6f   : > { %1996 = shalt.err (!%p1993_p10)
}
  0x70   : > { %s1997_s12 = scalar_lea.vmem %s418_s15, 1024  ;;  %p2005_p2 = scmp.lt.s32.totalorder %s418_s15, %s418_s15 }
  0x71   : > { %p1998_p12 = scmp.ne.s32.totalorder %s418_s15, %s1997_s12  ;;  %p2006_p4 = scmp.lt.s32.totalorder %s1997_s12, %s1997_s12 }
  0x73   : > { %p2000_p13 = pnand %p1998_p12, %p2434_p11  ;;  %p2007_p6 = por %p2006_p4, %p2005_p2 }
  0x75   : > { %p2001_p1 = pneg %p2000_p13 }
  0x77   : > { %p2008_p8 = pnand %p2007_p6, %p2001_p1 }
  0x79   : > { %2011 = shalt.err (!%p2008_p8)
}
  0x7a   : > { %s2255_s7 = smov 64   ;;  %s2256_s3 = smov 4  }
  0x7b   : > { %1750 = dma.hbm_to_vmem [thread:$0]  (!%p2420_p9), %s3063_s9, 1024, %s418_s15, [#allocation12], %s2255_s7, %s2255_s7, %s2256_s3  }
  0x7c   : > { %s2257_s4 = smov [#allocation14]   ;;  %s3064_s11 = sld [smem:[#allocation42_spill]] }
  0x7d   : > { %s433_s14 = sshll.u32 %s2257_s4, 4  ;;  %s434_s14 = int_to_ptr.vmem [resolvable:$true] %s433_s14 }
  0x82   : > { %s2012_s22 = scalar_lea.hbm %s3064_s11, 1024 }
  0x83   : > { %p2013_p0 = scmp.ne.s32.totalorder %s3064_s11, %s2012_s22  ;;  %p2019_p7 = scmp.lt.u32.totalorder %s2012_s22, %s3064_s11 }
  0x85   : > { %p2015_p3 = pnand %p2013_p0, %p2434_p11 }
  0x87   : > { %p2016_p5 = pneg %p2015_p3 }
  0x89   : > { %p2021_p10 = pnand %p2019_p7, %p2016_p5 }
  0x8b   : > { %2024 = shalt.err (!%p2021_p10)
}
  0x8c   : > { %s2025_s15 = scalar_lea.vmem %s434_s14, 1024  ;;  %p2033_p2 = scmp.lt.s32.totalorder %s434_s14, %s434_s14 }
  0x8d   : > { %p2026_p12 = scmp.ne.s32.totalorder %s434_s14, %s2025_s15  ;;  %p2034_p4 = scmp.lt.s32.totalorder %s2025_s15, %s2025_s15 }
  0x8f   : > { %p2028_p13 = pnand %p2026_p12, %p2434_p11  ;;  %p2035_p6 = por %p2034_p4, %p2033_p2 }
  0x91   : > { %p2029_p1 = pneg %p2028_p13 }
  0x93   : > { %p2036_p8 = pnand %p2035_p6, %p2029_p1 }
  0x95   : > { %2039 = shalt.err (!%p2036_p8)
}
  0x96   : > { %1753 = dma.hbm_to_vmem [thread:$0]  (!%p2420_p9), %s3064_s11, 1024, %s434_s14, [#allocation15], %s2255_s7, %s2255_s7, %s2256_s3  }
  0x97   : > { %s46_s24 = sadd.s32 1, %s2238_s17  ;;  %p60_p0 = scmp.ne.s32.totalorder %s2222_s30, %s2218_s29 }
  0x98   : > { %p3027_p3 = scmp.eq.s32.totalorder %s2242_s18, 0  ;;  %p66_p5 = scmp.ne.s32.totalorder %s2218_s29, %s2214_s28 }
  0x99   : > { %p3026_p7 = scmp.lt.s32.totalorder %s2242_s18, 4  ;;  %s450_s20 = sand.u32 1, %s2222_s30  }
  0x9a   : > { %p62_p10 = por %p3027_p3, %p60_p0  ;;  %p3065_p12 = scmp.eq.s32.totalorder %s2394_s19, 0 }
  0x9b   : > { %s1534_s21 = sshll.u32 %s450_s20, 5  ;;  %s1609_s6 = sshll.u32 %s2238_s17, 9 }
  0x9c   : > { %p2525_p13 = por %p3065_p12, %p66_p5  ;;  %s3067_s0 = sld [smem:[#allocation32_spill]] }
  0x9d   : > { %s454_s28 = scalar_lea.vmem [#allocation5], %s1534_s21  ;;  %p2537_p9 = pnand %p3026_p7, %p62_p10 }
  0x9e   : > { %s461_s3 = sshll.u32 %s454_s28, 4  ;;  %s2543_s10 = scalar_lea.sflag [#allocation6], %s450_s20  ;;  %s2541_s3 = int_to_ptr.vmem [resolvable:$true] %s461_s3 }
  0x9f   : > { %p2042_p2 = pneg %p2537_p9 }
  0xa2   : > { %s2533_s7 = scalar_lea.hbm %s3067_s0, %s1609_s6  ;;  %s2045_s2 = scalar_lea.hbm %s3067_s0, 1024 }
  0xa3   : > { %s2040_s13 = scalar_lea.hbm %s2533_s7, 512  ;;  %p2046_p8 = scmp.lt.u32.totalorder %s2533_s7, %s3067_s0 }
  0xa4   : > { %p2041_p1 = scmp.ne.s32.totalorder %s2533_s7, %s2040_s13  ;;  %p2047_p0 = scmp.lt.u32.totalorder %s2045_s2, %s2040_s13 }
  0xa5   : > { %p2049_p10 = scmp.lt.u32.totalorder %s2040_s13, %s2533_s7 }
  0xa6   : > { %p2043_p4 = pnand %p2042_p2, %p2041_p1  ;;  %p2048_p5 = por %p2047_p0, %p2046_p8 }
  0xa8   : > { %p2044_p6 = pneg %p2043_p4  ;;  %p2050_p12 = por %p2049_p10, %p2048_p5 }
  0xaa   : > { %p2051_p7 = pnand %p2050_p12, %p2044_p6 }
  0xac   : > { %2054 = shalt.err (!%p2051_p7)
}
  0xad   : > { %s2055_s20 = scalar_lea.vmem %s2541_s3, 512  ;;  %s2258_s6 = smov [#allocation5]  }
  0xae   : > { %p2056_p1 = scmp.ne.s32.totalorder %s2541_s3, %s2055_s20  ;;  %s2060_s22 = sshll.u32 %s2258_s6, 4  ;;  %s2061_s22 = int_to_ptr.vmem [resolvable:$false] %s2060_s22 }
  0xaf   : > { %s2062_s25 = scalar_lea.vmem %s2061_s22, 1024  ;;  %p2063_p11 = scmp.lt.s32.totalorder %s2541_s3, %s2061_s22 }
  0xb0   : > { %p2058_p4 = pnand %p2056_p1, %p2042_p2  ;;  %p2064_p8 = scmp.lt.s32.totalorder %s2062_s25, %s2055_s20 }
  0xb2   : > { %p2059_p3 = pneg %p2058_p4  ;;  %p2065_p0 = por %p2064_p8, %p2063_p11 }
  0xb4   : > { %p2066_p5 = pnand %p2065_p0, %p2059_p3 }
  0xb6   : > { %2069 = shalt.err (!%p2066_p5)
}
  0xb7   : > { %s3069_s28 = smov 8   ;;  %s3070_s13 = smov 128  }
  0xb8   : > { %1757 = dma.hbm_to_vmem [thread:$0]  (!%p2537_p9), %s2533_s7, 512, %s2541_s3, %s2543_s10, %s3070_s13, %s3070_s13, %s3069_s28  }
  0xb9   : > { %s53_s14 = sadd.s32 1, %s2222_s30  ;;  %s43_s12 = sadd.s32 1, %s2234_s16 }
  0xba   : > { %p44_p11 = scmp.ge.s32.totalorder %s43_s12, 2  ;;  %s81_s15 = sadd.s32 1, %s2210_s27 }
  0xbb   : > { %p88_p3 = scmp.ne.s32.totalorder %s2210_s27, %s2206_s26  ;;  %s473_s2 = sand.u32 1, %s2210_s27  }
  0xbc   : > { %s3119_s12 = smov (%p44_p11, %s43_s12), 0  ;;  %s3121_s24 = smov (!%p44_p11, %s46_s24), %s2238_s17 }
  0xbd   : > { %3071 = sst [smem:[#allocation30_spill]] %s3119_s12  ;;  %s77_s8 = ssub.s32 %s2234_s16, %s3119_s12 }
  0xbe   : > { %s471_s21 = sand.u32 1, %s2242_s18   ;;  %p48_p7 = scmp.ge.s32.totalorder %s3121_s24, 2 }
  0xbf   : > { %p3072_p9 = scmp.eq.s32.totalorder %s2394_s19, 3  ;;  %p3075_p6 = scmp.eq.s32.totalorder %s2242_s18, 0 }
  0xc0   : > { %s1537_s10 = sshll.u32 %s473_s2, 4  ;;  %s3123_s24 = smov (%p48_p7, %s3121_s24), 0 }
  0xc1   : > { %p2590_p2 = por %p3072_p9, %p88_p3  ;;  %p2596_p10 = por %p88_p3, %p3075_p6 }
  0xc2   : > { %s1538_s20 = sshll.u32 %s2234_s16, 1  ;;  %s50_s6 = ssub.s32 %s2238_s17, %s3123_s24 }
  0xc3   : > { %s3073_s7 = scalar_select %p2590_p2, 1, 0 }
  0xc4   : > { %s1539_s22 = sshll.u32 %s2238_s17, 2  ;;  %p51_p12 = scmp.eq.s32.totalorder %s50_s6, 0 }
  0xc5   : > { %3074 = sst [smem:[#allocation31_spill]] %s3073_s7  ;;  %s78_s25 = sor.u32 %s77_s8, %s50_s6 }
  0xc6   : > { %p79_p1 = scmp.eq.s32.totalorder %s78_s25, 0  ;;  %s481_s0 = sadd.s32 %s1539_s22, %s1538_s20 }
  0xc7   : > { %s2607_s5 = scalar_select %p51_p12, %s2222_s30, %s53_s14  }
  0xc8   : > { %s2610_s9 = scalar_select %p79_p1, %s2210_s27, %s81_s15  }
  0xc9   : > { %s1540_s11 = sshll.u32 %s481_s0, 7  ;;  %s475_s12 = scalar_lea.vmem [#allocation8], %s1537_s10 }
  0xca   : > { %s484_s7 = sshll.u32 %s475_s12, 4  ;;  %s2615_s19 = scalar_lea.hbm %s3000_s1, %s1540_s11  ;;  %s2617_s7 = int_to_ptr.vmem [resolvable:$true] %s484_s7 }
  0xcb   : > { %p3077_p4 = scmp.lt.s32.totalorder %s2242_s18, 4  ;;  %s2627_s0 = scalar_lea.sflag [#allocation9], %s471_s21 }
  0xcc   : > { %s2070_s12 = scalar_lea.hbm %s2615_s19, 256  ;;  %s2075_s15 = scalar_lea.hbm %s3000_s1, 1024 }
  0xcd   : > { %p2623_p8 = pnand %p3077_p4, %p2596_p10  ;;  %p2071_p0 = scmp.ne.s32.totalorder %s2615_s19, %s2070_s12 }
  0xce   : > { %p2076_p7 = scmp.lt.u32.totalorder %s2615_s19, %s3000_s1  ;;  %p2077_p9 = scmp.lt.u32.totalorder %s2075_s15, %s2070_s12 }
  0xcf   : > { %p2072_p5 = pneg %p2623_p8  ;;  %p2079_p10 = scmp.lt.u32.totalorder %s2070_s12, %s2615_s19 }
  0xd0   : > { %p2078_p6 = por %p2077_p9, %p2076_p7 }
  0xd1   : > { %p2073_p11 = pnand %p2072_p5, %p2071_p0 }
  0xd2   : > { %p2080_p12 = por %p2079_p10, %p2078_p6 }
  0xd3   : > { %p2074_p3 = pneg %p2073_p11 }
  0xd5   : > { %p2081_p1 = pnand %p2080_p12, %p2074_p3 }
  0xd7   : > { %2084 = shalt.err (!%p2081_p1)
}
  0xd8   : > { %s2085_s21 = scalar_lea.vmem %s2617_s7, 256  ;;  %s2259_s10 = smov [#allocation8]  }
  0xd9   : > { %p2086_p4 = scmp.ne.s32.totalorder %s2617_s7, %s2085_s21  ;;  %s2090_s20 = sshll.u32 %s2259_s10, 4  ;;  %s2091_s20 = int_to_ptr.vmem [resolvable:$false] %s2090_s20 }
  0xda   : > { %s2092_s6 = scalar_lea.vmem %s2091_s20, 512  ;;  %p2093_p2 = scmp.lt.s32.totalorder %s2617_s7, %s2091_s20 }
  0xdb   : > { %p2088_p0 = pnand %p2086_p4, %p2072_p5  ;;  %p2094_p7 = scmp.lt.s32.totalorder %s2092_s6, %s2085_s21 }
  0xdd   : > { %p2089_p11 = pneg %p2088_p0  ;;  %p2095_p9 = por %p2094_p7, %p2093_p2 }
  0xdf   : > { %p2096_p6 = pnand %p2095_p9, %p2089_p11 }
  0xe1   : > { %2099 = shalt.err (!%p2096_p6)
}
  0xe2   : > { %1760 = dma.hbm_to_vmem [thread:$0]  (!%p2623_p8), %s2615_s19, 256, %s2617_s7, %s2627_s0, %s3070_s13, %s3070_s13, %s3069_s28  }
  0xe3   : > { %p3079_p5 = scmp.ne.s32.totalorder %s3058_s23, 0 }
  0xe4   : > { %s498_s22 = sand.u32 (!%p3079_p5), 1, %s2218_s29  }
  0xe5   : > { %496 = sbr.rel (%p3079_p5) target bundleno = 2386 (0x952), region = 72  ;;  %s2661_s25 = sshll.u32 (!%p3079_p5), %s498_s22, 5 }
  0xe6   : > { %s499_s2 = scalar_lea.sflag (!%p3079_p5), [#allocation6], %s498_s22  ;;  %s502_s12 = scalar_lea.vmem (!%p3079_p5), [#allocation5], %s2661_s25 }
  0xec   : > { %2177 = dma.done.wait (%p2525_p13), %s499_s2, 512  }
  0xed   : > { %2179 = vsyncadd (%p2525_p13), %s499_s2, 4294966784  ;;  %s3080_s14 = sld [smem:[#allocation27_spill]]  ;;  %s3081_s11 = sld [smem:[#allocation24_spill]] }
  0xee   : > { %s3082_s19 = sld [smem:[#allocation28_spill]] }
  0xf3   : > { %s507_s28 = sand.u32 1, %s3080_s14   ;;  %s509_s23 = sand.u32 1, %s3081_s11  }
  0xf4   : > { %s2672_s13 = sshll.u32 %s509_s23, 4  ;;  %s508_s7 = scalar_lea.sflag [#allocation9], %s507_s28 }
  0xf5   : > { %s511_s0 = scalar_lea.vmem [#allocation8], %s2672_s13  ;;  %p3083_p2 = scmp.ne.s32.totalorder %s3082_s19, 0 }
  0xf7   : > { %2181 = dma.done.wait (%p3083_p2), %s508_s7, 256  }
  0xf8   : > { %2183 = vsyncadd (%p3083_p2), %s508_s7, 4294967040  ;;  %p3084_p8 = scmp.eq.s32.totalorder %s3080_s14, 0 }
  0xfa   : > { %2185 = dma.done.wait (%p3084_p8), [#allocation9], 512   ;;  %p3085_p13 = pmov %p3084_p8 }
  0xfb   : > { %p3086_p3 = pmov %p3084_p8 }
  0xfc   : > { %2187 = vsyncadd (%p3085_p13), [#allocation9], 4294966784 }
  0xfd   : > { %2189 = dma.done.wait (%p3086_p3), [#allocation12], 4096   ;;  %p3087_p10 = pmov %p3086_p3 }
  0xfe   : > { %p3088_p12 = pmov %p3086_p3 }
  0xff   : > { %2191 = vsyncadd (%p3087_p10), [#allocation12], 4294963200 }
 0x100   : > { %2193 = dma.done.wait (%p3088_p12), [#allocation15], 1024   ;;  %p3089_p1 = pmov %p3086_p3 }
 0x101   : > { %s2692_s4 = scalar_lea.vmem [#allocation16], %s2672_s13  ;;  %s3090_s26 = sld [smem:[#allocation25_spill]] }
 0x102   : > { %2195 = vsyncadd (%p3089_p1), [#allocation15], 4294966272 }
 0x107   : > { %p1549_p4 = scmp.ne.s32.totalorder %s3090_s26, 0 }
 0x108   : > { %s3091_s3 = sld [smem:[#allocation34_spill]] (!%p1549_p4)  ;;  %s3092_s20 = sld [smem:[#allocation35_spill]] (!%p1549_p4)  ;;  %v2705_v2 = vld [vmem:[#allocation11] sm:$0xff] (!%p1549_p4)  ;;  %v2707_v3 = vld [vmem:[#allocation11 + $0x8] sm:$0xf] (!%p1549_p4)  ;;  %v2709_v4 = vld [vmem:[#allocation11 + $0xc] sm:$0xff] (!%p1549_p4) }
 0x109   : > { %581 = sbr.rel (%p1549_p4) target bundleno = 832 (0x340), region = 100  ;;  %v2711_v5 = vld [vmem:[#allocation11 + $0x14] sm:$0xf] (!%p1549_p4)  ;;  %v2713_v6 = vld [vmem:[#allocation11 + $0x18] sm:$0xff] (!%p1549_p4)  ;;  %v2715_v7 = vld [vmem:[#allocation11 + $0x20] sm:$0xf] (!%p1549_p4) }
 0x10a   : > { %v2717_v8 = vld [vmem:[#allocation11 + $0x24] sm:$0xff] (!%p1549_p4)  ;;  %v2719_v9 = vld [vmem:[#allocation11 + $0x2c] sm:$0xf] (!%p1549_p4)  ;;  %v2721_v10 = vld [vmem:[#allocation11 + $0x30] sm:$0xff] (!%p1549_p4)  ;;  %s3093_s2 = sld [smem:[#allocation37_spill]] (!%p1549_p4)  ;;  %s2774_s14 = smov (!%p1549_p4), 0  }
 0x10b   : > { %v2723_v11 = vld [vmem:[#allocation11 + $0x38] sm:$0xf] (!%p1549_p4)  ;;  %v2725_v12 = vld [vmem:[#allocation11 + $0x3c] sm:$0xff] (!%p1549_p4)  ;;  %v2727_v13 = vld [vmem:[#allocation11 + $0x44] sm:$0xf] (!%p1549_p4) }
 0x10c   : > { %v2729_v14 = vld [vmem:[#allocation11 + $0x48] sm:$0xff] (!%p1549_p4)  ;;  %v2731_v15 = vld [vmem:[#allocation11 + $0x50] sm:$0xf] (!%p1549_p4)  ;;  %v2733_v16 = vld [vmem:[#allocation11 + $0x54] sm:$0xff] (!%p1549_p4) }
 0x10d   : > { %v2735_v17 = vld [vmem:[#allocation11 + $0x5c] sm:$0xf] (!%p1549_p4)  ;;  %v2737_v18 = vld [vmem:[#allocation11 + $0x60] sm:$0xff] (!%p1549_p4)  ;;  %v2739_v19 = vld [vmem:[#allocation11 + $0x68] sm:$0xf] (!%p1549_p4) }
 0x10e   : > { %v2698_v0 = vld [vmem:[%s3091_s3] ss:$0 sm:$0xff] (!%p1549_p4)  ;;  %v2743_v21 = vld [vmem:[#allocation11 + $0x74] sm:$0xf] (!%p1549_p4)  ;;  %v2745_v22 = vld [vmem:[#allocation11 + $0x78] sm:$0xff] (!%p1549_p4) }
 0x10f   : > { %v2703_v1 = vld [vmem:[%s3092_s20] ss:$0 sm:$0xff] (!%p1549_p4)  ;;  %v2747_v23 = vld [vmem:[#allocation11 + $0x80] sm:$0xf] (!%p1549_p4)  ;;  %v2749_v24 = vld [vmem:[#allocation11 + $0x84] sm:$0xff] (!%p1549_p4) }
 0x110   : > { %v2741_v20 = vld [vmem:[#allocation11 + $0x6c] sm:$0xff]  ;;  %v2755_v27 = vld [vmem:[#allocation11 + $0x98] sm:$0xf]  ;;  %v2757_v28 = vld [vmem:[#allocation11 + $0x9c] sm:$0xff] }
 0x111   : > { %v2751_v25 = vld [vmem:[#allocation11 + $0x8c] sm:$0xf]  ;;  %v2753_v26 = vld [vmem:[#allocation11 + $0x90] sm:$0xff]  ;;  %v2759_v29 = vld [vmem:[#allocation11 + $0xa4] sm:$0xf] }
 0x112   : > { %v2761_v30 = vld [vmem:[#allocation11 + $0xa8] sm:$0xff]  ;;  %v2763_v31 = vld [vmem:[#allocation11 + $0xb0] sm:$0xf]  ;;  %v2765_v32 = vld [vmem:[#allocation11 + $0xb4] sm:$0xff] }
 0x113   : > { %v2767_v33 = vld [vmem:[#allocation11 + $0xbc] sm:$0xf]  ;;  %v2772_v34 = vld [vmem:[%s3093_s2] sm:$0x7] }
 0x114 LB: >> { %s1550_s11 = sshll.u32 %s2246_s14, 4  ;;  %v1554_v45 = vcombine.high %v2705_v2, %v2709_v4  ;;  %v1553_v46 = vcombine.low %v2705_v2, %v2709_v4  ;;  %v1555_v47 = vcombine.low %v2707_v3, %v2711_v5  ;;  %v2260_v48 = vmov 0.0   ;;  %s622_s14 = sadd.s32 1, %s2246_s14   ;;  %s2246_s14 = sphi %s2774_s14, %s622_s14  }
 0x115   : >> { %s624_s19 = scalar_lea.vmem %s502_s12, %s1550_s11 [#allocation5]  ;;  %1643 = vmatprep.subr.bf16.mxu1 %v2260_v48  ;;  %v1557_v49 = vcombine.high %v2713_v6, %v2717_v8  ;;  %v1556_v50 = vcombine.low %v2713_v6, %v2717_v8  ;;  %v1558_v51 = vcombine.low %v2715_v7, %v2719_v9  ;;  %v1560_v52 = vcombine.high %v2721_v10, %v2725_v12  ;;  %s912_s28 = sshra.s32 %s1550_s11, 4 }
 0x116   : >> { %v625_v35 = vld [vmem:[%s624_s19] sm:$0xff]  ;;  %v626_v36 = vld [vmem:[%s624_s19 + $0x8] sm:$0xff]  ;;  %825 = vmatprep.subr.bf16.mxu0 %v1554_v45  ;;  %1644 = vmatpush3.bf16.msra.mxu1 %v1555_v47  ;;  %v1559_v53 = vcombine.low %v2721_v10, %v2725_v12  ;;  %v1561_v54 = vcombine.low %v2723_v11, %v2727_v13  ;;  %v1563_v55 = vcombine.high %v2729_v14, %v2733_v16  ;;  %v2261_v62 = vmov 0   ;;  %s1577_s7 = sshll.u32 %s912_s28, 3  ;;  %p619_p0 = scmp.ge.s32.totalorder %s622_s14, 2  }
 0x117   : >> { %627 = vadd.xlane.f32.xlu0 %v625_v35  ;;  %826 = vmatpush1.bf16.msra.mxu0 %v1553_v46  ;;  %v1562_v56 = vcombine.low %v2729_v14, %v2733_v16  ;;  %v1564_v57 = vcombine.low %v2731_v15, %v2735_v17  ;;  %v1566_v58 = vcombine.high %v2737_v18, %v2741_v20  ;;  %vm2262_vm0 = vmmov 0   ;;  %s923_s26 = scalar_lea.vmem [#allocation4], %s1577_s7  ;;  %s919_s15 = scalar_lea.vmem [#allocation3], %s1577_s7 }
 0x118   : >> { %1645 = vmatprep.subr.bf16.mxu1 %v2260_v48  ;;  %827 = vmatprep.subr.bf16.mxu0 %v1557_v49  ;;  %v1565_v59 = vcombine.low %v2737_v18, %v2741_v20  ;;  %v1567_v60 = vcombine.low %v2739_v19, %v2743_v21  ;;  %v1569_v61 = vcombine.high %v2745_v22, %v2749_v24  ;;  %s915_s8 = scalar_lea.vmem [#allocation2], %s1577_s7 }
 0x119   : >> { %857 = vmatprep.mubr.bf16.mxu0 %v2261_v62  ;;  %1659 = vmatprep.mubr.msk.bf16.mxu1 %vm2262_vm0, %v2260_v48  ;;  %v1568_v63 = vcombine.low %v2745_v22, %v2749_v24 }
 0x11a   : >> { %1646 = vmatpush3.bf16.msra.mxu1 %v1558_v51 }
 0x11b   : >> { %629 = vadd.xlane.f32.xlu0 %v626_v36  ;;  %828 = vmatpush1.bf16.msra.mxu0 %v1556_v50 }
 0x11c   : >> { %1647 = vmatprep.subr.bf16.mxu1 %v2260_v48  ;;  %829 = vmatprep.subr.bf16.mxu0 %v1560_v52 }
 0x11e   : >> { %1648 = vmatpush3.bf16.msra.mxu1 %v1561_v54 }
 0x11f   : >> { %830 = vmatpush1.bf16.msra.mxu0 %v1559_v53  ;;  %1649 = vmatprep.subr.bf16.mxu1 %v2260_v48 }
 0x120   : >> { %831 = vmatprep.subr.bf16.mxu0 %v1563_v55 }
 0x122   : >> { %1650 = vmatpush3.bf16.msra.mxu1 %v1564_v57 }
 0x123   : >> { %832 = vmatpush1.bf16.msra.mxu0 %v1562_v56  ;;  %1651 = vmatprep.subr.bf16.mxu1 %v2260_v48 }
 0x124   : >> { %833 = vmatprep.subr.bf16.mxu0 %v1566_v58 }
 0x126   : >> { %1652 = vmatpush3.bf16.msra.mxu1 %v1567_v60 }
 0x127   : >> { %834 = vmatpush1.bf16.msra.mxu0 %v1565_v59  ;;  %1653 = vmatprep.subr.bf16.mxu1 %v2260_v48 }
 0x128   : >> { %835 = vmatprep.subr.bf16.mxu0 %v1569_v61 }
 0x12b   : >> { %836 = vmatpush1.bf16.msra.mxu0 %v1568_v63 }
 0x1a4   : >> { %v628_v37 = vpop.xlane.xlu0 %627 }
 0x1a5   : >> { %v632_v38 = vmul.f32 0.0078125, %v628_v37  ;;  %v1571_v37 = vcombine.low %v2753_v26, %v2757_v28 }
 0x1a7   : >> { %v2784_v39 = vsub.f32 %v625_v35, %v632_v38  ;;  %v1570_v35 = vcombine.low %v2747_v23, %v2751_v25  ;;  %v1573_v38 = vcombine.low %v2755_v27, %v2759_v29 }
 0x1a8   : >> { %v630_v40 = vpop.xlane.xlu0 %629 }
 0x1a9   : >> { %v633_v41 = vmul.f32 0.0078125, %v630_v40  ;;  %v636_v42 = vmul.f32 %v2784_v39, %v2784_v39  ;;  %1654 = vmatpush3.bf16.msra.mxu1 %v1570_v35  ;;  %v1575_v40 = vcombine.high %v2761_v30, %v2765_v32 }
 0x1aa   : >> { %1655 = vmatprep.subr.bf16.mxu1 %v2260_v48 }
 0x1ab   : >> { %v2788_v43 = vsub.f32 %v626_v36, %v633_v41  ;;  %638 = vadd.xlane.f32.xlu1 %v636_v42  ;;  %v1572_v36 = vcombine.high %v2753_v26, %v2757_v28  ;;  %v1574_v41 = vcombine.low %v2761_v30, %v2765_v32  ;;  %v1576_v42 = vcombine.low %v2763_v31, %v2767_v33 }
 0x1ad   : >> { %v637_v44 = vmul.f32 %v2788_v43, %v2788_v43  ;;  %837 = vmatprep.subr.bf16.mxu0 %v1572_v36  ;;  %1656 = vmatpush3.bf16.msra.mxu1 %v1573_v38 }
 0x1ae   : >> { %838 = vmatpush1.bf16.msra.mxu0 %v1571_v37  ;;  %1657 = vmatprep.subr.bf16.mxu1 %v2260_v48 }
 0x1af   : >> { %640 = vadd.xlane.f32.xlu1 %v637_v44  ;;  %839 = vmatprep.subr.bf16.mxu0 %v1575_v40 }
 0x1b1   : >> { %1658 = vmatpush3.bf16.msra.mxu1 %v1576_v42 }
 0x1b2   : >> { %840 = vmatpush1.bf16.msra.mxu0 %v1574_v41  ;;  %v682_v41 = vlaneseq }
 0x1b4   : >> { %v683_v42 = vshrl.u32 %v682_v41, 7 }
 0x238   : >> { %v639_v44 = vpop.xlane.xlu1 %638 }
 0x239   : >> { %v642_v45 = vmul.f32 0.0078125, %v639_v44  ;;  %v684_v44 = vsub.s32 0, %v683_v42 }
 0x23b   : >> { %v644_v46 = vadd.f32 1e-12, %v642_v45  ;;  %v692_v45 = vsub.s32 2, %v683_v42 }
 0x23c   : >> { %v641_v47 = vpop.xlane.xlu1 %640 }
 0x23d   : >> { %1888 = vrsqrt.f32 %v644_v46  ;;  %v643_v49 = vmul.f32 0.0078125, %v641_v47  ;;  %vm648_vm1 = vcmp.eq.f32.partialorder %v644_v46, inf  ;;  %v651_v53 = vand.u32 2147483648, %v644_v46 }
 0x23e   : >> { %vm650_vm2 = vcmp.eq.f32.partialorder %v644_v46, 0.0 }
 0x23f   : >> { %v645_v50 = vadd.f32 1e-12, %v643_v49 }
 0x241   : >> { %1890 = vrsqrt.f32 %v645_v50  ;;  %vm655_vm3 = vcmp.eq.f32.partialorder %v645_v50, inf  ;;  %v658_v57 = vand.u32 2147483648, %v645_v50  ;;  %vm657_vm4 = vcmp.eq.f32.partialorder %v645_v50, 0.0 }
 0x247   : >> { %v1889_v51 = vpop.eup %1888 }
 0x248   : >> { %v647_v52 = vmul.f32 %v1889_v51, %v644_v46 }
 0x24a   : >> { %v649_v54 = vsel %vm648_vm1, %v644_v46, %v647_v52  ;;  %v685_v46 = vrot.slane %v2772_v34, %v684_v44 }
 0x24b   : >> { %v652_v55 = vsel %vm650_vm2, %v651_v53, %v649_v54  ;;  %v1891_v56 = vpop.eup %1890 }
 0x24c   : >> { %1892 = vrcp.f32 %v652_v55  ;;  %v654_v48 = vmul.f32 %v1891_v56, %v645_v50 }
 0x24e   : >> { %v656_v58 = vsel %vm655_vm3, %v645_v50, %v654_v48 }
 0x24f   : >> { %v659_v59 = vsel %vm657_vm4, %v658_v57, %v656_v58 }
 0x250   : >> { %1894 = vrcp.f32 %v659_v59 }
 0x256   : >> { %v1893_v60 = vpop.eup %1892 }
 0x257   : >> { %v661_v61 = vmul.f32 %v1893_v60, %v2784_v39  ;;  %v688_v39 = vsub.s32 1, %v683_v42 }
 0x259   : >> { %v670_v35 = vmul.f32 %v2698_v0, %v661_v61  ;;  %v689_v50 = vrot.slane %v2772_v34, %v688_v39 }
 0x25a   : >> { %v1895_v62 = vpop.eup %1894 }
 0x25b   : >> { %v663_v63 = vmul.f32 %v1895_v62, %v2788_v43  ;;  %v678_v37 = vadd.f32 %v2703_v1, %v670_v35  ;;  %v693_v43 = vrot.slane %v2772_v34, %v692_v45 }
 0x25d   : >> { %v671_v36 = vmul.f32 %v2698_v0, %v663_v63 }
 0x25f   : >> { %v679_v38 = vadd.f32 %v2703_v1, %v671_v36 }
 0x261   : >> { %v680_v40 = vpack.c.bf16 %v679_v38, %v678_v37 }
 0x263   : >> { %858 = vmatmul.mubr.bf16.vlgmr.msra.gmra.mrb[0].mxu0 %v680_v40  ;;  %1660 = vmatmul.mubr.bf16.vlgmr.msra.gmra.mrb[0].mxu1 %v680_v40 }
 0x336   : >> { %v859_v47 = vpop.f32.mrb[0].mxu0  ;;  %v902_v49 = vpop.f32.mrb[0].mxu1 }
 0x337   : >> { %v860_v51 = vadd.f32 %v859_v47, %v685_v46  ;;  %v861_v52 = vpop.f32.mrb[1].mxu0  ;;  %v1661_v53 = vpop.f32.mrb[1].mxu1  ;;  %v903_v56 = vadd.f32 %v902_v49, %v693_v43 }
 0x338   : >> { %v863_v54 = vpop.f32.mrb[2].mxu0  ;;  %v905_v55 = vpop.f32.mrb[2].mxu1  ;;  %v862_v60 = vadd.f32 %v861_v52, %v689_v50 }
 0x339   : >> { %v864_v48 = vadd.f32 %v863_v54, %v685_v46  ;;  %v906_v57 = vadd.f32 %v905_v55, %v693_v43  ;;  %v865_v58 = vpop.f32.mrb[3].mxu0  ;;  %v1662_v59 = vpop.f32.mrb[3].mxu1  ;;  %v909_v62 = vmul.f32 0.17677669, %v860_v51  ;;  %621 = sbr.rel (!%p619_p0) target bundleno = 276 (0x114), region = 163 }
 0x33a   : >> { %v866_v61 = vadd.f32 %v865_v58, %v689_v50 }
 0x33b   : >> { %v910_v63 = vmul.f32 0.17677669, %v864_v48  ;;  %v921_v35 = vpack.c.bf16 %v906_v57, %v903_v56 }
 0x33c   : >> { %v917_v36 = vpack.c.bf16 %v866_v61, %v862_v60 }
 0x33d   : >> { %v911_v37 = vpack.c.bf16 %v910_v63, %v909_v62  ;;  %924 = vst [vmem:[%s923_s26] sm:$0xff] %v921_v35 }
 0x33e   : >> { %920 = vst [vmem:[%s919_s15] sm:$0xff] %v917_v36 }
 0x33f   : >> { %916 = vst [vmem:[%s915_s8] sm:$0xff] %v911_v37 }
 0x340 PF: > { %s3094_s3 = sld [smem:[#allocation25_spill]]  ;;  %v2263_v40 = vmov 0.0   ;;  %vm2264_vm5 = vmmov 0   ;;  %vm983_vm6 = vcmask 261120   ;;  %v1007_v33 = vld [vmem:[%s511_s0] sm:$0xff]  ;;  %v1008_v41 = vld [vmem:[%s511_s0 + $0x8] sm:$0xff] }
 0x341   : > { %1663 = vmatprep.subr.bf16.mxu0 %v2263_v40  ;;  %1667 = vmatprep.mubr.msk.bf16.mxu0 %vm2264_vm5, %v2263_v40  ;;  %v1896_v55 = vld [vmem:[#allocation13] sm:$0xff]   ;;  %v1897_v56 = vld [vmem:[#allocation13 + $0x8] sm:$0xff]   ;;  %v1898_v48 = vld [vmem:[#allocation13 + $0x10] sm:$0xff]   ;;  %s3095_s6 = sld [smem:[#allocation38_spill]]  ;;  %s3096_s14 = sld [smem:[#allocation39_spill]] }
 0x342   : > { %1671 = vmatprep.subr.bf16.mxu1 %v2263_v40  ;;  %1675 = vmatprep.mubr.msk.bf16.mxu1 %vm2264_vm5, %v2263_v40  ;;  %v1899_v57 = vld [vmem:[#allocation13 + $0x18] sm:$0xff]   ;;  %v1900_v58 = vld [vmem:[#allocation13 + $0x20] sm:$0xff]   ;;  %v1901_v59 = vld [vmem:[#allocation13 + $0x28] sm:$0xff]   ;;  %s3097_s11 = sld [smem:[#allocation26_spill]]  ;;  %s1358_s0 = sshll.u32 %s2692_s4, 4  ;;  %s2931_s0 = int_to_ptr.vmem [resolvable:$true] %s1358_s0 }
 0x343   : > { %v1902_v60 = vld [vmem:[#allocation13 + $0x30] sm:$0xff]   ;;  %v1903_v61 = vld [vmem:[#allocation13 + $0x38] sm:$0xff]   ;;  %v1904_v62 = vld [vmem:[#allocation14] sm:$0xff]   ;;  %s3098_s7 = sld [smem:[#allocation41_spill]]  ;;  %s3102_s22 = sld [smem:[#allocation44_spill]] }
 0x344   : > { %v1009_v24 = vld [vmem:[#allocation4] sm:$0xff]  ;;  %v1010_v25 = vld [vmem:[#allocation4 + $0x8] sm:$0xff]  ;;  %v1905_v63 = vld [vmem:[#allocation14 + $0x8] sm:$0xff]   ;;  %s2265_s19 = smov [#allocation16]  }
 0x345   : > { %v931_v38 = vld [vmem:[#allocation3] sm:$0xff]  ;;  %v932_v0 = vld [vmem:[#allocation3 + $0x8] sm:$0xff]  ;;  %1672 = vmatpush3.bf16.msra.mxu1 %v1009_v24  ;;  %v1906_v35 = vld [vmem:[#allocation14 + $0x10] sm:$0xff]   ;;  %s2104_s28 = sshll.u32 %s2265_s19, 4  ;;  %s2105_s28 = int_to_ptr.vmem [resolvable:$false] %s2104_s28 }
 0x346   : > { %s1580_s21 = sshll.u32 %s3094_s3, 4  ;;  %1664 = vmatpush3.bf16.xpose.msra.mxu0 %v931_v38  ;;  %1673 = vmatprep.subr.bf16.mxu1 %v2263_v40  ;;  %v1907_v36 = vld [vmem:[#allocation14 + $0x18] sm:$0xff]   ;;  %v1908_v37 = vld [vmem:[#allocation14 + $0x20] sm:$0xff]   ;;  %v1909_v38 = vld [vmem:[#allocation14 + $0x28] sm:$0xff]   ;;  %s1604_s26 = sshll.u32 %s3094_s3, 1 }
 0x347   : > { %s926_s10 = sshra.s32 %s1580_s21, 4  ;;  %1665 = vmatprep.subr.bf16.mxu0 %v2263_v40  ;;  %s974_s12 = scalar_lea.vmem [#allocation10], %s1580_s21 }
 0x348   : > { %s1581_s20 = sshll.u32 %s926_s10, 3  ;;  %v975_v2 = vld [vmem:[%s974_s12] sm:$0xff]  ;;  %v976_v4 = vld [vmem:[%s974_s12 + $0x8] sm:$0xff]  ;;  %s1605_s15 = sshll.u32 %s3097_s11, 2 }
 0x349   : > { %s929_s25 = scalar_lea.vmem [#allocation2], %s1581_s20  ;;  %1674 = vmatpush3.bf16.msra.mxu1 %v1010_v25  ;;  %s3099_s10 = sld [smem:[#allocation43_spill]] }
 0x34a   : > { %v930_v1 = vld [vmem:[%s929_s25] sm:$0xff]  ;;  %1679 = vmatprep.subr.bf16.mxu1 %v2263_v40  ;;  %s1355_s25 = sadd.s32 %s1605_s15, %s1604_s26  ;;  %s3101_s12 = sld [smem:[#allocation31_spill]] }
 0x34b   : > { %s1606_s13 = sshll.u32 %s1355_s25, 7  ;;  %s2100_s11 = scalar_lea.vmem %s2931_s0, 256 }
 0x34c   : > { %s2929_s2 = scalar_lea.hbm %s3102_s22, %s1606_s13  ;;  %p2101_p11 = scmp.ne.s32.totalorder %s2931_s0, %s2100_s11 }
 0x34d   : > { %p2107_p5 = scmp.lt.s32.totalorder %s2931_s0, %s2105_s28 }
 0x34e   : > { %1666 = vmatpush3.bf16.xpose.msra.mxu0 %v932_v0 }
 0x34f   : > { %1699 = vmatprep.subr.bf16.mxu0 %v2263_v40 }
 0x350   : > { %p3103_p7 = scmp.ne.s32.totalorder %s3101_s12, 0 }
 0x352   : > { %p2102_p9 = pnand %p2101_p11, %p3103_p7 }
 0x354   : > { %p2103_p6 = pneg %p2102_p9 }
 0x355   : > { %1668 = vmatmul.mubr.bf16.vlgmr.msra.gmra.mrb[0].mxu0 %v930_v1 }
 0x356   : > { %1715 = vmatprep.mubr.msk.bf16.mxu0 %vm2264_vm5, %v2263_v40  ;;  %1700 = vmatpush3.bf16.msra.mxu0 %v1904_v62 }
 0x357   : > { %1701 = vmatprep.subr.bf16.mxu0 %v2263_v40 }
 0x35a   : > { %1702 = vmatpush3.bf16.msra.mxu0 %v1905_v63 }
 0x35b   : > { %1703 = vmatprep.subr.bf16.mxu0 %v2263_v40 }
 0x35e   : > { %1704 = vmatpush3.bf16.msra.mxu0 %v1906_v35 }
 0x35f   : > { %1705 = vmatprep.subr.bf16.mxu0 %v2263_v40 }
 0x362   : > { %1706 = vmatpush3.bf16.msra.mxu0 %v1907_v36 }
 0x363   : > { %1707 = vmatprep.subr.bf16.mxu0 %v2263_v40 }
 0x366   : > { %1708 = vmatpush3.bf16.msra.mxu0 %v1908_v37 }
 0x367   : > { %1709 = vmatprep.subr.bf16.mxu0 %v2263_v40 }
 0x36a   : > { %1710 = vmatpush3.bf16.msra.mxu0 %v1909_v38 }
 0x36b   : > { %1711 = vmatprep.subr.bf16.mxu0 %v2263_v40 }
 0x428   : > { %v967_v3 = vpop.f32.mrb[0].mxu0 }
 0x429   : > { %v977_v5 = vmul.f32 %v975_v2, %v967_v3  ;;  %v1669_v6 = vpop.f32.mrb[1].mxu0 }
 0x42a   : > { %v970_v7 = vpop.f32.mrb[2].mxu0 }
 0x42b   : > { %v978_v8 = vmul.f32 %v976_v4, %v970_v7  ;;  %v1670_v9 = vpop.f32.mrb[3].mxu0  ;;  %vm979_vm7 = vcmp.lt.f32.partialorder %v977_v5, 0.001 }
 0x42c   : > { %v981_v10 = vsel %vm979_vm7, -10000.0, %v977_v5 }
 0x42d   : > { %v984_v11 = vsel %vm983_vm6, %v981_v10, -inf  ;;  %vm980_vm8 = vcmp.lt.f32.partialorder %v978_v8, 0.001 }
 0x42e   : > { %985 = vmax.xlane.f32.xlu0 %v984_v11  ;;  %v982_v12 = vsel %vm980_vm8, -10000.0, %v978_v8 }
 0x42f   : > { %v987_v13 = vsel %vm983_vm6, %v982_v12, -inf }
 0x432   : > { %988 = vmax.xlane.f32.xlu0 %v987_v13 }
 0x4bb   : > { %v986_v14 = vpop.xlane.xlu0 %985 }
 0x4bc   : > { %v990_v15 = vsub.f32 %v981_v10, %v986_v14 }
 0x4be   : > { %v992_v16 = vmul.f32 1.442695, %v990_v15 }
 0x4bf   : > { %v989_v17 = vpop.xlane.xlu0 %988 }
 0x4c0   : > { %1912 = vpow2.f32 %v992_v16  ;;  %v991_v18 = vsub.f32 %v982_v12, %v989_v17  ;;  %v1583_v17 = vld [vmem:[%s3095_s6] ss:$0 sm:$0xff] }
 0x4c2   : > { %v994_v19 = vmul.f32 1.442695, %v991_v18 }
 0x4c4   : > { %1914 = vpow2.f32 %v994_v19 }
 0x4ca   : > { %v1913_v20 = vpop.eup %1912 }
 0x4cb   : > { %v996_v21 = vsel %vm983_vm6, %v1913_v20, 0.0 }
 0x4cc   : > { %997 = vadd.xlane.f32.xlu1 %v996_v21 }
 0x4ce   : > { %v1915_v22 = vpop.eup %1914 }
 0x4cf   : > { %v999_v23 = vsel %vm983_vm6, %v1915_v22, 0.0 }
 0x4d0   : > { %1000 = vadd.xlane.f32.xlu1 %v999_v23 }
 0x559   : > { %v998_v26 = vpop.xlane.xlu1 %997 }
 0x55a   : > { %1916 = vrcp.f32 %v998_v26 }
 0x55d   : > { %v1001_v27 = vpop.xlane.xlu1 %1000 }
 0x55e   : > { %1918 = vrcp.f32 %v1001_v27  ;;  %v1910_v27 = vld [vmem:[#allocation14 + $0x30] sm:$0xff]  }
 0x55f   : > { %1712 = vmatpush3.bf16.msra.mxu0 %v1910_v27 }
 0x560   : > { %1713 = vmatprep.subr.bf16.mxu0 %v2263_v40 }
 0x564   : > { %v1917_v28 = vpop.eup %1916 }
 0x565   : > { %v1004_v30 = vmul.f32 %v1917_v28, %v1913_v20  ;;  %v1911_v28 = vld [vmem:[#allocation14 + $0x38] sm:$0xff]  }
 0x566   : > { %1714 = vmatpush3.bf16.msra.mxu0 %v1911_v28 }
 0x568   : > { %v1919_v29 = vpop.eup %1918 }
 0x569   : > { %v1005_v31 = vmul.f32 %v1919_v29, %v1915_v22  ;;  %v1584_v22 = vld [vmem:[%s3096_s14] ss:$0 sm:$0xff]  ;;  %s2938_s14 = scalar_lea.sflag [#allocation7], %s509_s23 }
 0x56a   : > { %v1585_v29 = vld [vmem:[%s3098_s7] ss:$0 sm:$0xff]  ;;  %s2106_s7 = scalar_lea.vmem %s2105_s28, 512 }
 0x56b   : > { %v1006_v32 = vpack.c.bf16 %v1005_v31, %v1004_v30  ;;  %p2108_p2 = scmp.lt.s32.totalorder %s2106_s7, %s2100_s11 }
 0x56d   : > { %1676 = vmatmul.mubr.msk.bf16.vlgmr.msra.gmra.mrb[0].mxu1 %vm983_vm6, %v1006_v32  ;;  %p2109_p8 = por %p2108_p2, %p2107_p5 }
 0x56e   : > { %1695 = vmatprep.mubr.msk.bf16.mxu1 %vm2264_vm5, %v2263_v40  ;;  %1680 = vmatpush3.bf16.msra.mxu1 %v1896_v55 }
 0x56f   : > { %1681 = vmatprep.subr.bf16.mxu1 %v2263_v40  ;;  %p2110_p13 = pnand %p2109_p8, %p2103_p6 }
 0x572   : > { %1682 = vmatpush3.bf16.msra.mxu1 %v1897_v56 }
 0x573   : > { %1683 = vmatprep.subr.bf16.mxu1 %v2263_v40 }
 0x576   : > { %1684 = vmatpush3.bf16.msra.mxu1 %v1898_v48 }
 0x577   : > { %1685 = vmatprep.subr.bf16.mxu1 %v2263_v40 }
 0x57a   : > { %1686 = vmatpush3.bf16.msra.mxu1 %v1899_v57 }
 0x57b   : > { %1687 = vmatprep.subr.bf16.mxu1 %v2263_v40 }
 0x57e   : > { %1688 = vmatpush3.bf16.msra.mxu1 %v1900_v58 }
 0x57f   : > { %1689 = vmatprep.subr.bf16.mxu1 %v2263_v40 }
 0x582   : > { %1690 = vmatpush3.bf16.msra.mxu1 %v1901_v59 }
 0x583   : > { %1691 = vmatprep.subr.bf16.mxu1 %v2263_v40 }
 0x586   : > { %1692 = vmatpush3.bf16.msra.mxu1 %v1902_v60 }
 0x587   : > { %1693 = vmatprep.subr.bf16.mxu1 %v2263_v40  ;;  %v1594_v40 = vld [vmem:[%s3099_s10] ss:$0 sm:$0xff] }
 0x58a   : > { %1694 = vmatpush3.bf16.msra.mxu1 %v1903_v61 }
 0x640   : > { %v1048_v34 = vpop.f32.mrb[0].mxu1 }
 0x641   : > { %v2878_v42 = vadd.f32 %v1048_v34, %v1007_v33  ;;  %v1677_v44 = vpop.f32.mrb[1].mxu1 }
 0x642   : > { %v1051_v45 = vpop.f32.mrb[2].mxu1 }
 0x643   : > { %v2880_v39 = vadd.f32 %v1051_v45, %v1008_v41  ;;  %1057 = vadd.xlane.f32.xlu0 %v2878_v42  ;;  %v1678_v46 = vpop.f32.mrb[3].mxu1 }
 0x645   : > { %1059 = vadd.xlane.f32.xlu1 %v2880_v39 }
 0x6d0   : > { %v1058_v43 = vpop.xlane.xlu0 %1057 }
 0x6d1   : > { %v1062_v47 = vmul.f32 0.0078125, %v1058_v43 }
 0x6d2   : > { %v1060_v49 = vpop.xlane.xlu1 %1059 }
 0x6d3   : > { %v2885_v50 = vsub.f32 %v2878_v42, %v1062_v47  ;;  %v1063_v51 = vmul.f32 0.0078125, %v1060_v49 }
 0x6d5   : > { %v2888_v52 = vsub.f32 %v2880_v39, %v1063_v51  ;;  %v1066_v53 = vmul.f32 %v2885_v50, %v2885_v50 }
 0x6d7   : > { %1068 = vadd.xlane.f32.xlu0 %v1066_v53  ;;  %v1067_v54 = vmul.f32 %v2888_v52, %v2888_v52 }
 0x6d9   : > { %1070 = vadd.xlane.f32.xlu1 %v1067_v54 }
 0x764   : > { %v1069_v0 = vpop.xlane.xlu0 %1068 }
 0x765   : > { %v1072_v1 = vmul.f32 0.0078125, %v1069_v0 }
 0x766   : > { %v1071_v2 = vpop.xlane.xlu1 %1070 }
 0x767   : > { %v1074_v3 = vadd.f32 1e-12, %v1072_v1  ;;  %v1073_v4 = vmul.f32 0.0078125, %v1071_v2 }
 0x769   : > { %1920 = vrsqrt.f32 %v1074_v3  ;;  %v1075_v5 = vadd.f32 1e-12, %v1073_v4  ;;  %vm1078_vm9 = vcmp.eq.f32.partialorder %v1074_v3, inf  ;;  %v1081_v8 = vand.u32 2147483648, %v1074_v3 }
 0x76a   : > { %vm1080_vm10 = vcmp.eq.f32.partialorder %v1074_v3, 0.0 }
 0x76b   : > { %1922 = vrsqrt.f32 %v1075_v5  ;;  %vm1085_vm11 = vcmp.eq.f32.partialorder %v1075_v5, inf  ;;  %v1088_v13 = vand.u32 2147483648, %v1075_v5  ;;  %vm1087_vm12 = vcmp.eq.f32.partialorder %v1075_v5, 0.0 }
 0x773   : > { %v1921_v6 = vpop.eup %1920 }
 0x774   : > { %v1077_v7 = vmul.f32 %v1921_v6, %v1074_v3 }
 0x775   : > { %v1923_v9 = vpop.eup %1922 }
 0x776   : > { %v1079_v10 = vsel %vm1078_vm9, %v1074_v3, %v1077_v7  ;;  %v1084_v12 = vmul.f32 %v1923_v9, %v1075_v5 }
 0x777   : > { %v1082_v11 = vsel %vm1080_vm10, %v1081_v8, %v1079_v10 }
 0x778   : > { %1924 = vrcp.f32 %v1082_v11  ;;  %v1086_v14 = vsel %vm1085_vm11, %v1075_v5, %v1084_v12 }
 0x779   : > { %v1089_v15 = vsel %vm1087_vm12, %v1088_v13, %v1086_v14 }
 0x77a   : > { %1926 = vrcp.f32 %v1089_v15 }
 0x782   : > { %v1925_v16 = vpop.eup %1924 }
 0x783   : > { %v1091_v18 = vmul.f32 %v1925_v16, %v2885_v50 }
 0x784   : > { %v1927_v19 = vpop.eup %1926 }
 0x785   : > { %v1093_v20 = vmul.f32 %v1927_v19, %v2888_v52  ;;  %v1100_v21 = vmul.f32 %v1583_v17, %v1091_v18 }
 0x787   : > { %v1101_v23 = vmul.f32 %v1583_v17, %v1093_v20  ;;  %v1108_v24 = vadd.f32 %v1584_v22, %v1100_v21 }
 0x789   : > { %v1109_v25 = vadd.f32 %v1584_v22, %v1101_v23 }
 0x78b   : > { %v1110_v26 = vpack.c.bf16 %v1109_v25, %v1108_v24 }
 0x78d   : > { %1696 = vmatmul.mubr.bf16.vlgmr.msra.gmra.mrb[4].mxu1 %v1110_v26 }
 0x860   : > { %v1216_v30 = vpop.f32.mrb[4].mxu1 }
 0x861   : > { %v1217_v31 = vadd.f32 %v1585_v29, %v1216_v30  ;;  %v1697_v32 = vpop.f32.mrb[5].mxu1 }
 0x862   : > { %v1219_v33 = vpop.f32.mrb[6].mxu1 }
 0x863   : > { %v1220_v34 = vadd.f32 %v1585_v29, %v1219_v33  ;;  %v1698_v41 = vpop.f32.mrb[7].mxu1  ;;  %v1223_v44 = vmax.f32 %v1217_v31, 0.0 }
 0x865   : > { %v1224_v45 = vmax.f32 %v1220_v34, 0.0 }
 0x867   : > { %v1225_v46 = vpack.c.bf16 %v1224_v45, %v1223_v44 }
 0x869   : > { %1716 = vmatmul.mubr.bf16.vlgmr.msra.gmra.mrb[4].mxu0 %v1225_v46 }
 0x93c   : > { %v1331_v43 = vpop.f32.mrb[4].mxu0 }
 0x93d   : > { %v1332_v47 = vadd.f32 %v1594_v40, %v1331_v43  ;;  %v1717_v49 = vpop.f32.mrb[5].mxu0 }
 0x93e   : > { %v1334_v50 = vpop.f32.mrb[6].mxu0 }
 0x93f   : > { %v1338_v51 = vadd.f32 %v1332_v47, %v2878_v42  ;;  %v1335_v52 = vadd.f32 %v1594_v40, %v1334_v50  ;;  %v1718_v53 = vpop.f32.mrb[7].mxu0 }
 0x941   : > { %1340 = vst [vmem:[%s2692_s4] sm:$0xff] %v1338_v51  ;;  %v1339_v54 = vadd.f32 %v1335_v52, %v2880_v39 }
 0x943   : > { %1341 = vst [vmem:[%s2692_s4 + $0x8] sm:$0xff] %v1339_v54 }
 0x944   : > { %2113 = shalt.err (!%p2110_p13)
}
 0x945   : > { %s2114_s23 = scalar_lea.hbm %s2929_s2, 256  ;;  %s2118_s15 = scalar_lea.hbm %s3102_s22, 1024 }
 0x946   : > { %p2115_p3 = scmp.ne.s32.totalorder %s2929_s2, %s2114_s23  ;;  %p2119_p1 = scmp.lt.u32.totalorder %s2929_s2, %s3102_s22 }
 0x947   : > { %p2120_p4 = scmp.lt.u32.totalorder %s2118_s15, %s2114_s23  ;;  %p2122_p11 = scmp.lt.u32.totalorder %s2114_s23, %s2929_s2 }
 0x948   : > { %p2116_p10 = pnand %p2115_p3, %p3103_p7 }
 0x949   : > { %p2121_p0 = por %p2120_p4, %p2119_p1 }
 0x94a   : > { %p2117_p12 = pneg %p2116_p10 }
 0x94b   : > { %p2123_p9 = por %p2122_p11, %p2121_p0 }
 0x94d   : > { %p2124_p6 = pnand %p2123_p9, %p2117_p12 }
 0x94f   : > { %2127 = shalt.err (!%p2124_p6)
}
 0x950   : > { %s2266_s10 = smov 128   ;;  %s2267_s20 = smov 8  }
 0x951   : > { %1739 = dma.vmem_to_hbm [thread:$0]  (%p3103_p7), %s2931_s0, 256, %s2929_s2, %s2938_s14, %s2266_s10, %s2266_s10, %s2267_s20  }
 0x952 PF: > { %s3104_s25 = sld [smem:[#allocation23_spill]]  ;;  %s3105_s13 = sld [smem:[#allocation29_spill]] }
 0x953   : > { %p1774_p5 = scmp.ge.s32.totalorder %s2242_s18, 2 }
 0x958   : > { %s1373_s3 = sand.u32 1, %s3104_s25   ;;  %p3106_p2 = scmp.ne.s32.totalorder %s3105_s13, 0 }
 0x959   : > { %s1374_s6 = scalar_lea.sflag [#allocation7], %s1373_s3 }
 0x95a   : > { %p1762_p8 = pnand %p1774_p5, %p3106_p2 }
 0x95c   : > { %2197 = dma.done.wait (!%p1762_p8), %s1374_s6, 256  }
 0x95d   : > { %2199 = vsyncadd (!%p1762_p8), %s1374_s6, 4294967040  ;;  %s34_s18 = sadd.s32 1, %s2242_s18   ;;  %s3107_s25 = sld [smem:[#allocation24_spill]] }
 0x95e   : > { %p31_p13 = scmp.ge.s32.totalorder %s34_s18, 6   ;;  %s3108_s12 = sld [smem:[#allocation30_spill]] }
 0x95f   : > { %s3109_s26 = smov %s2210_s27  ;;  %s3110_s27 = smov %s2610_s9 }
 0x960   : > { %s3111_s28 = smov %s2218_s29  ;;  %s3112_s29 = smov %s2222_s30 }
 0x961   : > { %s3113_s30 = smov %s2607_s5  ;;  %s3114_s14 = smov %s2234_s16 }
 0x962   : > { %s3115_s15 = smov %s2238_s17  ;;  %s3117_s17 = smov %s3123_s24 }
 0x963   :  { %33 = sbr.rel (!%p31_p13) target bundleno = 27 (0x1b), region = 174 }
 0x964   : > { %s3116_s16 = smov %s3108_s12 }
 0x96a   :  { %1379 = vsyncpa [#allocation6], 1 }
 0x96b   :  { %1381 = vsyncpa [#allocation6 + $0x1], 1 }
 0x96c   :  { %1382 = vsyncpa [#allocation9], 1 }
 0x96d   :  { %1384 = vsyncpa [#allocation9 + $0x1], 1 }
 0x96e   :  { %1385 = vsyncpa [#allocation12], 1 }
 0x96f   :  { %1386 = vsyncpa [#allocation15], 1 }
 0x970   :  { %1387 = vsyncpa [#allocation7], 1 }
 0x971   :  { %1389 = vsyncpa [#allocation7 + $0x1], 1 }

</bundles_post_ra>
